<compile_context>
chip_gen: v6e
topology: v6e:2x2x1
jax: 0.10.0
libtpu: 0.0.40
codegen_flags: <defaults>
</compile_context>

<pallas_src>
import numpy as np
import jax
import jax.numpy as jnp
from jax import lax
from jax.experimental import pallas as pl
from jax.experimental.pallas import tpu as pltpu

# Module config (matches AbstractAction.__init__ semantics)
N_LOW_LEVEL_ACTIONS = 4
N_TRANSITIONS = 3
N_ACTION_OPTIONS = N_LOW_LEVEL_ACTIONS + 1        # 5 (last id is the stop token)
N_TRANSITION_OPTIONS = N_TRANSITIONS + 1          # 4

LANES = 128
BATCH = 8            # independent samplers packed along sublanes (multiple of 8)
# TODO(synk): the PyTorch forward loops until the stop token is drawn
# (unbounded, data-dependent); here the draw count is capped at MAX_STEPS
# (P(no stop in 32 draws) ~ 0.1% for ~N(0,1) logits).
MAX_STEPS = 32
NEG_INF = -1e9


def abstract_action_kernel(act_ref, trans_ref, u_act_ref, u_trans_ref,
                           tokens_ref, meta_ref):
    B = act_ref.shape[0]
    act = act_ref[...]          # (B, L) f32, padded with NEG_INF past the vocab
    trans = trans_ref[...]      # (B, L)

    def gumbel(u):
        u = jnp.maximum(u, 1e-12)
        return -jnp.log(-jnp.log(u))

    lane2 = lax.broadcasted_iota(jnp.int32, (B, LANES), 1)
    lane3 = lax.broadcasted_iota(jnp.int32, (B, MAX_STEPS, LANES), 2)
    step3 = lax.broadcasted_iota(jnp.int32, (B, MAX_STEPS, LANES), 1)
    step_col = lax.broadcasted_iota(jnp.int32, (B, MAX_STEPS, 1), 1)

    # --- action sampling: all MAX_STEPS Gumbel-max draws at once -------------
    # loop-invariant logsumexp, computed exactly once per row (hoisted)
    m_a = jnp.max(act, axis=-1, keepdims=True)
    lse_a = m_a + jnp.log(jnp.sum(jnp.exp(act - m_a), axis=-1, keepdims=True))   # (B,1)

    g_act = gumbel(u_act_ref[...])                       # (B, S, L)  batched noise
    scores = act[:, None, :] + g_act                     # (B, S, L)
    row_max = jnp.max(scores, axis=-1, keepdims=True)    # (B, S, 1)
    winner = scores >= row_max                           # shared mask (one lane/row)
    tok = jnp.max(jnp.where(winner, lane3, -1), axis=-1, keepdims=True)          # (B,S,1)
    logit_at_tok = jnp.max(jnp.where(winner, act[:, None, :], NEG_INF),
                           axis=-1, keepdims=True)                               # (B,S,1)
    lp = logit_at_tok - lse_a[:, None, :]                # per-draw log-prob     (B,S,1)

    is_stop = tok == (N_ACTION_OPTIONS - 1)                                      # (B,S,1)
    first_stop = jnp.min(jnp.where(is_stop, step_col, MAX_STEPS),
                         axis=1, keepdims=True)                                  # (B,1,1)
    taken = step_col <= first_stop        # draws up to and including the stop token
    total_lp = jnp.sum(jnp.where(taken, lp, 0.0), axis=1)                        # (B,1)
    count = first_stop[:, :, 0]           # number of recorded (non-stop) tokens (B,1)

    # scatter recorded tokens: lane s holds the token drawn at step s (s < count)
    valid = jnp.logical_and(taken, jnp.logical_not(is_stop))                     # (B,S,1)
    placed = jnp.where(jnp.logical_and(step3 == lane3, valid), tok, -1)          # (B,S,L)
    tokens_ref[...] = jnp.max(placed, axis=1)                                    # (B,L)

    # --- transition sampling: a single Gumbel-max draw per row ---------------
    m_t = jnp.max(trans, axis=-1, keepdims=True)
    lse_t = m_t + jnp.log(jnp.sum(jnp.exp(trans - m_t), axis=-1, keepdims=True)) # (B,1)
    t_scores = trans + gumbel(u_trans_ref[...])                                  # (B,L)
    t_max = jnp.max(t_scores, axis=-1, keepdims=True)
    t_win = t_scores >= t_max
    next_tok = jnp.max(jnp.where(t_win, lane2, -1), axis=-1, keepdims=True)      # (B,1)
    t_logit = jnp.max(jnp.where(t_win, trans, NEG_INF), axis=-1, keepdims=True)
    total_lp = total_lp + (t_logit - lse_t)                                      # (B,1)

    meta_ref[...] = jnp.where(lane2 == 0, count.astype(jnp.float32),
                    jnp.where(lane2 == 1, next_tok.astype(jnp.float32),
                    jnp.where(lane2 == 2, total_lp, 0.0)))


def _pad_lanes(v, batch):
    row = jnp.full((LANES,), NEG_INF, jnp.float32).at[: v.shape[0]].set(
        v.astype(jnp.float32))
    return jnp.tile(row[None, :], (batch, 1))


def abstract_action_call(noise_key, action_params, transition_params, batch=BATCH):
    act_pad = _pad_lanes(action_params, batch)
    trans_pad = _pad_lanes(transition_params, batch)
    k_act, k_trans = jax.random.split(noise_key)
    u_act = jax.random.uniform(k_act, (batch, MAX_STEPS, LANES), dtype=jnp.float32)
    u_trans = jax.random.uniform(k_trans, (batch, LANES), dtype=jnp.float32)

    vmem = pl.BlockSpec(memory_space=pltpu.MemorySpace.VMEM)
    tokens, meta = pl.pallas_call(
        abstract_action_kernel,
        out_shape=(
            jax.ShapeDtypeStruct((batch, LANES), jnp.int32),
            jax.ShapeDtypeStruct((batch, LANES), jnp.float32),
        ),
        in_specs=[vmem, vmem, vmem, vmem],
        out_specs=(vmem, vmem),
    )(act_pad, trans_pad, u_act, u_trans)
    return tokens, meta, (u_act, u_trans)


def unpack_sample(tokens, meta, row=0, name="op"):
    n_tokens = int(meta[row, 0])
    return {
        "tokens": [int(t) for t in np.asarray(tokens[row, :n_tokens])],
        "next_state": int(meta[row, 1]),
        "logprob": float(meta[row, 2]),
        "AbstractActionName": name,
    }


def reference_forward(action_params, transition_params, u_act, u_trans):
    """Faithful sequential reference (same noise, same Gumbel-max math)."""
    a = np.asarray(action_params, np.float32)
    t = np.asarray(transition_params, np.float32)
    ua = np.asarray(u_act, np.float32)
    ut = np.asarray(u_trans, np.float32)

    def gum(u):
        u = np.maximum(u, 1e-12)
        return -np.log(-np.log(u))

    def log_softmax(x):
        m = x.max()
        return x - (m + np.log(np.exp(x - m).sum()))

    la, lt = log_softmax(a), log_softmax(t)
    out = []
    for b in range(ua.shape[0]):
        tokens, total = [], 0.0
        for s in range(ua.shape[1]):
            tok = int(np.argmax(a + gum(ua[b, s, : a.shape[0]])))
            total += float(la[tok])
            if tok == a.shape[0] - 1:
                break
            tokens.append(tok)
        nxt = int(np.argmax(t + gum(ut[b, : t.shape[0]])))
        total += float(lt[nxt])
        out.append({"tokens": tokens, "next_state": nxt, "logprob": total})
    return out


if __name__ == "__main__":
    key = jax.random.PRNGKey(0)
    k_act, k_trans, k_noise = jax.random.split(key, 3)
    # deterministic "randn" parameter init (shapes from __init__)
    action_params = jax.random.normal(k_act, (N_ACTION_OPTIONS,), dtype=jnp.float32)
    transition_params = jax.random.normal(k_trans, (N_TRANSITION_OPTIONS,), dtype=jnp.float32)

    tokens, meta, (u_act, u_trans) = abstract_action_call(
        k_noise, action_params, transition_params, batch=BATCH)
    jax.block_until_ready((tokens, meta))

    ref = reference_forward(action_params, transition_params, u_act, u_trans)
    tokens_np, meta_np = np.asarray(tokens), np.asarray(meta)
    for b in range(BATCH):
        got = unpack_sample(tokens_np, meta_np, row=b)
        assert got["tokens"] == ref[b]["tokens"], (b, got, ref[b])
        assert got["next_state"] == ref[b]["next_state"], (b, got, ref[b])
        assert abs(got["logprob"] - ref[b]["logprob"]) < 2e-3, (b, got, ref[b])
        assert 0 <= got["next_state"] < N_TRANSITION_OPTIONS
        assert all(0 <= tk < N_ACTION_OPTIONS - 1 for tk in got["tokens"])
        assert np.all(tokens_np[b, len(got["tokens"]):] == -1)
        assert np.isfinite(got["logprob"])
    print("KERNEL_OK")
</pallas_src>

<mosaic_0001>
module attributes {stable_mosaic.version = 11 : i64} {
  func.func @abstract_action_kernel(%arg0: memref<8x128xf32, #tpu.memory_space<vmem>>, %arg1: memref<8x128xf32, #tpu.memory_space<vmem>>, %arg2: memref<8x32x128xf32, #tpu.memory_space<vmem>>, %arg3: memref<8x128xf32, #tpu.memory_space<vmem>>, %arg4: memref<8x128xi32, #tpu.memory_space<vmem>>, %arg5: memref<8x128xf32, #tpu.memory_space<vmem>>) attributes {dimension_semantics = [], scalar_prefetch = 0 : i64, scratch_operands = 0 : i64, tpu.core_type = #tpu.core_type<tc>} {
    %c0 = arith.constant 0 : index
    %c0_0 = arith.constant 0 : index
    %0 = vector.load %arg0[%c0, %c0_0] : memref<8x128xf32, #tpu.memory_space<vmem>>, vector<8x128xf32>
    %c0_1 = arith.constant 0 : index
    %c0_2 = arith.constant 0 : index
    %1 = vector.load %arg1[%c0_1, %c0_2] : memref<8x128xf32, #tpu.memory_space<vmem>>, vector<8x128xf32>
    %2 = tpu.iota {dimensions = array<i32: 1>} : vector<8x128xi32>
    %3 = tpu.iota {dimensions = array<i32: 2>} : vector<8x32x128xi32>
    %4 = tpu.iota {dimensions = array<i32: 1>} : vector<8x32x128xi32>
    %5 = tpu.iota {dimensions = array<i32: 1>} : vector<8x32x1xi32>
    %cst = arith.constant dense<0xFF800000> : vector<8xf32>
    %6 = vector.multi_reduction <maximumf>, %0, %cst [1] : vector<8x128xf32> to vector<8xf32>
    %7 = vector.shape_cast %6 : vector<8xf32> to vector<8x1xf32>
    %8 = vector.broadcast %7 : vector<8x1xf32> to vector<8x128xf32>
    %9 = arith.subf %0, %8 : vector<8x128xf32>
    %10 = math.exp %9 : vector<8x128xf32>
    %cst_3 = arith.constant dense<0.000000e+00> : vector<8xf32>
    %11 = vector.multi_reduction <add>, %10, %cst_3 [1] : vector<8x128xf32> to vector<8xf32>
    %12 = vector.shape_cast %11 : vector<8xf32> to vector<8x1xf32>
    %13 = math.log %12 : vector<8x1xf32>
    %14 = arith.addf %7, %13 : vector<8x1xf32>
    %c0_4 = arith.constant 0 : index
    %c0_5 = arith.constant 0 : index
    %c0_6 = arith.constant 0 : index
    %15 = vector.load %arg2[%c0_4, %c0_5, %c0_6] : memref<8x32x128xf32, #tpu.memory_space<vmem>>, vector<8x32x128xf32>
    %cst_7 = arith.constant 9.99999996E-13 : f32
    %16 = vector.broadcast %cst_7 : f32 to vector<8x32x128xf32>
    %17 = arith.maximumf %15, %16 : vector<8x32x128xf32>
    %18 = math.log %17 : vector<8x32x128xf32>
    %cst_8 = arith.constant 0.000000e+00 : f32
    %19 = vector.broadcast %cst_8 : f32 to vector<8x32x128xf32>
    %20 = arith.subf %19, %18 : vector<8x32x128xf32>
    %21 = math.log %20 : vector<8x32x128xf32>
    %cst_9 = arith.constant 0.000000e+00 : f32
    %22 = vector.broadcast %cst_9 : f32 to vector<8x32x128xf32>
    %23 = arith.subf %22, %21 : vector<8x32x128xf32>
    %24 = vector.shape_cast %0 : vector<8x128xf32> to vector<8x1x128xf32>
    %25 = vector.broadcast %24 : vector<8x1x128xf32> to vector<8x32x128xf32>
    %26 = arith.addf %25, %23 : vector<8x32x128xf32>
    %cst_10 = arith.constant dense<0xFF800000> : vector<8x32xf32>
    %27 = vector.multi_reduction <maximumf>, %26, %cst_10 [2] : vector<8x32x128xf32> to vector<8x32xf32>
    %28 = vector.shape_cast %27 : vector<8x32xf32> to vector<8x32x1xf32>
    %29 = vector.broadcast %28 : vector<8x32x1xf32> to vector<8x32x128xf32>
    %30 = arith.cmpf oge, %26, %29 : vector<8x32x128xf32>
    %c-1_i32 = arith.constant -1 : i32
    %31 = vector.broadcast %c-1_i32 : i32 to vector<8x32x128xi32>
    %32 = arith.select %30, %3, %31 : vector<8x32x128xi1>, vector<8x32x128xi32>
    %cst_11 = arith.constant dense<-2147483648> : vector<8x32xi32>
    %33 = vector.multi_reduction <maxsi>, %32, %cst_11 [2] : vector<8x32x128xi32> to vector<8x32xi32>
    %34 = vector.shape_cast %33 : vector<8x32xi32> to vector<8x32x1xi32>
    %35 = vector.shape_cast %0 : vector<8x128xf32> to vector<8x1x128xf32>
    %cst_12 = arith.constant -1.000000e+09 : f32
    %36 = vector.shape_cast %35 : vector<8x1x128xf32> to vector<8x1x128xf32>
    %37 = vector.broadcast %36 : vector<8x1x128xf32> to vector<8x32x128xf32>
    %38 = vector.broadcast %cst_12 : f32 to vector<8x32x128xf32>
    %39 = arith.select %30, %37, %38 : vector<8x32x128xi1>, vector<8x32x128xf32>
    %cst_13 = arith.constant dense<0xFF800000> : vector<8x32xf32>
    %40 = vector.multi_reduction <maximumf>, %39, %cst_13 [2] : vector<8x32x128xf32> to vector<8x32xf32>
    %41 = vector.shape_cast %40 : vector<8x32xf32> to vector<8x32x1xf32>
    %42 = vector.shape_cast %14 : vector<8x1xf32> to vector<8x1x1xf32>
    %43 = vector.broadcast %42 : vector<8x1x1xf32> to vector<8x32x1xf32>
    %44 = arith.subf %41, %43 : vector<8x32x1xf32>
    %c4_i32 = arith.constant 4 : i32
    %45 = vector.broadcast %c4_i32 : i32 to vector<8x32x1xi32>
    %46 = arith.cmpi eq, %34, %45 : vector<8x32x1xi32>
    %c32_i32 = arith.constant 32 : i32
    %47 = vector.broadcast %c32_i32 : i32 to vector<8x32x1xi32>
    %48 = arith.select %46, %5, %47 : vector<8x32x1xi1>, vector<8x32x1xi32>
    %cst_14 = arith.constant dense<2147483647> : vector<8x1xi32>
    %49 = vector.multi_reduction <minsi>, %48, %cst_14 [1] : vector<8x32x1xi32> to vector<8x1xi32>
    %50 = vector.shape_cast %49 : vector<8x1xi32> to vector<8x1x1xi32>
    %51 = vector.broadcast %50 : vector<8x1x1xi32> to vector<8x32x1xi32>
    %52 = arith.cmpi sle, %5, %51 : vector<8x32x1xi32>
    %cst_15 = arith.constant 0.000000e+00 : f32
    %53 = vector.broadcast %cst_15 : f32 to vector<8x32x1xf32>
    %54 = arith.select %52, %44, %53 : vector<8x32x1xi1>, vector<8x32x1xf32>
    %cst_16 = arith.constant dense<0.000000e+00> : vector<8x1xf32>
    %55 = vector.multi_reduction <add>, %54, %cst_16 [1] : vector<8x32x1xf32> to vector<8x1xf32>
    %56 = vector.shape_cast %50 : vector<8x1x1xi32> to vector<8x1xi32>
    %cst_17 = arith.constant dense<true> : vector<8x32x1xi1>
    %57 = arith.xori %46, %cst_17 : vector<8x32x1xi1>
    %58 = arith.andi %52, %57 : vector<8x32x1xi1>
    %59 = arith.cmpi eq, %4, %3 : vector<8x32x128xi32>
    %60 = vector.broadcast %58 : vector<8x32x1xi1> to vector<8x32x128xi1>
    %61 = arith.andi %59, %60 : vector<8x32x128xi1>
    %c-1_i32_18 = arith.constant -1 : i32
    %62 = vector.shape_cast %34 : vector<8x32x1xi32> to vector<8x32x1xi32>
    %63 = vector.broadcast %62 : vector<8x32x1xi32> to vector<8x32x128xi32>
    %64 = vector.broadcast %c-1_i32_18 : i32 to vector<8x32x128xi32>
    %65 = arith.select %61, %63, %64 : vector<8x32x128xi1>, vector<8x32x128xi32>
    %cst_19 = arith.constant dense<-2147483648> : vector<8x128xi32>
    %66 = vector.multi_reduction <maxsi>, %65, %cst_19 [1] : vector<8x32x128xi32> to vector<8x128xi32>
    %c0_20 = arith.constant 0 : index
    %c0_21 = arith.constant 0 : index
    %67 = vector.load %arg4[%c0_20, %c0_21] : memref<8x128xi32, #tpu.memory_space<vmem>>, vector<8x128xi32>
    tpu.vector_store %arg4[%c0_20, %c0_21], %66 {strides = array<i32>} : memref<8x128xi32, #tpu.memory_space<vmem>>, vector<8x128xi32>,
    %cst_22 = arith.constant dense<0xFF800000> : vector<8xf32>
    %68 = vector.multi_reduction <maximumf>, %1, %cst_22 [1] : vector<8x128xf32> to vector<8xf32>
    %69 = vector.shape_cast %68 : vector<8xf32> to vector<8x1xf32>
    %70 = vector.broadcast %69 : vector<8x1xf32> to vector<8x128xf32>
    %71 = arith.subf %1, %70 : vector<8x128xf32>
    %72 = math.exp %71 : vector<8x128xf32>
    %cst_23 = arith.constant dense<0.000000e+00> : vector<8xf32>
    %73 = vector.multi_reduction <add>, %72, %cst_23 [1] : vector<8x128xf32> to vector<8xf32>
    %74 = vector.shape_cast %73 : vector<8xf32> to vector<8x1xf32>
    %75 = math.log %74 : vector<8x1xf32>
    %76 = arith.addf %69, %75 : vector<8x1xf32>
    %c0_24 = arith.constant 0 : index
    %c0_25 = arith.constant 0 : index
    %77 = vector.load %arg3[%c0_24, %c0_25] : memref<8x128xf32, #tpu.memory_space<vmem>>, vector<8x128xf32>
    %cst_26 = arith.constant 9.99999996E-13 : f32
    %78 = vector.broadcast %cst_26 : f32 to vector<8x128xf32>
    %79 = arith.maximumf %77, %78 : vector<8x128xf32>
    %80 = math.log %79 : vector<8x128xf32>
    %cst_27 = arith.constant 0.000000e+00 : f32
    %81 = vector.broadcast %cst_27 : f32 to vector<8x128xf32>
    %82 = arith.subf %81, %80 : vector<8x128xf32>
    %83 = math.log %82 : vector<8x128xf32>
    %cst_28 = arith.constant 0.000000e+00 : f32
    %84 = vector.broadcast %cst_28 : f32 to vector<8x128xf32>
    %85 = arith.subf %84, %83 : vector<8x128xf32>
    %86 = arith.addf %1, %85 : vector<8x128xf32>
    %cst_29 = arith.constant dense<0xFF800000> : vector<8xf32>
    %87 = vector.multi_reduction <maximumf>, %86, %cst_29 [1] : vector<8x128xf32> to vector<8xf32>
    %88 = vector.shape_cast %87 : vector<8xf32> to vector<8x1xf32>
    %89 = vector.broadcast %88 : vector<8x1xf32> to vector<8x128xf32>
    %90 = arith.cmpf oge, %86, %89 : vector<8x128xf32>
    %c-1_i32_30 = arith.constant -1 : i32
    %91 = vector.broadcast %c-1_i32_30 : i32 to vector<8x128xi32>
    %92 = arith.select %90, %2, %91 : vector<8x128xi1>, vector<8x128xi32>
    %cst_31 = arith.constant dense<-2147483648> : vector<8xi32>
    %93 = vector.multi_reduction <maxsi>, %92, %cst_31 [1] : vector<8x128xi32> to vector<8xi32>
    %94 = vector.shape_cast %93 : vector<8xi32> to vector<8x1xi32>
    %cst_32 = arith.constant -1.000000e+09 : f32
    %95 = vector.broadcast %cst_32 : f32 to vector<8x128xf32>
    %96 = arith.select %90, %1, %95 : vector<8x128xi1>, vector<8x128xf32>
    %cst_33 = arith.constant dense<0xFF800000> : vector<8xf32>
    %97 = vector.multi_reduction <maximumf>, %96, %cst_33 [1] : vector<8x128xf32> to vector<8xf32>
    %98 = vector.shape_cast %97 : vector<8xf32> to vector<8x1xf32>
    %99 = arith.subf %98, %76 : vector<8x1xf32>
    %100 = arith.addf %55, %99 : vector<8x1xf32>
    %c0_i32 = arith.constant 0 : i32
    %101 = vector.broadcast %c0_i32 : i32 to vector<8x128xi32>
    %102 = arith.cmpi eq, %2, %101 : vector<8x128xi32>
    %103 = arith.sitofp %56 : vector<8x1xi32> to vector<8x1xf32>
    %c1_i32 = arith.constant 1 : i32
    %104 = vector.broadcast %c1_i32 : i32 to vector<8x128xi32>
    %105 = arith.cmpi eq, %2, %104 : vector<8x128xi32>
    %106 = arith.sitofp %94 : vector<8x1xi32> to vector<8x1xf32>
    %c2_i32 = arith.constant 2 : i32
    %107 = vector.broadcast %c2_i32 : i32 to vector<8x128xi32>
    %108 = arith.cmpi eq, %2, %107 : vector<8x128xi32>
    %cst_34 = arith.constant 0.000000e+00 : f32
    %109 = vector.shape_cast %100 : vector<8x1xf32> to vector<8x1xf32>
    %110 = vector.broadcast %109 : vector<8x1xf32> to vector<8x128xf32>
    %111 = vector.broadcast %cst_34 : f32 to vector<8x128xf32>
    %112 = arith.select %108, %110, %111 : vector<8x128xi1>, vector<8x128xf32>
    %113 = vector.shape_cast %106 : vector<8x1xf32> to vector<8x1xf32>
    %114 = vector.broadcast %113 : vector<8x1xf32> to vector<8x128xf32>
    %115 = arith.select %105, %114, %112 : vector<8x128xi1>, vector<8x128xf32>
    %116 = vector.shape_cast %103 : vector<8x1xf32> to vector<8x1xf32>
    %117 = vector.broadcast %116 : vector<8x1xf32> to vector<8x128xf32>
    %118 = arith.select %102, %117, %115 : vector<8x128xi1>, vector<8x128xf32>
    %c0_35 = arith.constant 0 : index
    %c0_36 = arith.constant 0 : index
    %119 = vector.load %arg5[%c0_35, %c0_36] : memref<8x128xf32, #tpu.memory_space<vmem>>, vector<8x128xf32>
    tpu.vector_store %arg5[%c0_35, %c0_36], %118 {strides = array<i32>} : memref<8x128xf32, #tpu.memory_space<vmem>>, vector<8x128xf32>,
    return
  }
}

</mosaic_0001>

<bundles_post_ra>
// kernel: tpu_custom_call.1
= control target key start
LH: loop header
LB: loop body
LE: loop exit
PB: predicated region body
PF: predicated region fallthrough
CT: control target
= control target key end

     0   :  { %11 = vsyncpa [#allocation3], 0  ;;  %s4951_s0 = inlined_call_operand.hbm [shape: f32[8,128], index: 0, kind: input, shape index: {}]   ;;  %s4952_s1 = inlined_call_operand.hbm [shape: f32[8,128], index: 1, kind: input, shape index: {}]   ;;  %s4953_s2 = inlined_call_operand.hbm [shape: f32[8,32,128], index: 2, kind: input, shape index: {}]   ;;  %s4954_s3 = inlined_call_operand.hbm [shape: f32[8,128], index: 3, kind: input, shape index: {}]   ;;  %s4955_s4 = inlined_call_operand.hbm [shape: s32[8,128], index: 4, kind: output, shape index: {0}]   ;;  %s4956_s5 = inlined_call_operand.hbm [shape: f32[8,128], index: 5, kind: output, shape index: {1}]  }
   0x1   :  { %12 = vsyncpa [#allocation6], 0 }
   0x2   :  { %13 = vsyncpa [#allocation9], 0 }
   0x3   :  { %14 = vsyncpa [#allocation4], 0 }
   0x4   :  { %15 = vsyncpa [#allocation12], 0  ;;  %s2322_s18 = smov [#allocation5]   ;;  %s2323_s20 = smov [#allocation2]  }
   0x5   :  { %s32_s19 = sshll.u32 %s2322_s18, 4  ;;  %s22_s21 = sshll.u32 %s2323_s20, 4  ;;  %s33_s19 = int_to_ptr.vmem [resolvable:$true] %s32_s19  ;;  %s23_s21 = int_to_ptr.vmem [resolvable:$true] %s22_s21 }
   0x6   :  { %s2200_s22 = scalar_lea.vmem %s33_s19, 128  ;;  %p2205_p1 = scmp.lt.s32.totalorder %s33_s19, %s33_s19 }
   0x7   :  { %p2201_p0 = scmp.ne.s32.totalorder %s33_s19, %s2200_s22  ;;  %p2206_p2 = scmp.lt.s32.totalorder %s2200_s22, %s2200_s22 }
   0x9   :  { %p2207_p3 = por %p2206_p2, %p2205_p1 }
   0xb   :  { %p2208_p4 = pnand %p2207_p3, %p2201_p0 }
   0xd   :  { %2211 = shalt.err (!%p2208_p4)
}
   0xe   :  { %35 = dma.hbm_to_vmem [thread:$0]  %s4952_s1, 128, %s33_s19, [#allocation6]  }
   0xf   :  { %s2220_s25 = scalar_lea.vmem %s23_s21, 128  ;;  %p2225_p6 = scmp.lt.s32.totalorder %s23_s21, %s23_s21 }
  0x10   :  { %p2221_p5 = scmp.ne.s32.totalorder %s23_s21, %s2220_s25  ;;  %p2226_p7 = scmp.lt.s32.totalorder %s2220_s25, %s2220_s25 }
  0x12   :  { %p2227_p8 = por %p2226_p7, %p2225_p6 }
  0x14   :  { %p2228_p9 = pnand %p2227_p8, %p2221_p5 }
  0x16   :  { %2231 = shalt.err (!%p2228_p9)
}
  0x17   :  { %25 = dma.hbm_to_vmem [thread:$0]  %s4951_s0, 128, %s23_s21, [#allocation3]  }
  0x18   :  { %s2324_s28 = smov [#allocation7]  }
  0x19   :  { %s41_s29 = sshll.u32 %s2324_s28, 4  ;;  %s42_s29 = int_to_ptr.vmem [resolvable:$true] %s41_s29 }
  0x1a   :  { %s2240_s30 = scalar_lea.vmem %s42_s29, 4096  ;;  %p2245_p11 = scmp.lt.s32.totalorder %s42_s29, %s42_s29 }
  0x1b   :  { %p2241_p10 = scmp.ne.s32.totalorder %s42_s29, %s2240_s30  ;;  %p2246_p12 = scmp.lt.s32.totalorder %s2240_s30, %s2240_s30 }
  0x1d   :  { %p2247_p13 = por %p2246_p12, %p2245_p11 }
  0x1f   :  { %p2248_p0 = pnand %p2247_p13, %p2241_p10 }
  0x21   :  { %2251 = shalt.err (!%p2248_p0)
}
  0x22   :  { %s2325_s1 = smov 128   ;;  %s2326_s6 = smov 8  }
  0x23   :  { %47 = dma.hbm_to_vmem [thread:$0]  %s4953_s2, 4096, %s42_s29, [#allocation6], %s2325_s1, %s2325_s1, %s2326_s6  }
  0x24   :  { %s2327_s9 = smov [#allocation8]  }
  0x25   :  { %s54_s10 = sshll.u32 %s2327_s9, 4  ;;  %s55_s10 = int_to_ptr.vmem [resolvable:$true] %s54_s10 }
  0x26   :  { %s2260_s0 = scalar_lea.vmem %s55_s10, 128  ;;  %p2265_p2 = scmp.lt.s32.totalorder %s55_s10, %s55_s10 }
  0x27   :  { %p2261_p1 = scmp.ne.s32.totalorder %s55_s10, %s2260_s0  ;;  %p2266_p3 = scmp.lt.s32.totalorder %s2260_s0, %s2260_s0 }
  0x29   :  { %p2267_p4 = por %p2266_p3, %p2265_p2 }
  0x2b   :  { %p2268_p5 = pnand %p2267_p4, %p2261_p1 }
  0x2d   :  { %2271 = shalt.err (!%p2268_p5)
}
  0x2e   :  { %57 = dma.hbm_to_vmem [thread:$0]  %s4954_s3, 128, %s55_s10, [#allocation9]  }
  0x2f   :  { %2312 = dma.done.wait [#allocation3], 128  }
  0x30   :  { %2313 = vsyncadd [#allocation3], 4294967168 }
  0x31   :  { %2314 = dma.done.wait [#allocation6], 4224  }
  0x32   :  { %2315 = vsyncadd [#allocation6], 4294963072 }
  0x33   :  { %2316 = dma.done.wait [#allocation9], 128  }
  0x34   :  { %2317 = vsyncadd [#allocation9], 4294967168  ;;  %v93_v0 = vld [vmem:[#allocation7 + $0x20] sm:$0xff]  ;;  %v94_v4 = vld [vmem:[#allocation7 + $0x28] sm:$0xff]  ;;  %v72_v6 = vlaneseq  ;;  %v2328_v7 = vmov 1966171168  }
  0x35   :  { %v97_v1 = vld [vmem:[#allocation7 + $0x40] sm:$0xff]  ;;  %v125_v2 = vmax.f32 %v93_v0, 1e-12  ;;  %v98_v5 = vld [vmem:[#allocation7 + $0x48] sm:$0xff]  ;;  %v348_v8 = vunpack.c.l.s4 %v2328_v7  ;;  %v126_v9 = vmax.f32 %v94_v4, 1e-12 }
  0x36   :  { %v129_v3 = vmax.f32 %v97_v1, 1e-12  ;;  %v130_v10 = vmax.f32 %v98_v5, 1e-12  ;;  %v89_v11 = vld [vmem:[#allocation7] sm:$0xff]  ;;  %v90_v12 = vld [vmem:[#allocation7 + $0x8] sm:$0xff] }
  0x37   :  { %2052 = vlog2.f32 %v125_v2  ;;  %v121_v13 = vmax.f32 %v89_v11, 1e-12  ;;  %v95_v14 = vld [vmem:[#allocation7 + $0x30] sm:$0xff]  ;;  %v102_v15 = vld [vmem:[#allocation7 + $0x68] sm:$0xff]  ;;  %v122_v16 = vmax.f32 %v90_v12, 1e-12  ;;  %v349_v21 = vunpack.c.0.s8 %v348_v8 }
  0x38   :  { %2054 = vlog2.f32 %v129_v3  ;;  %v101_v17 = vld [vmem:[#allocation7 + $0x60] sm:$0xff]  ;;  %v127_v18 = vmax.f32 %v95_v14, 1e-12  ;;  %v99_v19 = vld [vmem:[#allocation7 + $0x50] sm:$0xff]  ;;  %v2376_v20 = vshrl.u32 %v72_v6, 7  ;;  %v106_v25 = vld [vmem:[#allocation7 + $0x88] sm:$0xff] }
  0x39   :  { %2056 = vlog2.f32 %v126_v9  ;;  %v134_v22 = vmax.f32 %v102_v15, 1e-12  ;;  %v105_v23 = vld [vmem:[#allocation7 + $0x80] sm:$0xff]  ;;  %v133_v24 = vmax.f32 %v101_v17, 1e-12  ;;  %v91_v27 = vld [vmem:[#allocation7 + $0x10] sm:$0xff] }
  0x3a   :  { %5128 = vst [vmem:[#allocation18_spill] sm:$0xff] %v2376_v20  ;;  %2058 = vlog2.f32 %v130_v10  ;;  %v131_v26 = vmax.f32 %v99_v19, 1e-12  ;;  %v137_v28 = vmax.f32 %v105_v23, 1e-12  ;;  %v96_v29 = vld [vmem:[#allocation7 + $0x38] sm:$0xff]  ;;  %v2379_v30 = vsub.s32 %v349_v21, %v2376_v20 }
  0x3b   :  { %2060 = vlog2.f32 %v121_v13  ;;  %v138_v31 = vmax.f32 %v106_v25, 1e-12  ;;  %v103_v32 = vld [vmem:[#allocation7 + $0x70] sm:$0xff]  ;;  %v123_v34 = vmax.f32 %v91_v27, 1e-12  ;;  %v110_v35 = vld [vmem:[#allocation7 + $0xa8] sm:$0xff] }
  0x3c   :  { %2062 = vlog2.f32 %v122_v16  ;;  %v2381_v33 = vld [vmem:[#allocation2] sm:$0xff]  ;;  %v128_v36 = vmax.f32 %v96_v29, 1e-12  ;;  %v109_v37 = vld [vmem:[#allocation7 + $0xa0] sm:$0xff]  ;;  %v135_v38 = vmax.f32 %v103_v32, 1e-12 }
  0x3d   :  { %2064 = vlog2.f32 %v127_v18  ;;  %v107_v39 = vld [vmem:[#allocation7 + $0x90] sm:$0xff]  ;;  %v353_v40 = vrot.slane %v2381_v33, %v2379_v30  ;;  %v142_v41 = vmax.f32 %v110_v35, 1e-12  ;;  %v141_v42 = vmax.f32 %v109_v37, 1e-12  ;;  %s2331_s2 = smov [#allocation10]  }
  0x3e   :  { %2066 = vlog2.f32 %v134_v22  ;;  %v139_v44 = vmax.f32 %v107_v39, 1e-12  ;;  %v2387_v55 = vsub.s32 0, %v2376_v20  ;;  %v346_v61 = vcombine.high %v2381_v33, %v2381_v33  ;;  %v114_v39 = vld [vmem:[#allocation7 + $0xc8] sm:$0xff]  ;;  %s2013_s3 = sshll.u32 %s2331_s2, 4  ;;  %s2014_s3 = int_to_ptr.vmem [resolvable:$true] %s2013_s3 }
  0x3f   :  { %2068 = vlog2.f32 %v133_v24  ;;  %v361_v48 = vcombine.high %v353_v40, %v353_v40  ;;  %v369_v52 = vrot.slane %v353_v40, %v2379_v30  ;;  %s2272_s13 = scalar_lea.vmem %s2014_s3, 128  ;;  %p2277_p7 = scmp.lt.s32.totalorder %s2014_s3, %s2014_s3 }
  0x40   :  { %2070 = vlog2.f32 %v131_v26  ;;  %5129 = vst [vmem:[#allocation19_spill] sm:$0xff] %v2387_v55  ;;  %v2396_v18 = vrot.slane %v346_v61, %v2379_v30  ;;  %p2273_p6 = scmp.ne.s32.totalorder %s2014_s3, %s2272_s13  ;;  %p2278_p8 = scmp.lt.s32.totalorder %s2272_s13, %s2272_s13 }
  0x41   :  { %2072 = vlog2.f32 %v137_v28  ;;  %v383_v63 = vrot.slane %v361_v48, %v2379_v30  ;;  %v391_v3 = vcombine.high %v369_v52, %v369_v52  ;;  %v2393_v8 = vrot.slane %v369_v52, %v2387_v55 }
  0x42   :  { %2074 = vlog2.f32 %v138_v31  ;;  %p2279_p9 = por %p2278_p8, %p2277_p7 }
  0x43   :  { %2076 = vlog2.f32 %v123_v34  ;;  %5130 = vst [vmem:[#allocation20_spill] sm:$0xff] %v2393_v8  ;;  %v393_v13 = vcombine.high %v383_v63, %v383_v63  ;;  %v2399_v21 = vrot.slane %v383_v63, %v2387_v55  ;;  %v2402_v25 = vrot.slane %v391_v3, %v2387_v55  ;;  %v100_v34 = vld [vmem:[#allocation7 + $0x58] sm:$0xff] }
  0x44   :  { %v2053_v43 = vpop.eup %2052  ;;  %2078 = vlog2.f32 %v128_v36  ;;  %v2409_v36 = vrot.slane %v2396_v18, %v2379_v30  ;;  %v132_v48 = vmax.f32 %v100_v34, 1e-12  ;;  %p2280_p10 = pnand %p2279_p9, %p2273_p6 }
  0x45   :  { %v2055_v45 = vpop.eup %2054  ;;  %v162_v46 = vmul.f32 0.6931472, %v2053_v43  ;;  %2080 = vlog2.f32 %v135_v38  ;;  %v2405_v29 = vrot.slane %v393_v13, %v2387_v55  ;;  %v362_v43 = vcombine.high %v2396_v18, %v2396_v18 }
  0x46   :  { %v2057_v47 = vpop.eup %2056  ;;  %v170_v49 = vmul.f32 0.6931472, %v2055_v45  ;;  %2082 = vlog2.f32 %v142_v41 }
  0x47   :  { %v2059_v50 = vpop.eup %2058  ;;  %v221_v51 = vsub.f32 0.0, %v162_v46  ;;  %v164_v53 = vmul.f32 0.6931472, %v2057_v47  ;;  %2084 = vlog2.f32 %v141_v42  ;;  %5131 = vst [vmem:[#allocation21_spill] sm:$0xff] %v2405_v29 }
  0x48   :  { %v2061_v54 = vpop.eup %2060  ;;  %v225_v56 = vsub.f32 0.0, %v170_v49  ;;  %v172_v57 = vmul.f32 0.6931472, %v2059_v50  ;;  %2086 = vlog2.f32 %v139_v44  ;;  %v113_v44 = vld [vmem:[#allocation7 + $0xc0] sm:$0xff]  ;;  %v104_v49 = vld [vmem:[#allocation7 + $0x78] sm:$0xff] }
  0x49   :  { %v2063_v58 = vpop.eup %2062  ;;  %2088 = vlog2.f32 %v221_v51  ;;  %v222_v59 = vsub.f32 0.0, %v164_v53  ;;  %v154_v60 = vmul.f32 0.6931472, %v2061_v54  ;;  %v146_v53 = vmax.f32 %v114_v39, 1e-12  ;;  %v92_v54 = vld [vmem:[#allocation7 + $0x18] sm:$0xff] }
  0x4a   :  { %v2065_v62 = vpop.eup %2064  ;;  %2090 = vlog2.f32 %v225_v56  ;;  %v226_v0 = vsub.f32 0.0, %v172_v57  ;;  %v156_v1 = vmul.f32 0.6931472, %v2063_v58  ;;  %v112_v39 = vld [vmem:[#allocation7 + $0xb8] sm:$0xff] }
  0x4b   :  { %v2067_v2 = vpop.eup %2066  ;;  %2092 = vlog2.f32 %v222_v59  ;;  %v217_v4 = vsub.f32 0.0, %v154_v60  ;;  %v166_v5 = vmul.f32 0.6931472, %v2065_v62  ;;  %v145_v59 = vmax.f32 %v113_v44, 1e-12  ;;  %v111_v60 = vld [vmem:[#allocation7 + $0xb0] sm:$0xff] }
  0x4c   :  { %v2069_v7 = vpop.eup %2068  ;;  %2094 = vlog2.f32 %v226_v0  ;;  %v218_v9 = vsub.f32 0.0, %v156_v1  ;;  %v180_v10 = vmul.f32 0.6931472, %v2067_v2  ;;  %v136_v0 = vmax.f32 %v104_v49, 1e-12  ;;  %v117_v1 = vld [vmem:[#allocation7 + $0xe0] sm:$0xff] }
  0x4d   :  { %v2071_v11 = vpop.eup %2070  ;;  %2096 = vlog2.f32 %v217_v4  ;;  %v223_v12 = vsub.f32 0.0, %v166_v5  ;;  %v178_v14 = vmul.f32 0.6931472, %v2069_v7  ;;  %v124_v5 = vmax.f32 %v92_v54, 1e-12 }
  0x4e   :  { %v2073_v15 = vpop.eup %2072  ;;  %2098 = vlog2.f32 %v218_v9  ;;  %v230_v16 = vsub.f32 0.0, %v180_v10  ;;  %v174_v17 = vmul.f32 0.6931472, %v2071_v11  ;;  %v143_v11 = vmax.f32 %v111_v60, 1e-12  ;;  %v120_v60 = vld [vmem:[#allocation7 + $0xf8] sm:$0xff] }
  0x4f   :  { %v2075_v19 = vpop.eup %2074  ;;  %2100 = vlog2.f32 %v223_v12  ;;  %v229_v22 = vsub.f32 0.0, %v178_v14  ;;  %v186_v23 = vmul.f32 0.6931472, %v2073_v15  ;;  %v149_v15 = vmax.f32 %v117_v1, 1e-12 }
  0x50   :  { %v2077_v24 = vpop.eup %2076  ;;  %2102 = vlog2.f32 %v230_v16  ;;  %v227_v26 = vsub.f32 0.0, %v174_v17  ;;  %v188_v27 = vmul.f32 0.6931472, %v2075_v19 }
  0x51   :  { %v2079_v28 = vpop.eup %2078  ;;  %2104 = vlog2.f32 %v229_v22  ;;  %v233_v31 = vsub.f32 0.0, %v186_v23  ;;  %v158_v32 = vmul.f32 0.6931472, %v2077_v24  ;;  %v118_v23 = vld [vmem:[#allocation7 + $0xe8] sm:$0xff] }
  0x52   :  { %v2081_v35 = vpop.eup %2080  ;;  %2106 = vlog2.f32 %v227_v26  ;;  %v234_v37 = vsub.f32 0.0, %v188_v27  ;;  %v168_v38 = vmul.f32 0.6931472, %v2079_v28 }
  0x53   :  { %v2083_v40 = vpop.eup %2082  ;;  %2108 = vlog2.f32 %v233_v31  ;;  %v219_v41 = vsub.f32 0.0, %v158_v32  ;;  %v182_v42 = vmul.f32 0.6931472, %v2081_v35  ;;  %v108_v31 = vld [vmem:[#allocation7 + $0x98] sm:$0xff]  ;;  %v115_v32 = vld [vmem:[#allocation7 + $0xd0] sm:$0xff] }
  0x54   :  { %v2085_v45 = vpop.eup %2084  ;;  %2110 = vlog2.f32 %v234_v37  ;;  %v224_v46 = vsub.f32 0.0, %v168_v38  ;;  %v196_v47 = vmul.f32 0.6931472, %v2083_v40  ;;  %v119_v40 = vld [vmem:[#allocation7 + $0xf0] sm:$0xff]  ;;  %v140_v49 = vmax.f32 %v108_v31, 1e-12 }
  0x55   :  { %v2087_v50 = vpop.eup %2086  ;;  %2112 = vlog2.f32 %v219_v41  ;;  %v231_v51 = vsub.f32 0.0, %v182_v42  ;;  %v194_v52 = vmul.f32 0.6931472, %v2085_v45  ;;  %v150_v45 = vmax.f32 %v118_v23, 1e-12 }
  0x56   :  { %v2089_v56 = vpop.eup %2088  ;;  %2114 = vlog2.f32 %v224_v46  ;;  %v238_v57 = vsub.f32 0.0, %v196_v47  ;;  %v190_v58 = vmul.f32 0.6931472, %v2087_v50  ;;  %v116_v46 = vld [vmem:[#allocation7 + $0xd8] sm:$0xff]  ;;  %v147_v50 = vmax.f32 %v115_v32, 1e-12 }
  0x57   :  { %v2091_v61 = vpop.eup %2090  ;;  %v258_v62 = vmul.f32 0.6931472, %v2089_v56  ;;  %2116 = vlog2.f32 %v231_v51  ;;  %v237_v63 = vsub.f32 0.0, %v194_v52  ;;  %v151_v54 = vmax.f32 %v119_v40, 1e-12 }
  0x58   :  { %v2093_v2 = vpop.eup %2092  ;;  %v266_v3 = vmul.f32 0.6931472, %v2091_v61  ;;  %2118 = vlog2.f32 %v238_v57  ;;  %v235_v4 = vsub.f32 0.0, %v190_v58 }
  0x59   :  { %v2095_v7 = vpop.eup %2094  ;;  %v317_v9 = vsub.f32 0.0, %v258_v62  ;;  %v260_v10 = vmul.f32 0.6931472, %v2093_v2  ;;  %2120 = vlog2.f32 %v237_v63  ;;  %v148_v2 = vmax.f32 %v116_v46, 1e-12 }
  0x5a   :  { %v2097_v12 = vpop.eup %2096  ;;  %v321_v13 = vsub.f32 0.0, %v266_v3  ;;  %v268_v14 = vmul.f32 0.6931472, %v2095_v7  ;;  %2122 = vlog2.f32 %v235_v4  ;;  %v2437_v4 = vrot.slane %v2409_v36, %v2387_v55 }
  0x5b   :  { %v2099_v16 = vpop.eup %2098  ;;  %v2414_v17 = vadd.f32 %v2399_v21, %v317_v9  ;;  %v318_v19 = vsub.f32 0.0, %v260_v10  ;;  %v250_v22 = vmul.f32 0.6931472, %v2097_v12  ;;  %2124 = vlog2.f32 %v132_v48 }
  0x5c   :  { %v2101_v24 = vpop.eup %2100  ;;  %v2417_v26 = vadd.f32 %v2402_v25, %v321_v13  ;;  %v322_v27 = vsub.f32 0.0, %v268_v14  ;;  %v252_v28 = vmul.f32 0.6931472, %v2099_v16  ;;  %2126 = vlog2.f32 %v146_v53  ;;  %5132 = vst [vmem:[#allocation22_spill] sm:$0xff] %v2437_v4 }
  0x5d   :  { %v2103_v34 = vpop.eup %2102  ;;  %475 = vmax.xlane.f32.xlu0 %v2414_v17  ;;  %v2421_v35 = vadd.f32 %v2399_v21, %v318_v19  ;;  %v313_v37 = vsub.f32 0.0, %v250_v22  ;;  %v262_v38 = vmul.f32 0.6931472, %v2101_v24  ;;  %2128 = vlog2.f32 %v145_v59 }
  0x5e   :  { %v2105_v41 = vpop.eup %2104  ;;  %483 = vmax.xlane.f32.xlu1 %v2417_v26  ;;  %v2425_v42 = vadd.f32 %v2402_v25, %v322_v27  ;;  %v314_v44 = vsub.f32 0.0, %v252_v28  ;;  %2130 = vlog2.f32 %v136_v0  ;;  %v276_v52 = vmul.f32 0.6931472, %v2103_v34 }
  0x5f   :  { %v2107_v47 = vpop.eup %2106  ;;  %v274_v48 = vmul.f32 0.6931472, %v2105_v41  ;;  %2132 = vlog2.f32 %v124_v5  ;;  %v144_v53 = vmax.f32 %v112_v39, 1e-12  ;;  %v2429_v57 = vadd.f32 %v2393_v8, %v313_v37 }
  0x60   :  { %v2109_v51 = vpop.eup %2108  ;;  %2134 = vlog2.f32 %v143_v11  ;;  %v2432_v58 = vadd.f32 %v2393_v8, %v314_v44  ;;  %v319_v59 = vsub.f32 0.0, %v262_v38  ;;  %v270_v63 = vmul.f32 0.6931472, %v2107_v47 }
  0x61   :  { %v2111_v56 = vpop.eup %2110  ;;  %477 = vmax.xlane.f32.xlu0 %v2421_v35  ;;  %2136 = vlog2.f32 %v149_v15  ;;  %v325_v62 = vsub.f32 0.0, %v274_v48  ;;  %v282_v0 = vmul.f32 0.6931472, %v2109_v51  ;;  %v152_v7 = vmax.f32 %v120_v60, 1e-12 }
  0x62   :  { %v2113_v61 = vpop.eup %2112  ;;  %485 = vmax.xlane.f32.xlu1 %v2425_v42  ;;  %2138 = vlog2.f32 %v150_v45  ;;  %v284_v5 = vmul.f32 0.6931472, %v2111_v56  ;;  %v2441_v10 = vadd.f32 %v2399_v21, %v319_v59  ;;  %v326_v11 = vsub.f32 0.0, %v276_v52 }
  0x63   :  { %v2115_v1 = vpop.eup %2114  ;;  %2140 = vlog2.f32 %v140_v49  ;;  %v2447_v12 = vrot.slane %v362_v43, %v2379_v30  ;;  %v2451_v14 = vadd.f32 %v2405_v29, %v325_v62  ;;  %v323_v15 = vsub.f32 0.0, %v270_v63 }
  0x64   :  { %v2117_v3 = vpop.eup %2116  ;;  %2142 = vlog2.f32 %v147_v50  ;;  %v329_v16 = vsub.f32 0.0, %v282_v0  ;;  %v254_v22 = vmul.f32 0.6931472, %v2113_v61  ;;  %v330_v24 = vsub.f32 0.0, %v284_v5 }
  0x65   :  { %v2119_v9 = vpop.eup %2118  ;;  %467 = vmax.xlane.f32.xlu0 %v2429_v57  ;;  %2144 = vlog2.f32 %v144_v53  ;;  %v264_v27 = vmul.f32 0.6931472, %v2115_v1  ;;  %v2457_v18 = vadd.f32 %v2405_v29, %v326_v11  ;;  %v2461_v31 = vadd.f32 %v2402_v25, %v323_v15 }
  0x66   :  { %v2121_v13 = vpop.eup %2120  ;;  %469 = vmax.xlane.f32.xlu1 %v2432_v58  ;;  %2146 = vlog2.f32 %v151_v54  ;;  %v2464_v32 = vadd.f32 %v2437_v4, %v329_v16  ;;  %v2468_v34 = vrot.slane %v2447_v12, %v2387_v55  ;;  %v315_v39 = vsub.f32 0.0, %v254_v22 }
  0x67   :  { %v2453_v19 = vpop.eup %2122  ;;  %2148 = vlog2.f32 %v148_v2  ;;  %v278_v40 = vmul.f32 0.6931472, %v2117_v3  ;;  %v2471_v46 = vadd.f32 %v2437_v4, %v330_v24  ;;  %v320_v47 = vsub.f32 0.0, %v264_v27 }
  0x68   :  { %v2125_v23 = vpop.eup %2124  ;;  %2150 = vlog2.f32 %v152_v7  ;;  %v292_v51 = vmul.f32 0.6931472, %v2119_v9  ;;  %v290_v56 = vmul.f32 0.6931472, %v2121_v13  ;;  %v2476_v62 = vadd.f32 %v2393_v8, %v315_v39 }
  0x69   :  { %v2127_v30 = vpop.eup %2126  ;;  %479 = vmax.xlane.f32.xlu0 %v2441_v10  ;;  %v176_v43 = vmul.f32 0.6931472, %v2125_v23  ;;  %v327_v2 = vsub.f32 0.0, %v278_v40  ;;  %v2480_v9 = vadd.f32 %v2399_v21, %v320_v47 }
  0x6a   :  { %v2129_v28 = vpop.eup %2128  ;;  %491 = vmax.xlane.f32.xlu1 %v2451_v14  ;;  %v204_v37 = vmul.f32 0.6931472, %v2127_v30  ;;  %v333_v16 = vsub.f32 0.0, %v290_v56  ;;  %v334_v27 = vsub.f32 0.0, %v292_v51 }
  0x6b   :  { %v2131_v38 = vpop.eup %2130  ;;  %v228_v41 = vsub.f32 0.0, %v176_v43  ;;  %v202_v44 = vmul.f32 0.6931472, %v2129_v28 }
  0x6c   :  { %v2133_v45 = vpop.eup %2132  ;;  %v242_v48 = vsub.f32 0.0, %v204_v37  ;;  %v184_v49 = vmul.f32 0.6931472, %v2131_v38  ;;  %v286_v37 = vmul.f32 0.6931472, %v2453_v19  ;;  %v2490_v47 = vadd.f32 %v2468_v34, %v333_v16 }
  0x6d   :  { %v2135_v50 = vpop.eup %2134  ;;  %493 = vmax.xlane.f32.xlu0 %v2457_v18  ;;  %2152 = vlog2.f32 %v228_v41  ;;  %v241_v52 = vsub.f32 0.0, %v202_v44  ;;  %v160_v53 = vmul.f32 0.6931472, %v2133_v45  ;;  %v2486_v41 = vadd.f32 %v2405_v29, %v327_v2 }
  0x6e   :  { %v2137_v54 = vpop.eup %2136  ;;  %487 = vmax.xlane.f32.xlu1 %v2461_v31  ;;  %2154 = vlog2.f32 %v242_v48  ;;  %v232_v59 = vsub.f32 0.0, %v184_v49  ;;  %v198_v60 = vmul.f32 0.6931472, %v2135_v50  ;;  %v392_v19 = vcombine.high %v2409_v36, %v2409_v36 }
  0x6f   :  { %v2139_v61 = vpop.eup %2138  ;;  %2156 = vlog2.f32 %v241_v52  ;;  %v220_v63 = vsub.f32 0.0, %v160_v53  ;;  %v210_v0 = vmul.f32 0.6931472, %v2137_v54  ;;  %v2496_v50 = vadd.f32 %v2468_v34, %v334_v27 }
  0x70   :  { %v2141_v1 = vpop.eup %2140  ;;  %2158 = vlog2.f32 %v232_v59  ;;  %v239_v3 = vsub.f32 0.0, %v198_v60  ;;  %v212_v5 = vmul.f32 0.6931472, %v2139_v61  ;;  %v331_v51 = vsub.f32 0.0, %v286_v37 }
  0x71   :  { %v2143_v7 = vpop.eup %2142  ;;  %499 = vmax.xlane.f32.xlu0 %v2464_v32  ;;  %2160 = vlog2.f32 %v220_v63  ;;  %v245_v11 = vsub.f32 0.0, %v210_v0  ;;  %v192_v13 = vmul.f32 0.6931472, %v2141_v1  ;;  %v2500_v36 = vrot.slane %v392_v19, %v2387_v55 }
  0x72   :  { %v2145_v15 = vpop.eup %2144  ;;  %501 = vmax.xlane.f32.xlu1 %v2471_v46  ;;  %2162 = vlog2.f32 %v239_v3  ;;  %v246_v22 = vsub.f32 0.0, %v212_v5  ;;  %v206_v23 = vmul.f32 0.6931472, %v2143_v7  ;;  %v2504_v0 = vadd.f32 %v2437_v4, %v331_v51 }
  0x73   :  { %v2147_v24 = vpop.eup %2146  ;;  %2164 = vlog2.f32 %v245_v11  ;;  %v236_v30 = vsub.f32 0.0, %v192_v13  ;;  %v200_v43 = vmul.f32 0.6931472, %v2145_v15  ;;  %5133 = vst [vmem:[#allocation23_spill] sm:$0xff] %v2500_v36  ;;  %v394_v27 = vcombine.high %v2447_v12, %v2447_v12 }
  0x74   :  { %v2149_v28 = vpop.eup %2148  ;;  %2166 = vlog2.f32 %v246_v22  ;;  %v243_v38 = vsub.f32 0.0, %v206_v23  ;;  %v214_v39 = vmul.f32 0.6931472, %v2147_v24 }
  0x75   :  { %v2151_v40 = vpop.eup %2150  ;;  %471 = vmax.xlane.f32.xlu0 %v2476_v62  ;;  %2168 = vlog2.f32 %v236_v30  ;;  %v240_v44 = vsub.f32 0.0, %v200_v43  ;;  %v208_v45 = vmul.f32 0.6931472, %v2149_v28 }
  0x76   :  { %481 = vmax.xlane.f32.xlu1 %v2480_v9  ;;  %2170 = vlog2.f32 %v243_v38  ;;  %v247_v48 = vsub.f32 0.0, %v214_v39  ;;  %v216_v49 = vmul.f32 0.6931472, %v2151_v40 }
  0x77   :  { %2172 = vlog2.f32 %v240_v44  ;;  %v244_v52 = vsub.f32 0.0, %v208_v45  ;;  %v2523_v44 = vrot.slane %v394_v27, %v2387_v55 }
  0x78   :  { %2174 = vlog2.f32 %v247_v48  ;;  %v248_v61 = vsub.f32 0.0, %v216_v49 }
  0x79   :  { %495 = vmax.xlane.f32.xlu0 %v2486_v41  ;;  %2176 = vlog2.f32 %v244_v52  ;;  %5136 = vst [vmem:[#allocation26_spill] sm:$0xff] %v2523_v44 }
  0x7a   :  { %v2153_v53 = vpop.eup %2152  ;;  %507 = vmax.xlane.f32.xlu1 %v2490_v47  ;;  %2178 = vlog2.f32 %v248_v61 }
  0x7b   :  { %v2155_v54 = vpop.eup %2154  ;;  %v272_v56 = vmul.f32 0.6931472, %v2153_v53 }
  0x7c   :  { %v2157_v59 = vpop.eup %2156  ;;  %v300_v60 = vmul.f32 0.6931472, %v2155_v54 }
  0x7d   :  { %v2159_v63 = vpop.eup %2158  ;;  %509 = vmax.xlane.f32.xlu0 %v2496_v50  ;;  %v324_v1 = vsub.f32 0.0, %v272_v56  ;;  %v298_v2 = vmul.f32 0.6931472, %v2157_v59 }
  0x7e   :  { %v2161_v3 = vpop.eup %2160  ;;  %v338_v5 = vsub.f32 0.0, %v300_v60  ;;  %v280_v7 = vmul.f32 0.6931472, %v2159_v63 }
  0x7f   :  { %v2163_v11 = vpop.eup %2162  ;;  %v2507_v13 = vadd.f32 %v2402_v25, %v324_v1  ;;  %v337_v15 = vsub.f32 0.0, %v298_v2  ;;  %v256_v16 = vmul.f32 0.6931472, %v2161_v3 }
  0x80   :  { %v2165_v22 = vpop.eup %2164  ;;  %v2510_v23 = vadd.f32 %v2500_v36, %v338_v5  ;;  %v328_v24 = vsub.f32 0.0, %v280_v7  ;;  %v294_v37 = vmul.f32 0.6931472, %v2163_v11  ;;  %v1873_v7 = vld [vmem:[#allocation8] sm:$0xff] }
  0x81   :  { %v2167_v30 = vpop.eup %2166  ;;  %503 = vmax.xlane.f32.xlu0 %v2504_v0  ;;  %489 = vmax.xlane.f32.xlu1 %v2507_v13  ;;  %v2517_v43 = vadd.f32 %v2500_v36, %v337_v15  ;;  %v316_v28 = vsub.f32 0.0, %v256_v16  ;;  %v306_v38 = vmul.f32 0.6931472, %v2165_v22 }
  0x82   :  { %5134 = vst [vmem:[#allocation24_spill] sm:$0xff] %v2510_v23  ;;  %v2169_v39 = vpop.eup %2168  ;;  %v2520_v40 = vadd.f32 %v2405_v29, %v328_v24  ;;  %v308_v12 = vmul.f32 0.6931472, %v2167_v30  ;;  %v335_v48 = vsub.f32 0.0, %v294_v37  ;;  %v1874_v24 = vmax.f32 %v1873_v7, 1e-12 }
  0x83   :  { %v2171_v45 = vpop.eup %2170  ;;  %v2528_v19 = vadd.f32 %v2393_v8, %v316_v28  ;;  %v341_v49 = vsub.f32 0.0, %v306_v38  ;;  %v288_v51 = vmul.f32 0.6931472, %v2169_v39 }
  0x84   :  { %5135 = vst [vmem:[#allocation25_spill] sm:$0xff] %v2520_v40  ;;  %v2173_v52 = vpop.eup %2172  ;;  %v342_v53 = vsub.f32 0.0, %v308_v12  ;;  %v302_v54 = vmul.f32 0.6931472, %v2171_v45  ;;  %v2533_v59 = vadd.f32 %v2468_v34, %v335_v48  ;;  %2180 = vlog2.f32 %v1874_v24 }
  0x85   :  { %517 = vmax.xlane.f32.xlu0 %v2510_v23  ;;  %515 = vmax.xlane.f32.xlu1 %v2517_v43  ;;  %5137 = vst [vmem:[#allocation27_spill] sm:$0xff] %v2528_v19  ;;  %v2175_v56 = vpop.eup %2174  ;;  %v2536_v60 = vadd.f32 %v2523_v44, %v341_v49  ;;  %v332_v61 = vsub.f32 0.0, %v288_v51  ;;  %v296_v63 = vmul.f32 0.6931472, %v2173_v52  ;;  %v2569_v52 = vld [vmem:[#allocation5] sm:$0xff] }
  0x86   :  { %5138 = vst [vmem:[#allocation28_spill] sm:$0xff] %v2533_v59  ;;  %v2177_v1 = vpop.eup %2176  ;;  %v2539_v2 = vadd.f32 %v2523_v44, %v342_v53  ;;  %v339_v3 = vsub.f32 0.0, %v302_v54  ;;  %v310_v5 = vmul.f32 0.6931472, %v2175_v56  ;;  %5147 = vst [vmem:[#allocation37_spill] sm:$0xff] %v2569_v52 }
  0x87   :  { %5139 = vst [vmem:[#allocation29_spill] sm:$0xff] %v2536_v60  ;;  %v2179_v11 = vpop.eup %2178  ;;  %v2544_v15 = vadd.f32 %v2437_v4, %v332_v61  ;;  %v336_v16 = vsub.f32 0.0, %v296_v63  ;;  %v304_v22 = vmul.f32 0.6931472, %v2177_v1 }
  0x88   :  { %5140 = vst [vmem:[#allocation30_spill] sm:$0xff] %v2539_v2  ;;  %v2547_v27 = vadd.f32 %v2500_v36, %v339_v3  ;;  %v343_v28 = vsub.f32 0.0, %v310_v5  ;;  %v312_v38 = vmul.f32 0.6931472, %v2179_v11 }
  0x89   :  { %497 = vmax.xlane.f32.xlu0 %v2520_v40  ;;  %473 = vmax.xlane.f32.xlu1 %v2528_v19  ;;  %5141 = vst [vmem:[#allocation31_spill] sm:$0xff] %v2544_v15  ;;  %v2552_v30 = vadd.f32 %v2468_v34, %v336_v16  ;;  %v340_v37 = vsub.f32 0.0, %v304_v22 }
  0x8a   :  { %5142 = vst [vmem:[#allocation32_spill] sm:$0xff] %v2547_v27  ;;  %v2557_v39 = vadd.f32 %v2523_v44, %v343_v28  ;;  %v344_v45 = vsub.f32 0.0, %v312_v38 }
  0x8b   :  { %5143 = vst [vmem:[#allocation33_spill] sm:$0xff] %v2552_v30  ;;  %v2560_v12 = vadd.f32 %v2500_v36, %v340_v37 }
  0x8c   :  { %5144 = vst [vmem:[#allocation34_spill] sm:$0xff] %v2557_v39  ;;  %v2565_v48 = vadd.f32 %v2523_v44, %v344_v45 }
  0x8d   :  { %511 = vmax.xlane.f32.xlu1 %v2533_v59  ;;  %523 = vmax.xlane.f32.xlu0 %v2536_v60  ;;  %5145 = vst [vmem:[#allocation35_spill] sm:$0xff] %v2560_v12 }
  0x8e   :  { %5146 = vst [vmem:[#allocation36_spill] sm:$0xff] %v2565_v48 }
  0x91   :  { %525 = vmax.xlane.f32.xlu1 %v2539_v2  ;;  %505 = vmax.xlane.f32.xlu0 %v2544_v15  ;;  %v2181_v49 = vpop.eup %2180 }
  0x92   :  { %v1876_v51 = vmul.f32 0.6931472, %v2181_v49 }
  0x94   :  { %v1877_v53 = vsub.f32 0.0, %v1876_v51 }
  0x95   :  { %519 = vmax.xlane.f32.xlu1 %v2547_v27  ;;  %513 = vmax.xlane.f32.xlu0 %v2552_v30 }
  0x96   :  { %2182 = vlog2.f32 %v1877_v53 }
  0x99   :  { %527 = vmax.xlane.f32.xlu1 %v2557_v39  ;;  %521 = vmax.xlane.f32.xlu0 %v2560_v12 }
  0x9d   :  { %529 = vmax.xlane.f32.xlu1 %v2565_v48  ;;  %79 = vmax.xlane.f32.xlu0 %v2381_v33 }
  0xa1   :  { %1863 = vmax.xlane.f32.xlu1 %v2569_v52 }
  0xa3   :  { %v2183_v54 = vpop.eup %2182 }
  0xa4   :  { %v1879_v56 = vmul.f32 0.6931472, %v2183_v54 }
  0xa6   :  { %v1880_v61 = vsub.f32 0.0, %v1879_v56 }
  0xa8   :  { %v2573_v63 = vadd.f32 %v1880_v61, %v2569_v52  ;;  %v2610_v61 = vand.u32 127, %v72_v6 }
  0xaa   :  { %5148 = vst [vmem:[#allocation38_spill] sm:$0xff] %v2573_v63  ;;  %1882 = vmax.xlane.f32.xlu0 %v2573_v63  ;;  %5149 = vst [vmem:[#allocation39_spill] sm:$0xff] %v2610_v61 }
  0xe6   :  { %v476_v1 = vpop.xlane.xlu0 %475 }
  0xe7   :  { %vm535_vm0 = vcmp.ge.f32.partialorder %v2414_v17, %v476_v1  ;;  %v484_v3 = vpop.xlane.xlu1 %483 }
  0xe8   :  { %v1047_v5 = vsel %vm535_vm0, %v2399_v21, -1e+09  ;;  %vm539_vm1 = vcmp.ge.f32.partialorder %v2417_v26, %v484_v3 }
  0xe9   :  { %1083 = vmax.xlane.f32.xlu1 %v1047_v5  ;;  %v1051_v11 = vsel %vm539_vm1, %v2402_v25, -1e+09  ;;  %v2631_v55 = vsel %vm539_vm1, %v2610_v61, 4294967295 }
  0xea   :  { %v2581_v7 = vpop.xlane.xlu0 %477  ;;  %5151 = vst [vmem:[#allocation41_spill] sm:$0xff] %v2631_v55  ;;  %v708_v63 = vshra.s32 %v2631_v55, 16 }
  0xeb   :  { %v2586_v16 = vpop.xlane.xlu1 %485 }
  0xec   :  { %v2653_v36 = vcvt.s32.f32 %v708_v63  ;;  %vm540_vm1 = vcmp.ge.f32.partialorder %v2425_v42, %v2586_v16 }
  0xed   :  { %1091 = vmax.xlane.f32.xlu1 %v1051_v11 }
  0xee   :  { %v468_v22 = vpop.xlane.xlu0 %467  ;;  %5154 = vst [vmem:[#allocation44_spill] sm:$0xff] %v2653_v36 }
  0xef   :  { %vm531_vm2 = vcmp.ge.f32.partialorder %v2429_v57, %v468_v22  ;;  %v2589_v24 = vpop.xlane.xlu1 %469 }
  0xf0   :  { %v1043_v28 = vsel %vm531_vm2, %v2393_v8, -1e+09  ;;  %v2646_v44 = vsel %vm531_vm2, %v2610_v61, 4294967295  ;;  %vm532_vm2 = vcmp.ge.f32.partialorder %v2432_v58, %v2589_v24 }
  0xf1   :  { %1075 = vmax.xlane.f32.xlu1 %v1043_v28  ;;  %5153 = vst [vmem:[#allocation43_spill] sm:$0xff] %v2646_v44 }
  0xf2   :  { %v480_v37 = vpop.xlane.xlu0 %479 }
  0xf3   :  { %vm537_vm3 = vcmp.ge.f32.partialorder %v2441_v10, %v480_v37  ;;  %v2595_v38 = vpop.xlane.xlu1 %491 }
  0xf4   :  { %v1049_v45 = vsel %vm537_vm3, %v2399_v21, -1e+09 }
  0xf5   :  { %1087 = vmax.xlane.f32.xlu1 %v1049_v45  ;;  %v2621_v45 = vsel %vm535_vm0, %v2610_v61, 4294967295  ;;  %vm536_vm0 = vcmp.ge.f32.partialorder %v2421_v35, %v2581_v7 }
  0xf6   :  { %v494_v49 = vpop.xlane.xlu0 %493  ;;  %5150 = vst [vmem:[#allocation40_spill] sm:$0xff] %v2621_v45 }
  0xf7   :  { %vm544_vm4 = vcmp.ge.f32.partialorder %v2457_v18, %v494_v49  ;;  %v2601_v51 = vpop.xlane.xlu1 %487 }
  0xf8   :  { %v1056_v53 = vsel %vm544_vm4, %v2405_v29, -1e+09  ;;  %v2672_v63 = vsel %vm544_vm4, %v2610_v61, 4294967295  ;;  %vm541_vm4 = vcmp.ge.f32.partialorder %v2461_v31, %v2601_v51 }
  0xf9   :  { %1101 = vmax.xlane.f32.xlu1 %v1056_v53  ;;  %5158 = vst [vmem:[#allocation48_spill] sm:$0xff] %v2672_v63  ;;  %v2925_v24 = vsel %vm541_vm4, %v2610_v61, 4294967295 }
  0xfa   :  { %v500_v54 = vpop.xlane.xlu0 %499 }
  0xfb   :  { %vm547_vm5 = vcmp.ge.f32.partialorder %v2464_v32, %v500_v54  ;;  %v2607_v56 = vpop.xlane.xlu1 %501 }
  0xfc   :  { %v1059_v5 = vsel %vm547_vm5, %v2437_v4, -1e+09 }
  0xfd   :  { %1107 = vmax.xlane.f32.xlu1 %v1059_v5  ;;  %v652_v5 = vshra.s32 %v2621_v45, 16 }
  0xfe   :  { %v472_v11 = vpop.xlane.xlu0 %471 }
  0xff   :  { %vm533_vm6 = vcmp.ge.f32.partialorder %v2476_v62, %v472_v11  ;;  %v2616_v28 = vpop.xlane.xlu1 %481 }
 0x100   :  { %v1045_v6 = vsel %vm533_vm6, %v2393_v8, -1e+09 }
 0x101   :  { %1079 = vmax.xlane.f32.xlu1 %v1045_v6  ;;  %v2640_v6 = vcvt.s32.f32 %v652_v5  ;;  %v2659_v5 = vsel %vm537_vm3, %v2610_v61, 4294967295  ;;  %vm543_vm3 = vcmp.ge.f32.partialorder %v2451_v14, %v2595_v38  ;;  %v736_v14 = vshra.s32 %v2925_v24, 16 }
 0x102   :  { %v496_v53 = vpop.xlane.xlu0 %495  ;;  %5155 = vst [vmem:[#allocation45_spill] sm:$0xff] %v2659_v5  ;;  %v680_v55 = vshra.s32 %v2659_v5, 16 }
 0x103   :  { %vm545_vm7 = vcmp.ge.f32.partialorder %v2486_v41, %v496_v53  ;;  %v2636_v1 = vpop.xlane.xlu1 %507  ;;  %5152 = vst [vmem:[#allocation42_spill] sm:$0xff] %v2640_v6 }
 0x104   :  { %v1057_v17 = vsel %vm545_vm7, %v2405_v29, -1e+09 }
 0x105   :  { %1103 = vmax.xlane.f32.xlu1 %v1057_v17  ;;  %v596_v17 = vshra.s32 %v2646_v44, 16  ;;  %v778_v44 = vshra.s32 %v2672_v63, 16 }
 0x106   :  { %v2638_v20 = vpop.xlane.xlu0 %509 }
 0x107   :  { %vm552_vm8 = vcmp.ge.f32.partialorder %v2496_v50, %v2638_v20  ;;  %v1055_v50 = vsel %vm543_vm3, %v2405_v29, -1e+09 }
 0x108   :  { %v2727_v41 = vsel %vm552_vm8, %v2610_v61, 4294967295 }
 0x109   :  { %655 = vmax.xlane.f32.xlu1 %v2640_v6  ;;  %v2666_v6 = vcvt.s32.f32 %v596_v17  ;;  %v2685_v17 = vsel %vm547_vm5, %v2610_v61, 4294967295  ;;  %5174 = vst [vmem:[#allocation64_spill] sm:$0xff] %v2727_v41  ;;  %vm548_vm5 = vcmp.ge.f32.partialorder %v2471_v46, %v2607_v56 }
 0x10a   :  { %v2649_v26 = vpop.xlane.xlu0 %503  ;;  %v2651_v3 = vpop.xlane.xlu1 %489  ;;  %5162 = vst [vmem:[#allocation52_spill] sm:$0xff] %v2685_v17  ;;  %v820_v5 = vshra.s32 %v2685_v17, 16  ;;  %v2935_v38 = vsel %vm548_vm5, %v2610_v61, 4294967295 }
 0x10b   :  { %5157 = vst [vmem:[#allocation47_spill] sm:$0xff] %v2666_v6  ;;  %vm549_vm9 = vcmp.ge.f32.partialorder %v2504_v0, %v2649_v26  ;;  %v2879_v0 = vsel %vm536_vm0, %v2610_v61, 4294967295  ;;  %v1060_v26 = vsel %vm548_vm5, %v2437_v4, -1e+09  ;;  %v834_v31 = vshra.s32 %v2935_v38, 16 }
 0x10c   :  { %v1061_v20 = vsel %vm549_vm9, %v2437_v4, -1e+09 }
 0x10d   :  { %711 = vmax.xlane.f32.xlu1 %v2653_v36  ;;  %v2679_v36 = vcvt.s32.f32 %v680_v55  ;;  %v2698_v55 = vsel %vm533_vm6, %v2610_v61, 4294967295  ;;  %vm538_vm6 = vcmp.ge.f32.partialorder %v2480_v9, %v2616_v28  ;;  %v2950_v46 = vcvt.s32.f32 %v834_v31 }
 0x10e   :  { %v2662_v57 = vpop.xlane.xlu0 %517  ;;  %v2664_v22 = vpop.xlane.xlu1 %515  ;;  %5166 = vst [vmem:[#allocation56_spill] sm:$0xff] %v2698_v55  ;;  %v624_v63 = vshra.s32 %v2698_v55, 16  ;;  %v1050_v35 = vsel %vm538_vm6, %v2399_v21, -1e+09  ;;  %v2945_v51 = vsel %vm538_vm6, %v2610_v61, 4294967295 }
 0x10f   :  { %5156 = vst [vmem:[#allocation46_spill] sm:$0xff] %v2662_v57  ;;  %5161 = vst [vmem:[#allocation51_spill] sm:$0xff] %v2679_v36  ;;  %vm556_vm10 = vcmp.ge.f32.partialorder %v2510_v23, %v2662_v57  ;;  %v694_v56 = vshra.s32 %v2945_v51, 16  ;;  %v5197_v23 = vld [vmem:[#allocation41_spill] sm:$0xff] }
 0x110   :  { %v2720_v17 = vcvt.s32.f32 %v624_v63  ;;  %v890_v63 = vshra.s32 %v2727_v41, 16  ;;  %v2761_v12 = vsel %vm556_vm10, %v2610_v61, 4294967295 }
 0x111   :  { %599 = vmax.xlane.f32.xlu1 %v2666_v6  ;;  %v2692_v6 = vcvt.s32.f32 %v778_v44  ;;  %v2711_v44 = vsel %vm545_vm7, %v2610_v61, 4294967295  ;;  %vm551_vm7 = vcmp.ge.f32.partialorder %v2490_v47, %v2636_v1  ;;  %v2964_v28 = vcvt.s32.f32 %v694_v56 }
 0x112   :  { %v2675_v10 = vpop.xlane.xlu0 %497  ;;  %v2677_v37 = vpop.xlane.xlu1 %473  ;;  %5170 = vst [vmem:[#allocation60_spill] sm:$0xff] %v2711_v44  ;;  %5173 = vst [vmem:[#allocation63_spill] sm:$0xff] %v2720_v17  ;;  %v2754_v45 = vcvt.s32.f32 %v890_v63 }
 0x113   :  { %5159 = vst [vmem:[#allocation49_spill] sm:$0xff] %v2675_v10  ;;  %5160 = vst [vmem:[#allocation50_spill] sm:$0xff] %v2677_v37  ;;  %vm546_vm11 = vcmp.ge.f32.partialorder %v2520_v40, %v2675_v10 }
 0x114   :  { %5165 = vst [vmem:[#allocation55_spill] sm:$0xff] %v2692_v6  ;;  %v2777_v57 = vsel %vm546_vm11, %v2610_v61, 4294967295 }
 0x115   :  { %683 = vmax.xlane.f32.xlu1 %v2679_v36  ;;  %v2705_v36 = vcvt.s32.f32 %v820_v5  ;;  %v792_v5 = vshra.s32 %v2711_v44, 16  ;;  %v2743_v44 = vsel %vm549_vm9, %v2610_v61, 4294967295  ;;  %vm555_vm9 = vcmp.ge.f32.partialorder %v2517_v43, %v2664_v22 }
 0x116   :  { %v2688_v18 = vpop.xlane.xlu1 %511  ;;  %v2690_v49 = vpop.xlane.xlu0 %523  ;;  %v848_v41 = vshra.s32 %v2743_v44, 16  ;;  %v2985_v31 = vsel %vm555_vm9, %v2610_v61, 4294967295 }
 0x117   :  { %5163 = vst [vmem:[#allocation53_spill] sm:$0xff] %v2688_v18  ;;  %5164 = vst [vmem:[#allocation54_spill] sm:$0xff] %v2690_v49  ;;  %vm559_vm12 = vcmp.ge.f32.partialorder %v2536_v60, %v2690_v49 }
 0x118   :  { %5169 = vst [vmem:[#allocation59_spill] sm:$0xff] %v2705_v36  ;;  %v2770_v63 = vcvt.s32.f32 %v848_v41  ;;  %v806_v41 = vshra.s32 %v2777_v57, 16 }
 0x119   :  { %781 = vmax.xlane.f32.xlu1 %v2692_v6 }
 0x11a   :  { %v2701_v32 = vpop.xlane.xlu1 %525  ;;  %v2703_v54 = vpop.xlane.xlu0 %505 }
 0x11b   :  { %5167 = vst [vmem:[#allocation57_spill] sm:$0xff] %v2701_v32  ;;  %5168 = vst [vmem:[#allocation58_spill] sm:$0xff] %v2703_v54 }
 0x11d   :  { %823 = vmax.xlane.f32.xlu1 %v2705_v36  ;;  %v2736_v36 = vcvt.s32.f32 %v792_v5 }
 0x11e   :  { %v2716_v62 = vpop.xlane.xlu1 %519  ;;  %v2718_v11 = vpop.xlane.xlu0 %513 }
 0x11f   :  { %5171 = vst [vmem:[#allocation61_spill] sm:$0xff] %v2716_v62  ;;  %5172 = vst [vmem:[#allocation62_spill] sm:$0xff] %v2718_v11  ;;  %vm557_vm13 = vcmp.ge.f32.partialorder %v2547_v27, %v2716_v62 }
 0x120   :  { %5177 = vst [vmem:[#allocation67_spill] sm:$0xff] %v2736_v36 }
 0x121   :  { %627 = vmax.xlane.f32.xlu1 %v2720_v17 }
 0x122   :  { %v2732_v53 = vpop.xlane.xlu1 %527  ;;  %v2734_v55 = vpop.xlane.xlu0 %521 }
 0x123   :  { %5175 = vst [vmem:[#allocation65_spill] sm:$0xff] %v2732_v53  ;;  %5176 = vst [vmem:[#allocation66_spill] sm:$0xff] %v2734_v55  ;;  %vm561_vm14 = vcmp.ge.f32.partialorder %v2557_v39, %v2732_v53 }
 0x125   :  { %795 = vmax.xlane.f32.xlu1 %v2736_v36 }
 0x126   :  { %v2748_v17 = vpop.xlane.xlu1 %529  ;;  %v2750_v6 = vpop.xlane.xlu0 %79 }
 0x127   :  { %5178 = vst [vmem:[#allocation68_spill] sm:$0xff] %v2748_v17  ;;  %5179 = vst [vmem:[#allocation69_spill] sm:$0xff] %v2750_v6  ;;  %v81_v5 = vsub.f32 %v2381_v33, %v2750_v6  ;;  %v946_v6 = vshra.s32 %v2761_v12, 16  ;;  %vm5027_vm15 = vcmp.ge.f32.partialorder %v2565_v48, %v2748_v17  ;;  %v1052_v17 = vsel %vm540_vm1, %v2402_v25, -1e+09 }
 0x128   :  { %v1044_v48 = vsel %vm532_vm2, %v2393_v8, -1e+09 }
 0x129   :  { %v82_v36 = vmul.f32 1.442695, %v81_v5  ;;  %893 = vmax.xlane.f32.xlu1 %v2754_v45 }
 0x12a   :  { %v2766_v55 = vpop.xlane.xlu1 %1863 }
 0x12b   :  { %5180 = vst [vmem:[#allocation70_spill] sm:$0xff] %v2766_v55  ;;  %2184 = vpow2.f32 %v82_v36  ;;  %v1865_v33 = vsub.f32 %v2569_v52, %v2766_v55  ;;  %v2782_v36 = vcvt.s32.f32 %v946_v6  ;;  %v2789_v55 = vsel %vm559_vm12, %v2610_v61, 4294967295 }
 0x12c   :  { %v2794_v52 = vcvt.s32.f32 %v806_v41  ;;  %v2801_v6 = vsel %vm557_vm13, %v2610_v61, 4294967295  ;;  %v2813_v41 = vsel %vm561_vm14, %v2610_v61, 4294967295 }
 0x12d   :  { %v1866_v5 = vmul.f32 1.442695, %v1865_v33  ;;  %851 = vmax.xlane.f32.xlu1 %v2770_v63  ;;  %v988_v33 = vshra.s32 %v2789_v55, 16  ;;  %v960_v49 = vshra.s32 %v2801_v6, 16  ;;  %v1016_v27 = vshra.s32 %v2813_v41, 16 }
 0x12f   :  { %2186 = vpow2.f32 %v1866_v5  ;;  %v2806_v5 = vcvt.s32.f32 %v988_v33  ;;  %v2816_v62 = vcvt.s32.f32 %v960_v49  ;;  %v2824_v33 = vcvt.s32.f32 %v1016_v27 }
 0x130   :  { %v1048_v49 = vsel %vm536_vm0, %v2399_v21, -1e+09  ;;  %v2915_v21 = vsel %vm543_vm3, %v2610_v61, 4294967295  ;;  %vm534_vm0 = vcmp.ge.f32.partialorder %v2528_v19, %v2677_v37  ;;  %vm550_vm3 = vcmp.ge.f32.partialorder %v2544_v15, %v2703_v54  ;;  %v5191_v54 = vld [vmem:[#allocation66_spill] sm:$0xff]  ;;  %v5192_v15 = vld [vmem:[#allocation35_spill] sm:$0xff]  ;;  %v5194_v37 = vld [vmem:[#allocation40_spill] sm:$0xff] }
 0x131   :  { %949 = vmax.xlane.f32.xlu1 %v2782_v36  ;;  %5181 = vst [vmem:[#allocation71_spill] sm:$0xff] %v2824_v33  ;;  %v764_v58 = vshra.s32 %v2915_v21, 16  ;;  %vm558_vm5 = vcmp.ge.f32.partialorder %v5192_v15, %v5191_v54  ;;  %v651_v19 = vand.u32 65535, %v5194_v37 }
 0x133   :  { %v653_v8 = vcvt.s32.f32 %v651_v19  ;;  %v5200_v19 = vld [vmem:[#allocation44_spill] sm:$0xff] }
 0x135   :  { %809 = vmax.xlane.f32.xlu1 %v2794_v52 }
 0x138   :  { %v2185_v60 = vpop.eup %2184 }
 0x139   :  { %991 = vmax.xlane.f32.xlu1 %v2806_v5  ;;  %84 = vadd.xlane.f32.xlu0 %v2185_v60  ;;  %v2830_v60 = vsel %vm5027_vm15, %v2610_v61, 4294967295 }
 0x13a   :  { %5182 = vst [vmem:[#allocation72_spill] sm:$0xff] %v2830_v60  ;;  %v1030_v27 = vshra.s32 %v2830_v60, 16 }
 0x13c   :  { %v2187_v10 = vpop.eup %2186 }
 0x13d   :  { %963 = vmax.xlane.f32.xlu1 %v2816_v62  ;;  %1868 = vadd.xlane.f32.xlu0 %v2187_v10  ;;  %v1064_v10 = vsel %vm552_vm8, %v2468_v34, -1e+09  ;;  %vm542_vm8 = vcmp.ge.f32.partialorder %v2507_v13, %v2651_v3 }
 0x141   :  { %1019 = vmax.xlane.f32.xlu1 %v2824_v33  ;;  %1085 = vmax.xlane.f32.xlu0 %v1048_v49  ;;  %v2850_v49 = vcvt.s32.f32 %v1030_v27  ;;  %v2892_v27 = vsel %vm540_vm1, %v2610_v61, 4294967295  ;;  %vm553_vm1 = vcmp.ge.f32.partialorder %v2533_v59, %v2688_v18 }
 0x143   :  { %5183 = vst [vmem:[#allocation73_spill] sm:$0xff] %v2850_v49 }
 0x145   :  { %1117 = vmax.xlane.f32.xlu1 %v1064_v10  ;;  %1093 = vmax.xlane.f32.xlu0 %v1052_v17  ;;  %v666_v17 = vshra.s32 %v2879_v0, 16  ;;  %v722_v10 = vshra.s32 %v2892_v27, 16 }
 0x147   :  { %v2898_v7 = vcvt.s32.f32 %v666_v17  ;;  %v2908_v42 = vcvt.s32.f32 %v722_v10  ;;  %v2957_v17 = vsel %vm551_vm7, %v2610_v61, 4294967295  ;;  %v2971_v10 = vsel %vm542_vm8, %v2610_v61, 4294967295 }
 0x149   :  { %1033 = vmax.xlane.f32.xlu1 %v2850_v49  ;;  %1077 = vmax.xlane.f32.xlu0 %v1044_v48  ;;  %v1053_v48 = vsel %vm541_vm4, %v2402_v25, -1e+09  ;;  %vm554_vm4 = vcmp.ge.f32.partialorder %v2552_v30, %v2718_v11  ;;  %v3070_v11 = vsel %vm558_vm5, %v2610_v61, 4294967295  ;;  %v707_v49 = vand.u32 65535, %v5197_v23 }
 0x14b   :  { %v709_v15 = vcvt.s32.f32 %v707_v49 }
 0x14d   :  { %1111 = vmax.xlane.f32.xlu1 %v1061_v20  ;;  %1099 = vmax.xlane.f32.xlu0 %v1055_v50  ;;  %v2905_v20 = vsel %vm532_vm2, %v2610_v61, 4294967295  ;;  %vm560_vm2 = vcmp.ge.f32.partialorder %v2539_v2, %v2701_v32 }
 0x14e   :  { %v610_v16 = vshra.s32 %v2905_v20, 16 }
 0x150   :  { %v2918_v50 = vcvt.s32.f32 %v610_v16 }
 0x151   :  { %1095 = vmax.xlane.f32.xlu0 %v1053_v48  ;;  %v2928_v48 = vcvt.s32.f32 %v764_v58 }
 0x155   :  { %1109 = vmax.xlane.f32.xlu0 %v1060_v26  ;;  %v2938_v26 = vcvt.s32.f32 %v736_v14  ;;  %v750_v14 = vshra.s32 %v2971_v10, 16 }
 0x159   :  { %1089 = vmax.xlane.f32.xlu0 %v1050_v35  ;;  %v876_v35 = vshra.s32 %v2957_v17, 16 }
 0x15b   :  { %v2978_v58 = vcvt.s32.f32 %v876_v35  ;;  %v932_v35 = vshra.s32 %v2985_v31, 16 }
 0x15d   :  { %669 = vmax.xlane.f32.xlu0 %v2898_v7  ;;  %v3006_v39 = vcvt.s32.f32 %v932_v35 }
 0x161   :  { %725 = vmax.xlane.f32.xlu0 %v2908_v42 }
 0x165   :  { %613 = vmax.xlane.f32.xlu0 %v2918_v50 }
 0x169   :  { %767 = vmax.xlane.f32.xlu0 %v2928_v48 }
 0x16d   :  { %739 = vmax.xlane.f32.xlu0 %v2938_v26 }
 0x171   :  { %837 = vmax.xlane.f32.xlu0 %v2950_v46 }
 0x172   :  { %v2962_v9 = vpop.xlane.xlu1 %1083 }
 0x173   :  { %5184 = vst [vmem:[#allocation74_spill] sm:$0xff] %v2962_v9  ;;  %v2992_v9 = vcvt.s32.f32 %v750_v14 }
 0x175   :  { %697 = vmax.xlane.f32.xlu0 %v2964_v28 }
 0x176   :  { %v2976_v16 = vpop.xlane.xlu1 %1091 }
 0x177   :  { %5185 = vst [vmem:[#allocation75_spill] sm:$0xff] %v2976_v16  ;;  %v2999_v16 = vsel %vm534_vm0, %v2610_v61, 4294967295 }
 0x178   :  { %v638_v14 = vshra.s32 %v2999_v16, 16 }
 0x179   :  { %879 = vmax.xlane.f32.xlu0 %v2978_v58 }
 0x17a   :  { %v2990_v56 = vpop.xlane.xlu1 %1075  ;;  %v3020_v40 = vcvt.s32.f32 %v638_v14 }
 0x17b   :  { %5186 = vst [vmem:[#allocation76_spill] sm:$0xff] %v2990_v56  ;;  %v3013_v56 = vsel %vm553_vm1, %v2610_v61, 4294967295 }
 0x17c   :  { %v904_v35 = vshra.s32 %v3013_v56, 16 }
 0x17d   :  { %753 = vmax.xlane.f32.xlu0 %v2992_v9 }
 0x17e   :  { %v3004_v53 = vpop.xlane.xlu1 %1087  ;;  %v3034_v59 = vcvt.s32.f32 %v904_v35 }
 0x17f   :  { %5187 = vst [vmem:[#allocation77_spill] sm:$0xff] %v3004_v53  ;;  %v3027_v53 = vsel %vm560_vm2, %v2610_v61, 4294967295 }
 0x180   :  { %v1002_v14 = vshra.s32 %v3027_v53, 16 }
 0x181   :  { %935 = vmax.xlane.f32.xlu0 %v3006_v39 }
 0x182   :  { %v3018_v4 = vpop.xlane.xlu1 %1101  ;;  %v3048_v2 = vcvt.s32.f32 %v1002_v14 }
 0x183   :  { %5188 = vst [vmem:[#allocation78_spill] sm:$0xff] %v3018_v4  ;;  %v3041_v4 = vsel %vm550_vm3, %v2610_v61, 4294967295 }
 0x184   :  { %v862_v35 = vshra.s32 %v3041_v4, 16 }
 0x185   :  { %641 = vmax.xlane.f32.xlu0 %v3020_v40 }
 0x186   :  { %v3032_v18 = vpop.xlane.xlu1 %1107 }
 0x187   :  { %5189 = vst [vmem:[#allocation79_spill] sm:$0xff] %v3032_v18  ;;  %v3055_v18 = vsel %vm554_vm4, %v2610_v61, 4294967295  ;;  %v5199_v61 = vld [vmem:[#allocation43_spill] sm:$0xff] }
 0x188   :  { %v918_v14 = vshra.s32 %v3055_v18, 16  ;;  %v595_v33 = vand.u32 65535, %v5199_v61  ;;  %v1063_v61 = vsel %vm551_vm7, %v2468_v34, -1e+09 }
 0x189   :  { %907 = vmax.xlane.f32.xlu0 %v3034_v59 }
 0x18a   :  { %v3046_v32 = vpop.xlane.xlu1 %1079  ;;  %v3078_v37 = vcvt.s32.f32 %v918_v14 }
 0x18b   :  { %5190 = vst [vmem:[#allocation80_spill] sm:$0xff] %v3046_v32  ;;  %v3063_v32 = vcvt.s32.f32 %v862_v35  ;;  %v974_v35 = vshra.s32 %v3070_v11, 16 }
 0x18d   :  { %1005 = vmax.xlane.f32.xlu0 %v3048_v2  ;;  %5195 = vst [vmem:[#allocation40_spill] sm:$0xff] %v3063_v32  ;;  %v3087_v23 = vcvt.s32.f32 %v974_v35  ;;  %v5203_v35 = vld [vmem:[#allocation48_spill] sm:$0xff] }
 0x18e   :  { %v3060_v29 = vpop.xlane.xlu1 %1103 }
 0x18f   :  { %5193 = vst [vmem:[#allocation81_spill] sm:$0xff] %v3060_v29  ;;  %v5198_v29 = vld [vmem:[#allocation42_spill] sm:$0xff] }
 0x191   :  { %865 = vmax.xlane.f32.xlu0 %v3063_v32 }
 0x192   :  { %v3073_v30 = vpop.xlane.xlu1 %655 }
 0x193   :  { %5196 = vst [vmem:[#allocation82_spill] sm:$0xff] %v3073_v30  ;;  %vm657_vm6 = vcmp.eq.f32.partialorder %v5198_v29, %v3073_v30  ;;  %v5202_v30 = vld [vmem:[#allocation47_spill] sm:$0xff] }
 0x194   :  { %v658_v60 = vsel %vm657_vm6, %v653_v8, -inf  ;;  %v597_v8 = vcvt.s32.f32 %v595_v33  ;;  %v5204_v33 = vld [vmem:[#allocation51_spill] sm:$0xff] }
 0x195   :  { %659 = vmax.xlane.f32.xlu1 %v658_v60  ;;  %921 = vmax.xlane.f32.xlu0 %v3078_v37  ;;  %v5201_v60 = vld [vmem:[#allocation45_spill] sm:$0xff] }
 0x196   :  { %v3082_v54 = vpop.xlane.xlu1 %711  ;;  %v679_v14 = vand.u32 65535, %v5201_v60 }
 0x197   :  { %vm713_vm15 = vcmp.eq.f32.partialorder %v5200_v19, %v3082_v54  ;;  %v777_v19 = vand.u32 65535, %v5203_v35 }
 0x198   :  { %v714_v32 = vsel %vm713_vm15, %v709_v15, -inf }
 0x199   :  { %715 = vmax.xlane.f32.xlu1 %v714_v32  ;;  %977 = vmax.xlane.f32.xlu0 %v3087_v23  ;;  %v681_v32 = vcvt.s32.f32 %v679_v14  ;;  %v779_v1 = vcvt.s32.f32 %v777_v19 }
 0x19a   :  { %v3090_v29 = vpop.xlane.xlu1 %599 }
 0x19b   :  { %vm601_vm6 = vcmp.eq.f32.partialorder %v5202_v30, %v3090_v29  ;;  %v1054_v30 = vsel %vm542_vm8, %v2402_v25, -1e+09 }
 0x19c   :  { %v602_v49 = vsel %vm601_vm6, %v597_v8, -inf  ;;  %v5205_v8 = vld [vmem:[#allocation55_spill] sm:$0xff] }
 0x19d   :  { %603 = vmax.xlane.f32.xlu1 %v602_v49  ;;  %1115 = vmax.xlane.f32.xlu0 %v1063_v61  ;;  %v5206_v49 = vld [vmem:[#allocation23_spill] sm:$0xff] }
 0x19e   :  { %v3099_v15 = vpop.xlane.xlu1 %683  ;;  %v1067_v61 = vsel %vm555_vm9, %v5206_v49, -1e+09 }
 0x19f   :  { %vm685_vm15 = vcmp.eq.f32.partialorder %v5204_v33, %v3099_v15 }
 0x1a0   :  { %v686_v60 = vsel %vm685_vm15, %v681_v32, -inf  ;;  %v3116_v32 = vpop.xlane.xlu0 %1882 }
 0x1a1   :  { %687 = vmax.xlane.f32.xlu1 %v686_v60  ;;  %1097 = vmax.xlane.f32.xlu0 %v1054_v30 }
 0x1a2   :  { %v3108_v47 = vpop.xlane.xlu1 %781 }
 0x1a3   :  { %vm783_vm7 = vcmp.eq.f32.partialorder %v5205_v8, %v3108_v47  ;;  %v665_v8 = vand.u32 65535, %v2879_v0 }
 0x1a4   :  { %v784_v14 = vsel %vm783_vm7, %v779_v1, -inf }
 0x1a5   :  { %785 = vmax.xlane.f32.xlu1 %v784_v14  ;;  %1123 = vmax.xlane.f32.xlu0 %v1067_v61  ;;  %v667_v61 = vcvt.s32.f32 %v665_v8  ;;  %v763_v8 = vand.u32 65535, %v2915_v21 }
 0x1a6   :  { %v3132_v43 = vpop.xlane.xlu1 %823 }
 0x1aa   :  { %v3136_v30 = vpop.xlane.xlu1 %627 }
 0x1c2   :  { %v3118_v13 = vpop.xlane.xlu0 %84 }
 0x1c3   :  { %2188 = vlog2.f32 %v3118_v13 }
 0x1c6   :  { %v3120_v25 = vpop.xlane.xlu0 %1868 }
 0x1c7   :  { %5207 = vst [vmem:[#allocation41_spill] sm:$0xff] %v3120_v25  ;;  %v765_v25 = vcvt.s32.f32 %v763_v8 }
 0x1ca   :  { %v3122_v3 = vpop.xlane.xlu0 %1085 }
 0x1cb   :  { %5208 = vst [vmem:[#allocation42_spill] sm:$0xff] %v3122_v3  ;;  %v609_v3 = vand.u32 65535, %v2905_v20 }
 0x1ce   :  { %v3124_v35 = vpop.xlane.xlu0 %1093 }
 0x1cf   :  { %5209 = vst [vmem:[#allocation43_spill] sm:$0xff] %v3124_v35  ;;  %v721_v35 = vand.u32 65535, %v2892_v27 }
 0x1d2   :  { %v3126_v19 = vpop.xlane.xlu0 %1077 }
 0x1d3   :  { %5210 = vst [vmem:[#allocation44_spill] sm:$0xff] %v3126_v19 }
 0x1d6   :  { %v3128_v33 = vpop.xlane.xlu0 %1099 }
 0x1d7   :  { %5211 = vst [vmem:[#allocation45_spill] sm:$0xff] %v3128_v33  ;;  %v3146_v33 = vpop.xlane.xlu1 %795 }
 0x1da   :  { %v3130_v60 = vpop.xlane.xlu0 %1095 }
 0x1db   :  { %5212 = vst [vmem:[#allocation47_spill] sm:$0xff] %v3130_v60  ;;  %v3154_v27 = vpop.xlane.xlu1 %893 }
 0x1de   :  { %v3134_v22 = vpop.xlane.xlu0 %1109 }
 0x1df   :  { %5213 = vst [vmem:[#allocation48_spill] sm:$0xff] %v3134_v22  ;;  %v723_v22 = vcvt.s32.f32 %v721_v35  ;;  %v5215_v35 = vld [vmem:[#allocation52_spill] sm:$0xff]  ;;  %v3166_v21 = vpop.xlane.xlu1 %851 }
 0x1e2   :  { %v3138_v1 = vpop.xlane.xlu0 %1089 }
 0x1e3   :  { %5214 = vst [vmem:[#allocation51_spill] sm:$0xff] %v3138_v1 }
 0x1e6   :  { %v3141_v14 = vpop.xlane.xlu0 %669 }
 0x1e7   :  { %vm671_vm8 = vcmp.eq.f32.partialorder %v2898_v7, %v3141_v14  ;;  %v611_v7 = vcvt.s32.f32 %v609_v3  ;;  %v5217_v3 = vld [vmem:[#allocation59_spill] sm:$0xff] }
 0x1e8   :  { %v672_v60 = vsel %vm671_vm8, %v667_v61, -inf  ;;  %v819_v61 = vand.u32 65535, %v5215_v35  ;;  %vm825_vm7 = vcmp.eq.f32.partialorder %v5217_v3, %v3132_v43  ;;  %v693_v3 = vand.u32 65535, %v2945_v51 }
 0x1e9   :  { %673 = vmax.xlane.f32.xlu0 %v672_v60  ;;  %v875_v51 = vand.u32 65535, %v2957_v17  ;;  %v749_v17 = vand.u32 65535, %v2971_v10 }
 0x1ea   :  { %v3148_v19 = vpop.xlane.xlu0 %725  ;;  %v821_v35 = vcvt.s32.f32 %v819_v61 }
 0x1eb   :  { %vm727_vm9 = vcmp.eq.f32.partialorder %v2908_v42, %v3148_v19  ;;  %v735_v42 = vand.u32 65535, %v2925_v24 }
 0x1ec   :  { %v728_v0 = vsel %vm727_vm9, %v723_v22, -inf  ;;  %v826_v24 = vsel %vm825_vm7, %v821_v35, -inf }
 0x1ed   :  { %729 = vmax.xlane.f32.xlu0 %v728_v0  ;;  %v737_v8 = vcvt.s32.f32 %v735_v42 }
 0x1ee   :  { %v3156_v1 = vpop.xlane.xlu0 %613 }
 0x1ef   :  { %vm615_vm6 = vcmp.eq.f32.partialorder %v2918_v50, %v3156_v1  ;;  %v5218_v50 = vld [vmem:[#allocation56_spill] sm:$0xff] }
 0x1f0   :  { %v616_v60 = vsel %vm615_vm6, %v611_v7, -inf  ;;  %v623_v0 = vand.u32 65535, %v5218_v50  ;;  %v833_v7 = vand.u32 65535, %v2935_v38  ;;  %v3180_v50 = vpop.xlane.xlu1 %949 }
 0x1f1   :  { %617 = vmax.xlane.f32.xlu0 %v616_v60 }
 0x1f2   :  { %v3161_v20 = vpop.xlane.xlu0 %767  ;;  %v625_v61 = vcvt.s32.f32 %v623_v0  ;;  %v835_v42 = vcvt.s32.f32 %v833_v7 }
 0x1f3   :  { %5216 = vst [vmem:[#allocation55_spill] sm:$0xff] %v3161_v20  ;;  %vm769_vm15 = vcmp.eq.f32.partialorder %v2928_v48, %v3161_v20  ;;  %v5220_v20 = vld [vmem:[#allocation63_spill] sm:$0xff] }
 0x1f4   :  { %v770_v22 = vsel %vm769_vm15, %v765_v25, -inf  ;;  %vm629_vm9 = vcmp.eq.f32.partialorder %v5220_v20, %v3136_v30  ;;  %v5221_v25 = vld [vmem:[#allocation60_spill] sm:$0xff]  ;;  %v3194_v0 = vpop.xlane.xlu1 %809 }
 0x1f5   :  { %771 = vmax.xlane.f32.xlu0 %v770_v22  ;;  %v791_v22 = vand.u32 65535, %v5221_v25  ;;  %v5223_v20 = vld [vmem:[#allocation64_spill] sm:$0xff] }
 0x1f6   :  { %v3172_v60 = vpop.xlane.xlu0 %739 }
 0x1f7   :  { %5219 = vst [vmem:[#allocation23_spill] sm:$0xff] %v3172_v60  ;;  %vm741_vm8 = vcmp.eq.f32.partialorder %v2938_v26, %v3172_v60  ;;  %v630_v26 = vsel %vm629_vm9, %v625_v61, -inf  ;;  %v793_v25 = vcvt.s32.f32 %v791_v22  ;;  %v695_v60 = vcvt.s32.f32 %v693_v3 }
 0x1f8   :  { %v742_v48 = vsel %vm741_vm8, %v737_v8, -inf  ;;  %v5222_v8 = vld [vmem:[#allocation67_spill] sm:$0xff]  ;;  %vm895_vm8 = vcmp.eq.f32.partialorder %v2754_v45, %v3154_v27  ;;  %v847_v61 = vand.u32 65535, %v2743_v44  ;;  %v877_v3 = vcvt.s32.f32 %v875_v51 }
 0x1f9   :  { %827 = vmax.xlane.f32.xlu0 %v826_v24  ;;  %743 = vmax.xlane.f32.xlu1 %v742_v48  ;;  %vm797_vm15 = vcmp.eq.f32.partialorder %v5222_v8, %v3146_v33  ;;  %v889_v24 = vand.u32 65535, %v5223_v20  ;;  %v945_v45 = vand.u32 65535, %v2761_v12  ;;  %v931_v44 = vand.u32 65535, %v2985_v31 }
 0x1fa   :  { %v3182_v38 = vpop.xlane.xlu0 %837  ;;  %v751_v8 = vcvt.s32.f32 %v749_v17  ;;  %v805_v12 = vand.u32 65535, %v2777_v57  ;;  %v903_v57 = vand.u32 65535, %v3013_v56 }
 0x1fb   :  { %vm839_vm6 = vcmp.eq.f32.partialorder %v2950_v46, %v3182_v38  ;;  %v798_v46 = vsel %vm797_vm15, %v793_v25, -inf  ;;  %v891_v22 = vcvt.s32.f32 %v889_v24  ;;  %v947_v24 = vcvt.s32.f32 %v945_v45 }
 0x1fc   :  { %v840_v35 = vsel %vm839_vm6, %v835_v42, -inf  ;;  %vm853_vm6 = vcmp.eq.f32.partialorder %v2770_v63, %v3166_v21  ;;  %v637_v63 = vand.u32 65535, %v2999_v16  ;;  %v933_v51 = vcvt.s32.f32 %v931_v44 }
 0x1fd   :  { %631 = vmax.xlane.f32.xlu0 %v630_v26  ;;  %841 = vmax.xlane.f32.xlu1 %v840_v35  ;;  %v849_v35 = vcvt.s32.f32 %v847_v61 }
 0x1fe   :  { %v3190_v48 = vpop.xlane.xlu0 %697  ;;  %v639_v61 = vcvt.s32.f32 %v637_v63  ;;  %v5226_v63 = vld [vmem:[#allocation71_spill] sm:$0xff] }
 0x1ff   :  { %vm699_vm7 = vcmp.eq.f32.partialorder %v2964_v28, %v3190_v48  ;;  %v896_v28 = vsel %vm895_vm8, %v891_v22, -inf }
 0x200   :  { %v700_v7 = vsel %vm699_vm7, %v695_v60, -inf  ;;  %v3208_v60 = vpop.xlane.xlu1 %991  ;;  %vm951_vm7 = vcmp.eq.f32.partialorder %v2782_v36, %v3180_v50  ;;  %v987_v36 = vand.u32 65535, %v2789_v55 }
 0x201   :  { %799 = vmax.xlane.f32.xlu0 %v798_v46  ;;  %701 = vmax.xlane.f32.xlu1 %v700_v7  ;;  %v807_v7 = vcvt.s32.f32 %v805_v12 }
 0x202   :  { %v3200_v42 = vpop.xlane.xlu0 %879  ;;  %v989_v55 = vcvt.s32.f32 %v987_v36 }
 0x203   :  { %vm881_vm9 = vcmp.eq.f32.partialorder %v2978_v58, %v3200_v42  ;;  %v854_v58 = vsel %vm853_vm6, %v849_v35, -inf }
 0x204   :  { %v882_v26 = vsel %vm881_vm9, %v877_v3, -inf  ;;  %v3222_v25 = vpop.xlane.xlu1 %963  ;;  %vm811_vm9 = vcmp.eq.f32.partialorder %v2794_v52, %v3194_v0  ;;  %v1001_v52 = vand.u32 65535, %v3027_v53  ;;  %v905_v3 = vcvt.s32.f32 %v903_v57 }
 0x205   :  { %897 = vmax.xlane.f32.xlu0 %v896_v28  ;;  %883 = vmax.xlane.f32.xlu1 %v882_v26  ;;  %v861_v26 = vand.u32 65535, %v3041_v4 }
 0x206   :  { %v3210_v10 = vpop.xlane.xlu0 %753  ;;  %v1003_v53 = vcvt.s32.f32 %v1001_v52 }
 0x207   :  { %vm755_vm15 = vcmp.eq.f32.partialorder %v2992_v9, %v3210_v10  ;;  %v952_v9 = vsel %vm951_vm7, %v947_v24, -inf  ;;  %v5227_v24 = vld [vmem:[#allocation72_spill] sm:$0xff] }
 0x208   :  { %v756_v20 = vsel %vm755_vm15, %v751_v8, -inf  ;;  %vm993_vm15 = vcmp.eq.f32.partialorder %v2806_v5, %v3208_v60  ;;  %v3235_v22 = vpop.xlane.xlu1 %1019  ;;  %v959_v5 = vand.u32 65535, %v2801_v6  ;;  %v1015_v8 = vand.u32 65535, %v2813_v41 }
 0x209   :  { %855 = vmax.xlane.f32.xlu0 %v854_v58  ;;  %757 = vmax.xlane.f32.xlu1 %v756_v20  ;;  %v994_v28 = vsel %vm993_vm15, %v989_v55, -inf  ;;  %v863_v58 = vcvt.s32.f32 %v861_v26  ;;  %v5225_v20 = vld [vmem:[#allocation40_spill] sm:$0xff]  ;;  %vm1021_vm15 = vcmp.eq.f32.partialorder %v5226_v63, %v3235_v22 }
 0x20a   :  { %v3218_v31 = vpop.xlane.xlu0 %935  ;;  %v961_v6 = vcvt.s32.f32 %v959_v5 }
 0x20b   :  { %vm937_vm8 = vcmp.eq.f32.partialorder %v3006_v39, %v3218_v31  ;;  %v812_v39 = vsel %vm811_vm9, %v807_v7, -inf  ;;  %vm965_vm9 = vcmp.eq.f32.partialorder %v2816_v62, %v3222_v25  ;;  %v973_v62 = vand.u32 65535, %v3070_v11  ;;  %v5228_v7 = vld [vmem:[#allocation73_spill] sm:$0xff] }
 0x20c   :  { %v938_v46 = vsel %vm937_vm8, %v933_v51, -inf  ;;  %v3247_v44 = vpop.xlane.xlu1 %1117  ;;  %v966_v12 = vsel %vm965_vm9, %v961_v6, -inf }
 0x20d   :  { %953 = vmax.xlane.f32.xlu0 %v952_v9  ;;  %939 = vmax.xlane.f32.xlu1 %v938_v46  ;;  %5224 = vst [vmem:[#allocation52_spill] sm:$0xff] %v3247_v44  ;;  %v1017_v9 = vcvt.s32.f32 %v1015_v8  ;;  %v5258_v8 = vld [vmem:[#allocation68_spill] sm:$0xff] }
 0x20e   :  { %v3228_v16 = vpop.xlane.xlu0 %641 }
 0x20f   :  { %vm643_vm6 = vcmp.eq.f32.partialorder %v3020_v40, %v3228_v16  ;;  %v1022_v57 = vsel %vm1021_vm15, %v1017_v9, -inf  ;;  %v5244_v9 = vld [vmem:[#allocation22_spill] sm:$0xff] }
 0x210   :  { %v644_v17 = vsel %vm643_vm6, %v639_v61, -inf  ;;  %v3261_v51 = vpop.xlane.xlu1 %1033 }
 0x211   :  { %813 = vmax.xlane.f32.xlu0 %v812_v39  ;;  %645 = vmax.xlane.f32.xlu1 %v644_v17  ;;  %v975_v39 = vcvt.s32.f32 %v973_v62 }
 0x212   :  { %v3237_v56 = vpop.xlane.xlu0 %907 }
 0x213   :  { %vm909_vm7 = vcmp.eq.f32.partialorder %v3034_v59, %v3237_v56  ;;  %v917_v59 = vand.u32 65535, %v3055_v18  ;;  %v1029_v18 = vand.u32 65535, %v5227_v24 }
 0x214   :  { %v910_v40 = vsel %vm909_vm7, %v905_v3, -inf  ;;  %v1068_v3 = vsel %vm556_vm10, %v5206_v49, -1e+09 }
 0x215   :  { %995 = vmax.xlane.f32.xlu0 %v994_v28  ;;  %911 = vmax.xlane.f32.xlu1 %v910_v40  ;;  %v919_v46 = vcvt.s32.f32 %v917_v59  ;;  %v1031_v11 = vcvt.s32.f32 %v1029_v18  ;;  %v5231_v28 = vld [vmem:[#allocation20_spill] sm:$0xff]  ;;  %v1070_v59 = vsel %vm558_vm5, %v5206_v49, -1e+09 }
 0x216   :  { %v3243_v45 = vpop.xlane.xlu0 %1005  ;;  %v1046_v5 = vsel %vm534_vm0, %v5231_v28, -1e+09  ;;  %v1066_v28 = vsel %vm554_vm4, %v2468_v34, -1e+09 }
 0x217   :  { %vm1007_vm8 = vcmp.eq.f32.partialorder %v3048_v2, %v3243_v45 }
 0x218   :  { %v1008_v35 = vsel %vm1007_vm8, %v1003_v53, -inf  ;;  %vm1035_vm8 = vcmp.eq.f32.partialorder %v5228_v7, %v3261_v51  ;;  %v5234_v53 = vld [vmem:[#allocation21_spill] sm:$0xff]  ;;  %v690_v7 = vcvt.f32.s32 %v3099_v15 }
 0x219   :  { %1009 = vmax.xlane.f32.xlu1 %v1008_v35  ;;  %v1036_v17 = vsel %vm1035_vm8, %v1031_v11, -inf  ;;  %v788_v11 = vcvt.f32.s32 %v3108_v47  ;;  %v634_v35 = vcvt.f32.s32 %v3136_v30 }
 0x21a   :  { %v3253_v4 = vpop.xlane.xlu0 %865 }
 0x21b   :  { %vm867_vm6 = vcmp.eq.f32.partialorder %v5225_v20, %v3253_v4  ;;  %v5239_v20 = vld [vmem:[#allocation26_spill] sm:$0xff] }
 0x21c   :  { %v868_v2 = vsel %vm867_vm6, %v863_v58, -inf  ;;  %v1065_v58 = vsel %vm553_vm1, %v2468_v34, -1e+09  ;;  %v1071_v63 = vsel %vm559_vm12, %v5239_v20, -1e+09 }
 0x21d   :  { %967 = vmax.xlane.f32.xlu1 %v966_v12  ;;  %869 = vmax.xlane.f32.xlu0 %v868_v2  ;;  %v1072_v18 = vsel %vm560_vm2, %v5239_v20, -1e+09  ;;  %v3328_v2 = vpop.xlane.xlu1 %1111 }
 0x21e   :  { %v3263_v41 = vpop.xlane.xlu0 %921  ;;  %5262 = vst [vmem:[#allocation56_spill] sm:$0xff] %v3328_v2 }
 0x21f   :  { %vm923_vm7 = vcmp.eq.f32.partialorder %v3078_v37, %v3263_v41 }
 0x220   :  { %v924_v36 = vsel %vm923_vm7, %v919_v46, -inf }
 0x221   :  { %1023 = vmax.xlane.f32.xlu1 %v1022_v57  ;;  %925 = vmax.xlane.f32.xlu0 %v924_v36  ;;  %v1062_v36 = vsel %vm550_vm3, %v5244_v9, -1e+09  ;;  %v5264_v9 = vld [vmem:[#allocation82_spill] sm:$0xff]  ;;  %v718_v57 = vcvt.f32.s32 %v3082_v54  ;;  %v830_v54 = vcvt.f32.s32 %v3132_v43  ;;  %v900_v43 = vcvt.f32.s32 %v3154_v27 }
 0x222   :  { %v3269_v61 = vpop.xlane.xlu0 %977  ;;  %v662_v46 = vcvt.f32.s32 %v5264_v9  ;;  %v956_v9 = vcvt.f32.s32 %v3180_v50 }
 0x223   :  { %vm979_vm9 = vcmp.eq.f32.partialorder %v3087_v23, %v3269_v61  ;;  %v1058_v23 = vsel %vm546_vm11, %v5234_v53, -1e+09 }
 0x224   :  { %v980_v52 = vsel %vm979_vm9, %v975_v39, -inf  ;;  %v1069_v39 = vsel %vm557_vm13, %v5206_v49, -1e+09  ;;  %v663_v47 = vshll.u32 %v662_v46, 16 }
 0x225   :  { %1037 = vmax.xlane.f32.xlu1 %v1036_v17  ;;  %981 = vmax.xlane.f32.xlu0 %v980_v52  ;;  %v5249_v17 = vld [vmem:[#allocation38_spill] sm:$0xff]  ;;  %v5250_v52 = vld [vmem:[#allocation39_spill] sm:$0xff] }
 0x226   :  { %vm1884_vm10 = vcmp.ge.f32.partialorder %v5249_v17, %v3116_v32  ;;  %v3330_v24 = vpop.xlane.xlu0 %1115 }
 0x227   :  { %v1885_v37 = vsel %vm1884_vm10, %v5250_v52, 4294967295  ;;  %5263 = vst [vmem:[#allocation63_spill] sm:$0xff] %v3330_v24 }
 0x228   :  { %v1887_v53 = vshra.s32 %v1885_v37, 16 }
 0x229   :  { %1125 = vmax.xlane.f32.xlu1 %v1068_v3  ;;  %1081 = vmax.xlane.f32.xlu0 %v1046_v5  ;;  %v1073_v5 = vsel %vm561_vm14, %v5239_v20, -1e+09 }
 0x22a   :  { %v3324_v34 = vcvt.s32.f32 %v1887_v53 }
 0x22c   :  { %5260 = vst [vmem:[#allocation59_spill] sm:$0xff] %v3324_v34 }
 0x22d   :  { %1105 = vmax.xlane.f32.xlu1 %v1058_v23  ;;  %1119 = vmax.xlane.f32.xlu0 %v1065_v58  ;;  %v5257_v23 = vld [vmem:[#allocation36_spill] sm:$0xff]  ;;  %v5261_v58 = vld [vmem:[#allocation37_spill] sm:$0xff] }
 0x22e   :  { %vm5259_vm11 = vcmp.ge.f32.partialorder %v5257_v23, %v5258_v8  ;;  %v1900_v12 = vsel %vm1884_vm10, %v5261_v58, -1e+09  ;;  %v789_v23 = vshll.u32 %v788_v11, 16  ;;  %v676_v8 = vcvt.f32.s32 %v3141_v14 }
 0x22f   :  { %v1074_v6 = vsel %vm5259_vm11, %v5239_v20, -1e+09  ;;  %v3335_v20 = vpop.xlane.xlu0 %1097  ;;  %v802_v58 = vcvt.f32.s32 %v3146_v33  ;;  %v816_v14 = vcvt.f32.s32 %v3194_v0  ;;  %v998_v33 = vcvt.f32.s32 %v3208_v60  ;;  %v2189_v0 = vpop.eup %2188 }
 0x230   :  { %v3385_v60 = vshll.u32 %v956_v9, 16 }
 0x231   :  { %1131 = vmax.xlane.f32.xlu1 %v1071_v63  ;;  %1133 = vmax.xlane.f32.xlu0 %v1072_v18  ;;  %v660_v63 = vpop.xlane.xlu1 %659  ;;  %v1886_v18 = vand.u32 65535, %v1885_v37  ;;  %v3377_v11 = vshll.u32 %v802_v58, 16 }
 0x233   :  { %v3350_v26 = vcvt.s32.f32 %v1886_v18  ;;  %v3353_v32 = vpop.xlane.xlu0 %1123  ;;  %v3359_v18 = vshll.u32 %v830_v54, 16 }
 0x234   :  { %5267 = vst [vmem:[#allocation67_spill] sm:$0xff] %v3353_v32 }
 0x235   :  { %1113 = vmax.xlane.f32.xlu1 %v1062_v36  ;;  %1127 = vmax.xlane.f32.xlu0 %v1069_v39  ;;  %v716_v62 = vpop.xlane.xlu1 %715  ;;  %v606_v36 = vcvt.f32.s32 %v3090_v29  ;;  %v5265_v39 = vld [vmem:[#allocation18_spill] sm:$0xff]  ;;  %v661_v29 = vcvt.f32.s32 %v660_v63  ;;  %5266 = vst [vmem:[#allocation60_spill] sm:$0xff] %v3350_v26 }
 0x236   :  { %v1146_v17 = vsub.s32 1, %v5265_v39  ;;  %v1162_v55 = vsub.s32 5, %v5265_v39  ;;  %v1150_v3 = vsub.s32 2, %v5265_v39  ;;  %v1158_v13 = vsub.s32 4, %v5265_v39 }
 0x237   :  { %v607_v53 = vshll.u32 %v606_v36, 16  ;;  %v717_v63 = vcvt.f32.s32 %v716_v62  ;;  %v3362_v46 = vadd.s32 %v663_v47, %v661_v29  ;;  %v3365_v30 = vadd.s32 16, %v5265_v39 }
 0x238   :  { %v3372_v27 = vadd.s32 8, %v5265_v39  ;;  %v677_v62 = vshll.u32 %v676_v8, 16  ;;  %v732_v36 = vcvt.f32.s32 %v3148_v19  ;;  %v3391_v19 = vshll.u32 %v816_v14, 16 }
 0x239   :  { %1121 = vmax.xlane.f32.xlu1 %v1066_v28  ;;  %1135 = vmax.xlane.f32.xlu0 %v1073_v5  ;;  %v3332_v49 = vpop.xlane.xlu1 %603  ;;  %v719_v5 = vshll.u32 %v718_v57, 16  ;;  %v3367_v57 = vshll.u32 %v634_v35, 16  ;;  %vm1216_vm12 = vcmp.eq.s32.totalorder %v3362_v46, 4  ;;  %v970_v8 = vcvt.f32.s32 %v3222_v25 }
 0x23a   :  { %v605_v47 = vcvt.f32.s32 %v3332_v49  ;;  %v1248_v49 = vsel %vm1216_vm12, %v5265_v39, 32 }
 0x23b   :  { %v3383_v29 = vadd.s32 %v719_v5, %v717_v63  ;;  %v87_v63 = vmul.f32 0.6931472, %v2189_v0  ;;  %v5268_v0 = vld [vmem:[#allocation55_spill] sm:$0xff] }
 0x23d   :  { %1129 = vmax.xlane.f32.xlu1 %v1070_v59  ;;  %1137 = vmax.xlane.f32.xlu0 %v1074_v6  ;;  %v688_v28 = vpop.xlane.xlu1 %687  ;;  %v691_v59 = vshll.u32 %v690_v7, 16  ;;  %vm1220_vm0 = vcmp.eq.s32.totalorder %v3383_v29, 4 }
 0x23e   :  { %v689_v6 = vcvt.f32.s32 %v688_v28  ;;  %v3379_v28 = vshll.u32 %v900_v43, 16  ;;  %v733_v43 = vshll.u32 %v732_v36, 16 }
 0x240   :  { %v3375_v7 = vadd.s32 %v691_v59, %v689_v6  ;;  %v3393_v59 = vshll.u32 %v998_v33, 16  ;;  %v620_v6 = vcvt.f32.s32 %v3156_v1  ;;  %v3406_v1 = vadd.s32 %v607_v53, %v605_v47  ;;  %v5269_v47 = vld [vmem:[#allocation69_spill] sm:$0xff] }
 0x241   :  { %1901 = vmax.xlane.f32.xlu1 %v1900_v12  ;;  %1890 = vmax.xlane.f32.xlu0 %v3324_v34  ;;  %v858_v12 = vcvt.f32.s32 %v3166_v21  ;;  %v786_v58 = vpop.xlane.xlu1 %785  ;;  %v1026_v33 = vcvt.f32.s32 %v3235_v22  ;;  %v1252_v22 = vsel %vm1220_vm0, %v5265_v39, 32 }
 0x242   :  { %vm1218_vm13 = vcmp.eq.s32.totalorder %v3375_v7, 4  ;;  %v787_v9 = vcvt.f32.s32 %v786_v58  ;;  %v3417_v58 = vadd.f32 %v87_v63, %v5269_v47  ;;  %vm5073_vm4 = vcmp.eq.s32.totalorder %v3406_v1, 4  ;;  %v5272_v63 = vld [vmem:[#allocation41_spill] sm:$0xff] }
 0x243   :  { %v3381_v54 = vshll.u32 %v858_v12, 16  ;;  %2190 = vlog2.f32 %v5272_v63  ;;  %v3436_v40 = vshll.u32 %v1026_v33, 16 }
 0x272   :  { %v674_v21 = vpop.xlane.xlu0 %673 }
 0x273   :  { %v675_v50 = vcvt.f32.s32 %v674_v21  ;;  %v621_v21 = vshll.u32 %v620_v6, 16 }
 0x275   :  { %v3389_v35 = vadd.s32 %v677_v62, %v675_v50  ;;  %v1250_v62 = vsel %vm1218_vm13, %v3365_v30, 32 }
 0x276   :  { %v730_v5 = vpop.xlane.xlu0 %729 }
 0x277   :  { %vm1217_vm14 = vcmp.eq.s32.totalorder %v3389_v35, 4  ;;  %v731_v12 = vcvt.f32.s32 %v730_v5  ;;  %v774_v5 = vcvt.f32.s32 %v5268_v0 }
 0x278   :  { %v1249_v25 = vsel %vm1217_vm14, %v3372_v27, 32 }
 0x279   :  { %vm1291_vm1 = vcmp.lt.s32.totalorder %v1248_v49, %v1249_v25  ;;  %v3408_v14 = vadd.s32 %v733_v43, %v731_v12  ;;  %v3428_v12 = vadd.s32 %v789_v23, %v787_v9  ;;  %v775_v37 = vshll.u32 %v774_v5, 16 }
 0x27a   :  { %v1292_v36 = vsel %vm1291_vm1, %v1248_v49, %v1249_v25  ;;  %v618_v50 = vpop.xlane.xlu0 %617  ;;  %v3432_v25 = vshll.u32 %v970_v8, 16  ;;  %v1040_v23 = vcvt.f32.s32 %v3261_v51  ;;  %v1244_v9 = vsel %vm5073_vm4, %v5265_v39, 32 }
 0x27b   :  { %vm1293_vm2 = vcmp.lt.s32.totalorder %v1292_v36, %v1250_v62  ;;  %vm5076_vm3 = vcmp.eq.s32.totalorder %v3408_v14, 4  ;;  %v619_v53 = vcvt.f32.s32 %v618_v50  ;;  %5270 = vst [vmem:[#allocation64_spill] sm:$0xff] %v3428_v12  ;;  %v5273_v50 = vld [vmem:[#allocation23_spill] sm:$0xff]  ;;  %vm5068_vm15 = vcmp.eq.s32.totalorder %v3428_v12, 4 }
 0x27c   :  { %v1253_v6 = vsel %vm5076_vm3, %v3372_v27, 32  ;;  %v3425_v43 = vsel %vm1293_vm2, %v1292_v36, %v1250_v62  ;;  %v746_v0 = vcvt.f32.s32 %v5273_v50  ;;  %v2329_v36 = vmov 0  }
 0x27d   :  { %vm1306_vm5 = vcmp.lt.s32.totalorder %v1252_v22, %v1253_v6  ;;  %v3430_v49 = vadd.s32 %v621_v21, %v619_v53  ;;  %v3449_v21 = vrot.slane %v3417_v58, %v1146_v17  ;;  %2049 = vset.pattern.permute.xlu0 %v2329_v36  ;;  %2050 = vset.pattern.permute.xlu1 %v2329_v36 }
 0x27e   :  { %v772_v47 = vpop.xlane.xlu0 %771  ;;  %v1307_v15 = vsel %vm1306_vm5, %v1252_v22, %v1253_v6  ;;  %v3457_v51 = vrot.slane %v3417_v58, %v1162_v55  ;;  %v3462_v5 = vrot.slane %v3417_v58, %v1150_v3  ;;  %v747_v17 = vshll.u32 %v746_v0, 16 }
 0x27f   :  { %5271 = vst [vmem:[#allocation40_spill] sm:$0xff] %v3430_v49  ;;  %vm5072_vm6 = vcmp.eq.s32.totalorder %v3430_v49, 4  ;;  %v773_v62 = vcvt.f32.s32 %v772_v47  ;;  %v3466_v47 = vshll.u32 %v1040_v23, 16  ;;  %v1257_v3 = vsel %vm5068_vm15, %v3372_v27, 32 }
 0x280   :  { %v1245_v8 = vsel %vm5072_vm6, %v3372_v27, 32  ;;  %5275 = vst [vmem:[#allocation72_spill] sm:$0xff] %v3457_v51 }
 0x281   :  { %vm1276_vm7 = vcmp.lt.s32.totalorder %v1244_v9, %v1245_v8  ;;  %v3452_v33 = vadd.s32 %v775_v37, %v773_v62  ;;  %v844_v37 = vcvt.f32.s32 %v3182_v38  ;;  %v5276_v62 = vld [vmem:[#allocation19_spill] sm:$0xff]  ;;  %v3481_v38 = vrot.slane %v3417_v58, %v1158_v13 }
 0x282   :  { %v744_v53 = vpop.xlane.xlu1 %743  ;;  %v828_v22 = vpop.xlane.xlu0 %827  ;;  %v1277_v6 = vsel %vm1276_vm7, %v1244_v9, %v1245_v8  ;;  %v3470_v55 = vrot.slane %v3417_v58, %v5276_v62  ;;  %v5279_v8 = vsub.s32 3, %v5265_v39 }
 0x283   :  { %5274 = vst [vmem:[#allocation71_spill] sm:$0xff] %v3452_v33  ;;  %vm5069_vm8 = vcmp.eq.s32.totalorder %v3452_v33, 4  ;;  %v745_v63 = vcvt.f32.s32 %v744_v53  ;;  %v829_v50 = vcvt.f32.s32 %v828_v22  ;;  %5277 = vst [vmem:[#allocation73_spill] sm:$0xff] %v3481_v38  ;;  %v704_v53 = vcvt.f32.s32 %v3190_v48  ;;  %v5283_v48 = vld [vmem:[#allocation43_spill] sm:$0xff] }
 0x284   :  { %v1256_v0 = vsel %vm5069_vm8, %v5265_v39, 32  ;;  %v3491_v36 = vrot.slane %v3417_v58, %v5279_v8  ;;  %v5280_v22 = vsub.s32 6, %v5265_v39  ;;  %vm3606_vm8 = vcmp.eq.s32.totalorder %v3372_v27, %v5250_v52 }
 0x285   :  { %vm1321_vm9 = vcmp.lt.s32.totalorder %v1256_v0, %v1257_v3  ;;  %v3483_v23 = vadd.s32 %v747_v17, %v745_v63  ;;  %v3486_v9 = vadd.s32 %v3359_v18, %v829_v50  ;;  %v845_v17 = vshll.u32 %v844_v37, 16  ;;  %v5282_v50 = vld [vmem:[#allocation42_spill] sm:$0xff] }
 0x286   :  { %v3497_v62 = vrot.slane %v3417_v58, %v5280_v22  ;;  %v842_v13 = vpop.xlane.xlu1 %841  ;;  %v632_v26 = vpop.xlane.xlu0 %631  ;;  %v1322_v34 = vsel %vm1321_vm9, %v1256_v0, %v1257_v3  ;;  %v705_v3 = vshll.u32 %v704_v53, 16  ;;  %v886_v0 = vcvt.f32.s32 %v3200_v42 }
 0x287   :  { %5278 = vst [vmem:[#allocation24_spill] sm:$0xff] %v3486_v9  ;;  %vm5075_vm10 = vcmp.eq.s32.totalorder %v3483_v23, 4  ;;  %v843_v18 = vcvt.f32.s32 %v842_v13  ;;  %v633_v63 = vcvt.f32.s32 %v632_v26  ;;  %vm5054_vm1 = vcmp.eq.s32.totalorder %v3486_v9, 4  ;;  %v5286_v13 = vld [vmem:[#allocation74_spill] sm:$0xff] }
 0x288   :  { %5281 = vst [vmem:[#allocation46_spill] sm:$0xff] %v3497_v62  ;;  %v1254_v22 = vsel %vm5075_vm10, %v3365_v30, 32  ;;  %v3520_v62 = vpop.eup %2190  ;;  %v3534_v53 = vadd.s32 24, %v5265_v39 }
 0x289   :  { %vm1308_vm11 = vcmp.lt.s32.totalorder %v1307_v15, %v1254_v22  ;;  %v3510_v37 = vadd.s32 %v845_v17, %v843_v18  ;;  %v3513_v26 = vadd.s32 %v3367_v57, %v633_v63  ;;  %v1260_v57 = vsel %vm5054_vm1, %v5265_v39, 32 }
 0x28a   :  { %v702_v32 = vpop.xlane.xlu1 %701  ;;  %v800_v24 = vpop.xlane.xlu0 %799  ;;  %v3518_v44 = vsel %vm1308_vm11, %v1307_v15, %v1254_v22  ;;  %v760_v22 = vcvt.f32.s32 %v3210_v10  ;;  %vm3631_vm4 = vcmp.eq.s32.totalorder %v3534_v53, %v5250_v52 }
 0x28b   :  { %5284 = vst [vmem:[#allocation20_spill] sm:$0xff] %v3510_v37  ;;  %5285 = vst [vmem:[#allocation27_spill] sm:$0xff] %v3513_v26  ;;  %vm5049_vm2 = vcmp.eq.s32.totalorder %v3510_v37, 4  ;;  %vm5070_vm5 = vcmp.eq.s32.totalorder %v3513_v26, 4  ;;  %v703_v17 = vcvt.f32.s32 %v702_v32  ;;  %v801_v18 = vcvt.f32.s32 %v800_v24 }
 0x28c   :  { %v1261_v42 = vsel %vm5049_vm2, %v3372_v27, 32  ;;  %v1246_v15 = vsel %vm5070_vm5, %v3365_v30, 32  ;;  %v887_v32 = vshll.u32 %v886_v0, 16 }
 0x28d   :  { %vm1336_vm7 = vcmp.lt.s32.totalorder %v1260_v57, %v1261_v42  ;;  %vm1278_vm9 = vcmp.lt.s32.totalorder %v1277_v6, %v1246_v15  ;;  %v3536_v63 = vadd.s32 %v705_v3, %v703_v17  ;;  %v3539_v24 = vadd.s32 %v3377_v11, %v801_v18  ;;  %v5289_v11 = vld [vmem:[#allocation77_spill] sm:$0xff] }
 0x28e   :  { %v884_v8 = vpop.xlane.xlu1 %883  ;;  %v898_v37 = vpop.xlane.xlu0 %897  ;;  %v3542_v9 = vsel %vm1336_vm7, %v1260_v57, %v1261_v42  ;;  %v3544_v51 = vsel %vm1278_vm9, %v1277_v6, %v1246_v15  ;;  %v942_v57 = vcvt.f32.s32 %v3218_v31 }
 0x28f   :  { %5287 = vst [vmem:[#allocation50_spill] sm:$0xff] %v3539_v24  ;;  %vm1219_vm11 = vcmp.eq.s32.totalorder %v3536_v63, 4  ;;  %vm5055_vm2 = vcmp.eq.s32.totalorder %v3539_v24, 4  ;;  %v885_v12 = vcvt.f32.s32 %v884_v8  ;;  %v899_v33 = vcvt.f32.s32 %v898_v37 }
 0x290   :  { %v1251_v10 = vsel %vm1219_vm11, %v3534_v53, 32  ;;  %v1258_v6 = vsel %vm5055_vm2, %v3365_v30, 32  ;;  %v761_v37 = vshll.u32 %v760_v22, 16  ;;  %v943_v22 = vshll.u32 %v942_v57, 16 }
 0x291   :  { %vm1295_vm7 = vcmp.lt.s32.totalorder %v3425_v43, %v1251_v10  ;;  %vm1323_vm9 = vcmp.lt.s32.totalorder %v1322_v34, %v1258_v6  ;;  %v3559_v18 = vadd.s32 %v887_v32, %v885_v12  ;;  %v3562_v8 = vadd.s32 %v3379_v28, %v899_v33 }
 0x292   :  { %v1296_v42 = vsel %vm1295_vm7, %v3425_v43, %v1251_v10  ;;  %v758_v15 = vpop.xlane.xlu1 %757  ;;  %v856_v17 = vpop.xlane.xlu0 %855  ;;  %v3566_v0 = vsel %vm1323_vm9, %v1322_v34, %v1258_v6  ;;  %v648_v12 = vcvt.f32.s32 %v3228_v16  ;;  %v5292_v34 = vld [vmem:[#allocation51_spill] sm:$0xff]  ;;  %v914_v33 = vcvt.f32.s32 %v3237_v56 }
 0x293   :  { %5290 = vst [vmem:[#allocation21_spill] sm:$0xff] %v3559_v18  ;;  %5291 = vst [vmem:[#allocation25_spill] sm:$0xff] %v3562_v8  ;;  %v1297_v3 = vrot.slane %v1296_v42, 4  ;;  %vm5067_vm1 = vcmp.eq.s32.totalorder %v3559_v18, 4  ;;  %vm5062_vm2 = vcmp.eq.s32.totalorder %v3562_v8, 4  ;;  %v759_v24 = vcvt.f32.s32 %v758_v15 }
 0x294   :  { %v1264_v28 = vsel %vm5067_vm1, %v5265_v39, 32  ;;  %v1265_v31 = vsel %vm5062_vm2, %v3372_v27, 32  ;;  %v857_v43 = vcvt.f32.s32 %v856_v17  ;;  %v649_v49 = vshll.u32 %v648_v12, 16 }
 0x295   :  { %vm1298_vm7 = vcmp.lt.s32.totalorder %v1296_v42, %v1297_v3  ;;  %vm1351_vm9 = vcmp.lt.s32.totalorder %v1264_v28, %v1265_v31  ;;  %v3579_v32 = vadd.s32 %v761_v37, %v759_v24  ;;  %vm3594_vm1 = vcmp.eq.s32.totalorder %v5265_v39, %v5250_v52 }
 0x296   :  { %v1299_v10 = vsel %vm1298_vm7, %v1296_v42, %v1297_v3  ;;  %v3582_v16 = vadd.s32 %v3381_v54, %v857_v43  ;;  %v940_v6 = vpop.xlane.xlu1 %939  ;;  %v954_v15 = vpop.xlane.xlu0 %953  ;;  %v3584_v18 = vsel %vm1351_vm9, %v1264_v28, %v1265_v31  ;;  %v5297_v37 = vmov 0 }
 0x297   :  { %v1300_v26 = vrot.slane %v1299_v10, 2  ;;  %vm5074_vm2 = vcmp.eq.s32.totalorder %v3579_v32, 4  ;;  %v941_v17 = vcvt.f32.s32 %v940_v6  ;;  %v955_v8 = vcvt.f32.s32 %v954_v15 }
 0x298   :  { %5293 = vst [vmem:[#allocation49_spill] sm:$0xff] %v3582_v16  ;;  %v1255_v24 = vsel %vm5074_vm2, %v3534_v53, 32  ;;  %vm5071_vm7 = vcmp.eq.s32.totalorder %v3582_v16, 4  ;;  %v5298_v37 = vsel %vm3606_vm8, 4294967295, %v5297_v37  ;;  %v5300_v43 = vmov 0 }
 0x299   :  { %vm1301_vm9 = vcmp.lt.s32.totalorder %v1299_v10, %v1300_v26  ;;  %vm1310_vm15 = vcmp.lt.s32.totalorder %v3518_v44, %v1255_v24  ;;  %v1262_v3 = vsel %vm5071_vm7, %v3365_v30, 32  ;;  %v3602_v56 = vadd.s32 %v943_v22, %v941_v17 }
 0x29a   :  { %v1302_v57 = vsel %vm1301_vm9, %v1299_v10, %v1300_v26  ;;  %v1311_v42 = vsel %vm1310_vm15, %v3518_v44, %v1255_v24  ;;  %vm1338_vm5 = vcmp.lt.s32.totalorder %v3542_v9, %v1262_v3  ;;  %v3613_v12 = vadd.s32 %v3385_v60, %v955_v8  ;;  %v646_v28 = vpop.xlane.xlu1 %645  ;;  %v814_v31 = vpop.xlane.xlu0 %813 }
 0x29b   :  { %5296 = vst [vmem:[#allocation28_spill] sm:$0xff] %v3602_v56  ;;  %vm3617_vm7 = vcmp.eq.s32.totalorder %v3365_v30, %v5250_v52  ;;  %v1303_v22 = vrot.slane %v1302_v57, 1  ;;  %v1312_v6 = vrot.slane %v1311_v42, 4  ;;  %vm5081_vm6 = vcmp.eq.s32.totalorder %v3602_v56, 4 }
 0x29c   :  { %5299 = vst [vmem:[#allocation53_spill] sm:$0xff] %v3613_v12  ;;  %v5301_v43 = vsel %vm3617_vm7, 4294967295, %v5300_v43  ;;  %v647_v26 = vcvt.f32.s32 %v646_v28  ;;  %vm5112_vm9 = vmmov 1   ;;  %v5304_v60 = vmov 0 }
 0x29d   :  { %vm3625_vm15 = vmxor %vm1216_vm12, %vm5112_vm9  ;;  %v5305_v60 = vsel %vm3631_vm4, 4294967295, %v5304_v60  ;;  %v3638_v8 = vsel %vm5081_vm6, %v5265_v39, 32  ;;  %vm5080_vm2 = vcmp.eq.s32.totalorder %v3613_v12, 4  ;;  %v815_v10 = vcvt.f32.s32 %v814_v31 }
 0x29e   :  { %v3642_v15 = vsel %vm1338_vm5, %v3542_v9, %v1262_v3  ;;  %vm3647_vm12 = vmxor %vm1218_vm13, %vm5112_vm9  ;;  %vm1304_vm10 = vcmp.lt.s32.totalorder %v1302_v57, %v1303_v22  ;;  %vm1313_vm3 = vcmp.lt.s32.totalorder %v1311_v42, %v1312_v6  ;;  %v3654_v24 = vsel %vm5080_vm2, %v3372_v27, 32  ;;  %v912_v16 = vpop.xlane.xlu1 %911 }
 0x29f   :  { %v3656_v28 = vadd.s32 %v649_v49, %v647_v26  ;;  %vm3661_vm5 = vmxor %vm1217_vm14, %vm5112_vm9  ;;  %v3665_v3 = vsel %vm1304_vm10, %v1302_v57, %v1303_v22  ;;  %v1314_v31 = vsel %vm1313_vm3, %v1311_v42, %v1312_v6  ;;  %v3670_v52 = vadd.s32 %v3391_v19, %v815_v10 }
 0x2a0   :  { %5310 = vst [vmem:[#allocation26_spill] sm:$0xff] %v3665_v3  ;;  %vm1400_vm2 = vcmp.le.s32.totalorder %v5265_v39, %v3665_v3  ;;  %vm1401_vm6 = vcmp.le.s32.totalorder %v3372_v27, %v3665_v3  ;;  %vm5084_vm14 = vcmp.le.s32.totalorder %v3365_v30, %v3665_v3  ;;  %vm3683_vm3 = vmxor %vm1219_vm11, %vm5112_vm9  ;;  %v915_v19 = vshll.u32 %v914_v33, 16 }
 0x2a1   :  { %v5313_v57 = vsub.f32 %v5286_v13, %v3449_v21  ;;  %v5314_v22 = vsub.f32 %v5282_v50, %v3449_v21  ;;  %v5315_v26 = vsub.f32 %v5289_v11, %v3449_v21  ;;  %vm3701_vm11 = vmand %vm1400_vm2, %vm3625_vm15  ;;  %v1315_v33 = vrot.slane %v1314_v31, 2  ;;  %v5335_v11 = vld [vmem:[#allocation76_spill] sm:$0xff] }
 0x2a2   :  { %vm3708_vm13 = vmxor %vm1220_vm0, %vm5112_vm9  ;;  %vm5087_vm15 = vcmp.eq.s32.totalorder %v3670_v52, 4  ;;  %vm5326_vm0 = vcmp.le.s32.totalorder %v3534_v53, %v3665_v3  ;;  %v928_v44 = vcvt.f32.s32 %v3263_v41 }
 0x2a3   :  { %v1432_v42 = vsel %vm1400_vm2, %v5313_v57, 0.0  ;;  %v1433_v6 = vsel %vm1401_vm6, %v5314_v22, 0.0  ;;  %v1434_v10 = vsel %vm5084_vm14, %v5315_v26, 0.0  ;;  %vm3714_vm10 = vmand %vm1401_vm6, %vm3661_vm5  ;;  %vm5086_vm2 = vcmp.eq.s32.totalorder %v3656_v28, 4 }
 0x2a4   :  { %v1469_v50 = vadd.f32 %v1433_v6, %v1432_v42  ;;  %vm5322_vm14 = vcmp.eq.s32.totalorder %v3408_v14, 4  ;;  %v5325_v57 = vsub.f32 %v5292_v34, %v3449_v21  ;;  %vm5327_vm6 = vcmp.le.s32.totalorder %v3365_v30, %v3665_v3 }
 0x2a5   :  { %vm3723_vm4 = vmxor %vm5322_vm14, %vm5112_vm9  ;;  %v1247_v22 = vsel %vm5086_vm2, %v3534_v53, 32  ;;  %v1259_v21 = vsel %vm5087_vm15, %v3534_v53, 32  ;;  %v913_v34 = vcvt.f32.s32 %v912_v16 }
 0x2a6   :  { %v1435_v9 = vsel %vm5326_vm0, %v5325_v57, 0.0  ;;  %vm3738_vm5 = vmand %vm5327_vm6, %vm3647_vm12  ;;  %v1470_v6 = vadd.f32 %v1469_v50, %v1434_v10  ;;  %vm1316_vm12 = vcmp.lt.s32.totalorder %v1314_v31, %v1315_v33  ;;  %vm1280_vm6 = vcmp.lt.s32.totalorder %v3544_v51, %v1247_v22  ;;  %v996_v50 = vpop.xlane.xlu0 %995  ;;  %v3771_v57 = vpop.xlane.xlu1 %1009 }
 0x2a7   :  { %vm5330_vm14 = vmmov %vm5326_vm0  ;;  %vm1325_vm2 = vcmp.lt.s32.totalorder %v3566_v0, %v1259_v21  ;;  %v1317_v16 = vsel %vm1316_vm12, %v1314_v31, %v1315_v33  ;;  %v3764_v49 = vsel %vm1280_vm6, %v3544_v51, %v1247_v22  ;;  %v3769_v10 = vadd.s32 %v915_v19, %v913_v34  ;;  %v5334_v33 = vld [vmem:[#allocation75_spill] sm:$0xff] }
 0x2a8   :  { %vm3753_vm0 = vmand %vm5330_vm14, %vm3683_vm3  ;;  %v3767_v26 = vsel %vm1325_vm2, %v3566_v0, %v1259_v21  ;;  %v3775_v56 = vadd.f32 %v1470_v6, %v1435_v9  ;;  %v1318_v12 = vrot.slane %v1317_v16, 1  ;;  %v5333_v0 = vld [vmem:[#allocation45_spill] sm:$0xff]  ;;  %v1188_v9 = vsub.f32 %v5334_v33, %v3462_v5  ;;  %v5336_v21 = vld [vmem:[#allocation47_spill] sm:$0xff] }
 0x2a9   :  { %vm1668_vm15 = vmand %vm3594_vm1, %vm3701_vm11  ;;  %v997_v42 = vcvt.f32.s32 %v996_v50  ;;  %vm5102_vm6 = vcmp.eq.s32.totalorder %v3769_v10, 4  ;;  %v1282_v13 = vrot.slane %v3764_v49, 4 }
 0x2aa   :  { %vm1669_vm3 = vmand %vm3606_vm8, %vm3714_vm10  ;;  %v1700_v51 = vsel %vm1668_vm15, %v3362_v46, 4294967295  ;;  %v1190_v46 = vsub.f32 %v5336_v21, %v3462_v5  ;;  %vm5337_vm10 = vnez %v5305_v60  ;;  %vm1319_vm14 = vcmp.lt.s32.totalorder %v1317_v16, %v1318_v12 }
 0x2ab   :  { %vm1670_vm11 = vmand %vm3617_vm7, %vm3738_vm5  ;;  %v1701_v19 = vsel %vm1669_vm3, %v3389_v35, 4294967295  ;;  %vm5338_vm5 = vcmp.eq.s32.totalorder %v3483_v23, 4  ;;  %v3807_v33 = vsel %vm1319_vm14, %v1317_v16, %v1318_v12  ;;  %v1012_v12 = vcvt.f32.s32 %v3243_v45 }
 0x2ac   :  { %vm1671_vm2 = vmand %vm5337_vm10, %vm3753_vm0  ;;  %vm1743_vm15 = vcmp.gt.s32.totalorder %v1700_v51, %v1701_v19  ;;  %v1702_v34 = vsel %vm1670_vm11, %v3375_v7, 4294967295  ;;  %5341 = vst [vmem:[#allocation29_spill] sm:$0xff] %v3807_v33  ;;  %vm1404_vm3 = vcmp.le.s32.totalorder %v5265_v39, %v3807_v33  ;;  %vm1405_vm10 = vcmp.le.s32.totalorder %v3372_v27, %v3807_v33 }
 0x2ad   :  { %vm3802_vm12 = vmxor %vm5338_vm5, %vm5112_vm9  ;;  %v1744_v6 = vsel %vm1743_vm15, %v1700_v51, %v1701_v19  ;;  %v1703_v17 = vsel %vm1671_vm2, %v3536_v63, 4294967295  ;;  %vm5342_vm5 = vcmp.eq.s32.totalorder %v3579_v32, 4  ;;  %vm1406_vm11 = vcmp.le.s32.totalorder %v3365_v30, %v3807_v33  ;;  %v968_v51 = vpop.xlane.xlu1 %967 }
 0x2ae   :  { %vm1745_vm0 = vcmp.gt.s32.totalorder %v1744_v6, %v1702_v34  ;;  %vm3818_vm7 = vmxor %vm5342_vm5, %vm5112_vm9  ;;  %vm1407_vm2 = vcmp.le.s32.totalorder %v3534_v53, %v3807_v33  ;;  %v1436_v63 = vsel %vm1404_vm3, %v1188_v9, 0.0  ;;  %v5347_v19 = vsub.f32 %v5283_v48, %v3462_v5 }
 0x2af   :  { %v1746_v7 = vsel %vm1745_vm0, %v1744_v6, %v1702_v34  ;;  %vm3828_vm15 = vmand %vm1404_vm3, %vm3708_vm13  ;;  %v872_v9 = vcvt.f32.s32 %v3253_v4  ;;  %v3856_v48 = vadd.s32 %v3393_v59, %v997_v42  ;;  %v1191_v4 = vsub.f32 %v3335_v20, %v3462_v5  ;;  %v870_v20 = vpop.xlane.xlu0 %869  ;;  %v5354_v5 = vld [vmem:[#allocation80_spill] sm:$0xff]  ;;  %v5355_v42 = vld [vmem:[#allocation78_spill] sm:$0xff] }
 0x2b0   :  { %vm1747_vm14 = vcmp.gt.s32.totalorder %v1746_v7, %v1703_v17  ;;  %v1437_v21 = vsel %vm1405_vm10, %v5347_v19, 0.0  ;;  %vm3838_vm0 = vmand %vm1405_vm10, %vm3723_vm4  ;;  %v1266_v41 = vsel %vm5102_vm6, %v3365_v30, 32  ;;  %vm1283_vm3 = vcmp.lt.s32.totalorder %v3764_v49, %v1282_v13 }
 0x2b1   :  { %v3844_v6 = vsel %vm1747_vm14, %v1746_v7, %v1703_v17  ;;  %v1478_v3 = vadd.f32 %v1437_v21, %v1436_v63  ;;  %vm3851_vm13 = vmand %vm1406_vm11, %vm3802_vm12  ;;  %v1438_v17 = vsel %vm1406_vm11, %v1190_v46, 0.0  ;;  %vm1353_vm12 = vcmp.lt.s32.totalorder %v3584_v18, %v1266_v41  ;;  %v1024_v21 = vpop.xlane.xlu1 %1023 }
 0x2b2   :  { %vm3869_vm4 = vmand %vm1407_vm2, %vm3818_vm7  ;;  %v1013_v7 = vshll.u32 %v1012_v12, 16  ;;  %v1439_v63 = vsel %vm1407_vm2, %v1191_v4, 0.0  ;;  %v873_v16 = vshll.u32 %v872_v9, 16  ;;  %vm5356_vm5 = vnez %v5301_v43 }
 0x2b3   :  { %v1479_v59 = vadd.f32 %v1478_v3, %v1438_v17  ;;  %vm1672_vm10 = vmand %vm3594_vm1, %vm3828_vm15  ;;  %vm5100_vm2 = vcmp.eq.s32.totalorder %v3856_v48, 4  ;;  %v929_v34 = vshll.u32 %v928_v44, 16  ;;  %vm5357_vm15 = vnez %v5305_v60 }
 0x2b4   :  { %vm1673_vm7 = vmand %vm3606_vm8, %vm3838_vm0  ;;  %v1704_v3 = vsel %vm1672_vm10, %v3383_v29, 4294967295  ;;  %v1327_v29 = vrot.slane %v3767_v26, 4  ;;  %v1011_v9 = vcvt.f32.s32 %v3771_v57  ;;  %v3910_v17 = vsel %vm1283_vm3, %v3764_v49, %v1282_v13  ;;  %v926_v13 = vpop.xlane.xlu0 %925 }
 0x2b5   :  { %v3894_v19 = vadd.f32 %v1479_v59, %v1439_v63  ;;  %vm1674_vm11 = vmand %vm5356_vm5, %vm3851_vm13  ;;  %v1705_v12 = vsel %vm1673_vm7, %v3408_v14, 4294967295  ;;  %v969_v14 = vcvt.f32.s32 %v968_v51  ;;  %v1272_v44 = vsel %vm5100_vm2, %v5265_v39, 32 }
 0x2b6   :  { %vm1675_vm14 = vmand %vm5357_vm15, %vm3869_vm4  ;;  %vm1758_vm0 = vcmp.gt.s32.totalorder %v1704_v3, %v1705_v12  ;;  %v1706_v45 = vsel %vm1674_vm11, %v3483_v23, 4294967295  ;;  %v3915_v35 = vadd.s32 %v1013_v7, %v1011_v9  ;;  %vm5358_vm4 = vcmp.lt.s32.totalorder %v3638_v8, %v3654_v24 }
 0x2b7   :  { %v1759_v4 = vsel %vm1758_vm0, %v1704_v3, %v1705_v12  ;;  %v1367_v57 = vsel %vm5358_vm4, %v3638_v8, %v3654_v24  ;;  %v1707_v23 = vsel %vm1675_vm14, %v3579_v32, 4294967295  ;;  %v3924_v49 = vadd.s32 %v3432_v25, %v969_v14  ;;  %v1038_v8 = vpop.xlane.xlu1 %1037 }
 0x2b8   :  { %vm1760_vm13 = vcmp.gt.s32.totalorder %v1759_v4, %v1706_v45  ;;  %v871_v51 = vcvt.f32.s32 %v870_v20  ;;  %vm5098_vm7 = vcmp.eq.s32.totalorder %v3915_v35, 4  ;;  %v1025_v63 = vcvt.f32.s32 %v1024_v21  ;;  %v982_v14 = vpop.xlane.xlu0 %981 }
 0x2b9   :  { %v1761_v59 = vsel %vm1760_vm13, %v1759_v4, %v1706_v45  ;;  %5359 = vst [vmem:[#allocation54_spill] sm:$0xff] %v3924_v49  ;;  %v1354_v7 = vsel %vm1353_vm12, %v3584_v18, %v1266_v41  ;;  %v1273_v32 = vsel %vm5098_vm7, %v3372_v27, 32  ;;  %vm5096_vm3 = vcmp.eq.s32.totalorder %v3924_v49, 4 }
 0x2ba   :  { %vm1762_vm10 = vcmp.gt.s32.totalorder %v1761_v59, %v1707_v23  ;;  %v3936_v25 = vadd.s32 %v873_v16, %v871_v51  ;;  %vm3939_vm11 = vcmp.lt.s32.totalorder %v3767_v26, %v1327_v29  ;;  %vm1381_vm14 = vcmp.lt.s32.totalorder %v1272_v44, %v1273_v32 }
 0x2bb   :  { %v3930_v3 = vsel %vm1762_vm10, %v1761_v59, %v1707_v23  ;;  %v1270_v18 = vsel %vm5096_vm3, %v3365_v30, 32  ;;  %v3947_v41 = vadd.s32 %v3436_v40, %v1025_v63  ;;  %v1382_v20 = vsel %vm1381_vm14, %v1272_v44, %v1273_v32  ;;  %v4050_v33 = vpop.xlane.xlu1 %1125 }
 0x2bc   :  { %vm1368_vm12 = vcmp.lt.s32.totalorder %v1367_v57, %v1270_v18  ;;  %vm5097_vm0 = vcmp.eq.s32.totalorder %v3936_v25, 4  ;;  %v927_v16 = vcvt.f32.s32 %v926_v13  ;;  %v984_v12 = vcvt.f32.s32 %v3269_v61 }
 0x2bd   :  { %5362 = vst [vmem:[#allocation30_spill] sm:$0xff] %v3947_v41  ;;  %v1263_v21 = vsel %vm5097_vm0, %v3534_v53, 32  ;;  %vm5093_vm13 = vcmp.eq.s32.totalorder %v3947_v41, 4  ;;  %v1039_v9 = vcvt.f32.s32 %v1038_v8  ;;  %v1285_v45 = vrot.slane %v3910_v17, 2 }
 0x2be   :  { %vm1340_vm4 = vcmp.lt.s32.totalorder %v3642_v15, %v1263_v21  ;;  %v1274_v40 = vsel %vm5093_vm13, %v3365_v30, 32  ;;  %v3960_v4 = vadd.s32 %v929_v34, %v927_v16  ;;  %v1329_v61 = vsel %vm3939_vm11, %v3767_v26, %v1327_v29 }
 0x2bf   :  { %v3966_v44 = vsel %vm1340_vm4, %v3642_v15, %v1263_v21  ;;  %vm1383_vm10 = vcmp.lt.s32.totalorder %v1382_v20, %v1274_v40  ;;  %v3969_v23 = vadd.s32 %v3466_v47, %v1039_v9  ;;  %v1369_v51 = vsel %vm1368_vm12, %v1367_v57, %v1270_v18 }
 0x2c0   :  { %5363 = vst [vmem:[#allocation57_spill] sm:$0xff] %v3960_v4  ;;  %vm5095_vm14 = vcmp.eq.s32.totalorder %v3960_v4, 4  ;;  %v1384_v59 = vsel %vm1383_vm10, %v1382_v20, %v1274_v40  ;;  %v1871_v34 = vmul.f32 0.6931472, %v3520_v62  ;;  %v985_v13 = vshll.u32 %v984_v12, 16  ;;  %v5365_v62 = vld [vmem:[#allocation81_spill] sm:$0xff] }
 0x2c1   :  { %5364 = vst [vmem:[#allocation22_spill] sm:$0xff] %v3969_v23  ;;  %v1267_v63 = vsel %vm5095_vm14, %v3534_v53, 32  ;;  %vm5094_vm11 = vcmp.eq.s32.totalorder %v3969_v23, 4  ;;  %v983_v15 = vcvt.f32.s32 %v982_v14  ;;  %vm1286_vm4 = vcmp.lt.s32.totalorder %v3910_v17, %v1285_v45  ;;  %v1082_v14 = vpop.xlane.xlu0 %1081  ;;  %v5381_v12 = vld [vmem:[#allocation27_spill] sm:$0xff] }
 0x2c2   :  { %v1330_v26 = vrot.slane %v1329_v61, 2  ;;  %vm1355_vm13 = vcmp.lt.s32.totalorder %v1354_v7, %v1267_v63  ;;  %v1275_v47 = vsel %vm5094_vm11, %v3534_v53, 32  ;;  %v5366_v32 = vsub.s32 7, %v5265_v39  ;;  %v5405_v23 = vld [vmem:[#allocation63_spill] sm:$0xff] }
 0x2c3   :  { %v1356_v29 = vsel %vm1355_vm13, %v1354_v7, %v1267_v63  ;;  %vm1385_vm12 = vcmp.lt.s32.totalorder %v1384_v59, %v1275_v47  ;;  %v3989_v20 = vadd.s32 %v985_v13, %v983_v15  ;;  %v1287_v40 = vsel %vm1286_vm4, %v3910_v17, %v1285_v45  ;;  %v5370_v63 = vld [vmem:[#allocation70_spill] sm:$0xff]  ;;  %v5388_v45 = vld [vmem:[#allocation71_spill] sm:$0xff]  ;;  %v5410_v13 = vld [vmem:[#allocation44_spill] sm:$0xff] }
 0x2c4   :  { %v3987_v8 = vrot.slane %v3417_v58, %v5366_v32  ;;  %v1357_v24 = vrot.slane %v1356_v29, 4  ;;  %v1386_v18 = vsel %vm1385_vm12, %v1384_v59, %v1275_v47  ;;  %v3997_v57 = vadd.f32 %v1871_v34, %v5370_v63  ;;  %v5377_v47 = vld [vmem:[#allocation40_spill] sm:$0xff] }
 0x2c5   :  { %5367 = vst [vmem:[#allocation31_spill] sm:$0xff] %v3989_v20  ;;  %v1387_v7 = vrot.slane %v1386_v18, 4  ;;  %vm3999_vm13 = vcmp.lt.s32.totalorder %v1329_v61, %v1330_v26  ;;  %vm5099_vm12 = vcmp.eq.s32.totalorder %v3989_v20, 4  ;;  %v1288_v59 = vrot.slane %v1287_v40, 1 }
 0x2c6   :  { %5371 = vst [vmem:[#allocation58_spill] sm:$0xff] %v3997_v57  ;;  %vm1358_vm10 = vcmp.lt.s32.totalorder %v1356_v29, %v1357_v24  ;;  %vm5374_vm11 = vcmp.eq.s32.totalorder %v3406_v1, 4  ;;  %v1271_v15 = vsel %vm5099_vm12, %v3534_v53, 32  ;;  %vm5378_vm4 = vcmp.eq.s32.totalorder %v5377_v47, 4  ;;  %v5404_v57 = vld [vmem:[#allocation72_spill] sm:$0xff] }
 0x2c7   :  { %vm4007_vm14 = vmxor %vm5374_vm11, %vm5112_vm9  ;;  %v1359_v34 = vsel %vm1358_vm10, %v1356_v29, %v1357_v24  ;;  %vm1370_vm11 = vcmp.lt.s32.totalorder %v1369_v51, %v1271_v15  ;;  %vm1289_vm0 = vcmp.lt.s32.totalorder %v1287_v40, %v1288_v59  ;;  %v1183_v9 = vsub.f32 %v1082_v14, %v3470_v55  ;;  %v5426_v29 = vld [vmem:[#allocation28_spill] sm:$0xff] }
 0x2c8   :  { %vm4019_vm3 = vmxor %vm5378_vm4, %vm5112_vm9  ;;  %v1360_v63 = vrot.slane %v1359_v34, 2  ;;  %vm5382_vm7 = vcmp.eq.s32.totalorder %v5381_v12, 4  ;;  %vm4031_vm12 = vcmp.lt.s32.totalorder %v1386_v18, %v1387_v7  ;;  %v1371_v50 = vsel %vm1370_vm11, %v1369_v51, %v1271_v15  ;;  %v5397_v51 = vld [vmem:[#allocation64_spill] sm:$0xff] }
 0x2c9   :  { %vm4027_vm10 = vmxor %vm5382_vm7, %vm5112_vm9  ;;  %v4035_v31 = vsel %vm1289_vm0, %v1287_v40, %v1288_v59  ;;  %v1332_v46 = vsel %vm3999_vm13, %v1329_v61, %v1330_v26  ;;  %vm5389_vm4 = vcmp.eq.s32.totalorder %v5388_v45, 4  ;;  %v5390_v14 = vmov 0  ;;  %v5406_v40 = vld [vmem:[#allocation50_spill] sm:$0xff]  ;;  %v5440_v61 = vld [vmem:[#allocation53_spill] sm:$0xff] }
 0x2ca   :  { %5387 = vst [vmem:[#allocation32_spill] sm:$0xff] %v4035_v31  ;;  %vm4042_vm2 = vmxor %vm5389_vm4, %vm5112_vm9  ;;  %vm4046_vm7 = vcmp.lt.s32.totalorder %v1359_v34, %v1360_v63  ;;  %v1372_v22 = vrot.slane %v1371_v50, 4  ;;  %vm1396_vm0 = vcmp.le.s32.totalorder %v5265_v39, %v4035_v31  ;;  %vm1397_vm13 = vcmp.le.s32.totalorder %v3372_v27, %v4035_v31  ;;  %v5457_v26 = vld [vmem:[#allocation21_spill] sm:$0xff] }
 0x2cb   :  { %v5391_v14 = vsel %vm4042_vm2, 4294967295, %v5390_v14  ;;  %vm5394_vm11 = vcmp.eq.s32.totalorder %v3656_v28, 4  ;;  %vm5398_vm6 = vcmp.eq.s32.totalorder %v5397_v51, 4  ;;  %v5401_v58 = vsub.f32 %v5335_v11, %v3470_v55 }
 0x2cc   :  { %vm4059_vm4 = vmxor %vm5394_vm11, %vm5112_vm9  ;;  %v4095_v11 = vsel %vm4031_vm12, %v1386_v18, %v1387_v7  ;;  %vm1373_vm5 = vcmp.lt.s32.totalorder %v1371_v50, %v1372_v22  ;;  %v5414_v4 = vrot.slane %v3844_v6, 4  ;;  %v5415_v21 = vmov 0  ;;  %v5570_v54 = vld [vmem:[#allocation31_spill] sm:$0xff] }
 0x2cd   :  { %vm4066_vm2 = vmxor %vm5398_vm6, %vm5112_vm9  ;;  %v1428_v59 = vsel %vm1396_vm0, %v5401_v58, 0.0  ;;  %vm5407_vm6 = vcmp.eq.s32.totalorder %v5406_v40, 4  ;;  %v5411_v58 = vsub.f32 %v5410_v13, %v3470_v55  ;;  %v1374_v18 = vsel %vm1373_vm5, %v1371_v50, %v1372_v22 }
 0x2ce   :  { %vm4080_vm11 = vmand %vm1396_vm0, %vm4007_vm14  ;;  %vm4109_vm0 = vcmp.gt.s32.totalorder %v3844_v6, %v5414_v4  ;;  %vm5417_vm12 = vcmp.le.s32.totalorder %v3365_v30, %v4035_v31  ;;  %v1333_v24 = vrot.slane %v1332_v46, 1  ;;  %v5423_v22 = vrot.slane %v3930_v3, 4 }
 0x2cf   :  { %vm4089_vm15 = vmxor %vm5407_vm6, %vm5112_vm9  ;;  %v1429_v2 = vsel %vm1397_vm13, %v5411_v58, 0.0  ;;  %v5416_v21 = vsel %vm4109_vm0, 4294967295, %v5415_v21  ;;  %v5424_v50 = vmov 0  ;;  %v1375_v13 = vrot.slane %v1374_v18, 2 }
 0x2d0   :  { %vm4102_vm14 = vmand %vm1397_vm13, %vm4019_vm3  ;;  %v1460_v7 = vadd.f32 %v1429_v2, %v1428_v59  ;;  %vm5420_vm3 = vcmp.eq.s32.totalorder %v3670_v52, 4  ;;  %v4131_v2 = vsel %vm4046_vm7, %v1359_v34, %v1360_v63  ;;  %vm4136_vm5 = vcmp.gt.s32.totalorder %v3930_v3, %v5423_v22 }
 0x2d1   :  { %vm4118_vm6 = vmand %vm5417_vm12, %vm4027_vm10  ;;  %v5425_v50 = vsel %vm4136_vm5, 4294967295, %v5424_v50  ;;  %vm5427_vm10 = vcmp.eq.s32.totalorder %v5426_v29, 4  ;;  %v5428_v59 = vmov 0  ;;  %v5430_v17 = vsub.f32 %v5354_v5, %v3470_v55 }
 0x2d2   :  { %vm4125_vm13 = vmxor %vm5420_vm3, %vm5112_vm9  ;;  %vm5431_vm7 = vcmp.le.s32.totalorder %v3365_v30, %v4035_v31  ;;  %vm5432_vm3 = vcmp.le.s32.totalorder %v3534_v53, %v4035_v31  ;;  %v5436_v22 = vrot.slane %v3966_v44, 4  ;;  %v5437_v55 = vmov 0 }
 0x2d3   :  { %vm4143_vm12 = vmxor %vm5427_vm10, %vm5112_vm9  ;;  %v1430_v34 = vsel %vm5431_vm7, %v5430_v17, 0.0  ;;  %v1390_v5 = vrot.slane %v4095_v11, 2  ;;  %vm5439_vm7 = vmmov 1   ;;  %vm5441_vm0 = vcmp.eq.s32.totalorder %v5440_v61, 4 }
 0x2d4   :  { %v5429_v59 = vsel %vm4143_vm12, 4294967295, %v5428_v59  ;;  %vm4158_vm5 = vmand %vm5432_vm3, %vm4059_vm4  ;;  %vm4168_vm9 = vcmp.lt.s32.totalorder %v3966_v44, %v5436_v22  ;;  %v1461_v16 = vadd.f32 %v1460_v7, %v1430_v34  ;;  %vm1376_vm12 = vcmp.lt.s32.totalorder %v1374_v18, %v1375_v13  ;;  %v1106_v22 = vpop.xlane.xlu1 %1105 }
 0x2d5   :  { %vm5435_vm10 = vmmov %vm5432_vm3  ;;  %v5438_v55 = vsel %vm4168_vm9, 4294967295, %v5437_v55  ;;  %v1363_v49 = vrot.slane %v4131_v2, 1  ;;  %v1377_v7 = vsel %vm1376_vm12, %v1374_v18, %v1375_v13  ;;  %v5454_v63 = vsub.f32 %v5355_v42, %v3491_v36 }
 0x2d6   :  { %v1431_v58 = vsel %vm5435_vm10, %v1183_v9, 0.0  ;;  %vm4176_vm4 = vmxor %vm5441_vm0, %vm5439_vm7  ;;  %vm1334_vm10 = vcmp.lt.s32.totalorder %v1332_v46, %v1333_v24  ;;  %vm5444_vm0 = vnez %v5301_v43  ;;  %v1378_v20 = vrot.slane %v1377_v7, 1 }
 0x2d7   :  { %vm1664_vm3 = vmand %vm3594_vm1, %vm4080_vm11  ;;  %v4189_v31 = vsel %vm1334_vm10, %v1332_v46, %v1333_v24  ;;  %v4197_v34 = vadd.f32 %v1461_v16, %v1431_v58  ;;  %v1195_v16 = vsub.f32 %v1106_v22, %v3491_v36  ;;  %v5465_v22 = vld [vmem:[#allocation46_spill] sm:$0xff] }
 0x2d8   :  { %vm1665_vm9 = vmand %vm3606_vm8, %vm4102_vm14  ;;  %v1696_v9 = vsel %vm1664_vm3, %v3406_v1, 4294967295  ;;  %vm1408_vm14 = vcmp.le.s32.totalorder %v5265_v39, %v4189_v31  ;;  %vm5445_vm3 = vnez %v5305_v60  ;;  %vm1409_vm8 = vcmp.le.s32.totalorder %v3372_v27, %v4189_v31  ;;  %v4380_v18 = vpop.xlane.xlu1 %1131 }
 0x2d9   :  { %vm1666_vm11 = vmand %vm5444_vm0, %vm4118_vm6  ;;  %v1697_v15 = vsel %vm1665_vm9, %v5377_v47, 4294967295  ;;  %vm5119_vm9 = vcmp.le.s32.totalorder %v3365_v30, %v4189_v31  ;;  %vm5446_vm6 = vnez %v5391_v14  ;;  %v1441_v58 = vsel %vm1409_vm8, %v5454_v63, 0.0 }
 0x2da   :  { %vm1667_vm10 = vmand %vm5445_vm3, %vm4158_vm5  ;;  %v1698_v1 = vsel %vm1666_vm11, %v5381_v12, 4294967295  ;;  %vm1728_vm12 = vcmp.gt.s32.totalorder %v1696_v9, %v1697_v15  ;;  %vm1379_vm5 = vcmp.lt.s32.totalorder %v1377_v7, %v1378_v20  ;;  %vm5120_vm3 = vcmp.le.s32.totalorder %v3534_v53, %v4189_v31 }
 0x2db   :  { %v1699_v46 = vsel %vm1667_vm10, %v3656_v28, 4294967295  ;;  %v1729_v47 = vsel %vm1728_vm12, %v1696_v9, %v1697_v15  ;;  %vm4214_vm0 = vmand %vm1408_vm14, %vm5446_vm6  ;;  %v5449_v28 = vsub.f32 %v5333_v0, %v3491_v36  ;;  %vm4230_vm12 = vcmp.lt.s32.totalorder %v4095_v11, %v1390_v5 }
 0x2dc   :  { %vm1730_vm11 = vcmp.gt.s32.totalorder %v1729_v47, %v1698_v1  ;;  %vm4225_vm10 = vmand %vm1409_vm8, %vm4066_vm2  ;;  %v4234_v24 = vsel %vm1379_vm5, %v1377_v7, %v1378_v20  ;;  %v5459_v9 = vmov 0  ;;  %v1472_v20 = vrot.slane %v3775_v56, 4 }
 0x2dd   :  { %v1440_v12 = vsel %vm1408_vm14, %v5449_v28, 0.0  ;;  %v1731_v13 = vsel %vm1730_vm11, %v1729_v47, %v1698_v1  ;;  %vm4244_vm2 = vmand %vm5119_vm9, %vm4089_vm15  ;;  %vm5458_vm14 = vcmp.eq.s32.totalorder %v5457_v26, 4  ;;  %vm5123_vm5 = vcmp.le.s32.totalorder %v5265_v39, %v4234_v24  ;;  %v5467_v1 = vld [vmem:[#allocation25_spill] sm:$0xff] }
 0x2de   :  { %vm4251_vm6 = vmxor %vm5458_vm14, %vm5439_vm7  ;;  %vm1732_vm11 = vcmp.gt.s32.totalorder %v1731_v13, %v1699_v46  ;;  %vm4269_vm14 = vcmp.lt.s32.totalorder %v4131_v2, %v1363_v49  ;;  %vm5468_vm9 = vcmp.eq.s32.totalorder %v5467_v1, 4  ;;  %v5471_v47 = vrot.slane %v3966_v44, 4 }
 0x2df   :  { %v5460_v9 = vsel %vm4251_vm6, 4294967295, %v5459_v9  ;;  %vm4264_vm15 = vmand %vm5120_vm3, %vm4125_vm13  ;;  %vm5472_vm13 = vnez %v5438_v55  ;;  %vm5473_vm3 = vnez %v5429_v59  ;;  %v4297_v15 = vsel %vm1732_vm11, %v1731_v13, %v1699_v46 }
 0x2e0   :  { %vm4279_vm8 = vmxor %vm5468_vm9, %vm5439_vm7  ;;  %v1344_v28 = vsel %vm5472_vm13, %v3966_v44, %v5471_v47  ;;  %v5476_v7 = vrot.slane %v3844_v6, 4  ;;  %vm5477_vm9 = vnez %v5416_v21  ;;  %v5478_v44 = vrot.slane %v3930_v3, 4 }
 0x2e1   :  { %vm4293_vm6 = vmand %vm5123_vm5, %vm5473_vm3  ;;  %vm5479_vm13 = vnez %v5425_v50  ;;  %vm5480_vm3 = vcmp.le.s32.totalorder %v3372_v27, %v4234_v24  ;;  %v1487_v46 = vadd.f32 %v1441_v58, %v1440_v12  ;;  %v1481_v21 = vrot.slane %v3894_v19, 4 }
 0x2e2   :  { %v4304_v38 = vsel %vm5477_vm9, %v3844_v6, %v5476_v7  ;;  %v4311_v59 = vsel %vm5479_vm13, %v3930_v3, %v5478_v44  ;;  %vm4318_vm11 = vmand %vm5480_vm3, %vm4176_vm4  ;;  %vm5483_vm9 = vcmp.eq.s32.totalorder %v3769_v10, 4  ;;  %v1392_v3 = vsel %vm4230_vm12, %v4095_v11, %v1390_v5  ;;  %v1120_v5 = vpop.xlane.xlu0 %1119  ;;  %v5495_v7 = vld [vmem:[#allocation52_spill] sm:$0xff] }
 0x2e3   :  { %vm4325_vm5 = vmxor %vm5483_vm9, %vm5439_vm7  ;;  %v5486_v50 = vsub.f32 %v5365_v62, %v3491_v36  ;;  %vm5487_vm13 = vcmp.le.s32.totalorder %v3365_v30, %v4189_v31  ;;  %vm5488_vm3 = vcmp.le.s32.totalorder %v3534_v53, %v4189_v31  ;;  %v4349_v11 = vsel %vm4269_vm14, %v4131_v2, %v1363_v49 }
 0x2e4   :  { %vm1688_vm4 = vmand %vm3594_vm1, %vm4293_vm6  ;;  %v1443_v12 = vsel %vm5488_vm3, %v1195_v16, 0.0  ;;  %v1345_v14 = vrot.slane %v1344_v28, 2  ;;  %vm5489_vm12 = vnez %v5298_v37  ;;  %vm5124_vm9 = vcmp.le.s32.totalorder %v5265_v39, %v4349_v11 }
 0x2e5   :  { %v1442_v17 = vsel %vm5487_vm13, %v5486_v50, 0.0  ;;  %vm1689_vm6 = vmand %vm5489_vm12, %vm4318_vm11  ;;  %v4356_v36 = vsel %vm1688_vm4, %v5426_v29, 4294967295  ;;  %v1767_v16 = vrot.slane %v4311_v59, 2  ;;  %vm5125_vm11 = vcmp.le.s32.totalorder %v3372_v27, %v4349_v11  ;;  %v5508_v50 = vld [vmem:[#allocation24_spill] sm:$0xff] }
 0x2e6   :  { %v1488_v62 = vadd.f32 %v1487_v46, %v1442_v17  ;;  %v4362_v13 = vsel %vm1689_vm6, %v5440_v61, 4294967295  ;;  %vm1676_vm14 = vmand %vm3594_vm1, %vm4214_vm0  ;;  %v1393_v49 = vrot.slane %v1392_v3, 1  ;;  %v1202_v61 = vsub.f32 %v1120_v5, %v5404_v57 }
 0x2e7   :  { %vm1677_vm13 = vmand %vm5489_vm12, %vm4225_vm10  ;;  %v1708_v29 = vsel %vm1676_vm14, %v5388_v45, 4294967295  ;;  %vm5490_vm0 = vcmp.eq.s32.totalorder %v3856_v48, 4  ;;  %v5491_v58 = vmov 0  ;;  %vm5493_vm6 = vnez %v5301_v43 }
 0x2e8   :  { %v4372_v2 = vadd.f32 %v1488_v62, %v1443_v12  ;;  %vm4385_vm3 = vmxor %vm5490_vm0, %vm5439_vm7  ;;  %v1709_v32 = vsel %vm1677_vm13, %v5397_v51, 4294967295  ;;  %v5494_v45 = vsub.f32 %v5405_v23, %v5404_v57  ;;  %v5496_v47 = vsub.f32 %v5495_v7, %v5404_v57  ;;  %v5517_v62 = vld [vmem:[#allocation20_spill] sm:$0xff] }
 0x2e9   :  { %v5492_v58 = vsel %vm4385_vm3, 4294967295, %v5491_v58  ;;  %vm1678_vm4 = vmand %vm5493_vm6, %vm4244_vm2  ;;  %vm4408_vm2 = vcmp.lt.s32.totalorder %v1344_v28, %v1345_v14  ;;  %vm5499_vm14 = vnez %v5305_v60  ;;  %vm1773_vm0 = vcmp.gt.s32.totalorder %v1708_v29, %v1709_v32 }
 0x2ea   :  { %v1448_v41 = vsel %vm5124_vm9, %v5494_v45, 0.0  ;;  %v1449_v0 = vsel %vm5125_vm11, %v5496_v47, 0.0  ;;  %vm1679_vm13 = vmand %vm5499_vm14, %vm4264_vm15  ;;  %v1710_v23 = vsel %vm1678_vm4, %v5406_v40, 4294967295  ;;  %vm5500_vm10 = vcmp.eq.s32.totalorder %v3915_v35, 4 }
 0x2eb   :  { %v1505_v51 = vadd.f32 %v1449_v0, %v1448_v41  ;;  %vm4420_vm9 = vmxor %vm5500_vm10, %vm5439_vm7  ;;  %v5501_v44 = vmov 0  ;;  %v1711_v55 = vsel %vm1679_vm13, %v3670_v52, 4294967295  ;;  %v1774_v46 = vsel %vm1773_vm0, %v1708_v29, %v1709_v32  ;;  %v1134_v41 = vpop.xlane.xlu0 %1133  ;;  %v5551_v52 = vld [vmem:[#allocation57_spill] sm:$0xff] }
 0x2ec   :  { %v5502_v44 = vsel %vm4420_vm9, 4294967295, %v5501_v44  ;;  %vm5503_vm11 = vnez %v5460_v9  ;;  %vm5504_vm3 = vcmp.le.s32.totalorder %v5265_v39, %v4349_v11  ;;  %vm5507_vm4 = vcmp.le.s32.totalorder %v3365_v30, %v4349_v11 }
 0x2ed   :  { %vm4430_vm15 = vmand %vm5504_vm3, %vm5503_vm11  ;;  %v1450_v40 = vsel %vm5507_vm4, %v1202_v61, 0.0  ;;  %vm1394_vm10 = vcmp.lt.s32.totalorder %v1392_v3, %v1393_v49  ;;  %vm5509_vm14 = vcmp.eq.s32.totalorder %v5508_v50, 4  ;;  %vm4445_vm13 = vcmp.gt.s32.totalorder %v4311_v59, %v1767_v16 }
 0x2ee   :  { %vm4440_vm9 = vmxor %vm5509_vm14, %vm5439_vm7  ;;  %vm1775_vm11 = vcmp.gt.s32.totalorder %v1774_v46, %v1710_v23  ;;  %vm5514_vm3 = vcmp.le.s32.totalorder %v3372_v27, %v4349_v11  ;;  %v4458_v12 = vadd.f32 %v1505_v51, %v1450_v40  ;;  %v4460_v5 = vsel %vm1394_vm10, %v1392_v3, %v1393_v49  ;;  %v5542_v40 = vld [vmem:[#allocation79_spill] sm:$0xff] }
 0x2ef   :  { %vm4454_vm0 = vmand %vm5514_vm3, %vm4279_vm8  ;;  %vm5518_vm14 = vcmp.eq.s32.totalorder %v5517_v62, 4  ;;  %v4470_v4 = vadd.f32 %v1472_v20, %v3775_v56  ;;  %v1752_v61 = vrot.slane %v4304_v38, 2  ;;  %v1776_v32 = vsel %vm1775_vm11, %v1774_v46, %v1710_v23  ;;  %v5524_v56 = vld [vmem:[#allocation49_spill] sm:$0xff] }
 0x2f0   :  { %vm4465_vm4 = vmxor %vm5518_vm14, %vm5439_vm7  ;;  %vm5521_vm8 = vcmp.le.s32.totalorder %v3365_v30, %v4349_v11  ;;  %v1347_v49 = vsel %vm4408_vm2, %v1344_v28, %v1345_v14  ;;  %v4485_v45 = vadd.f32 %v1481_v21, %v3894_v19  ;;  %vm5525_vm3 = vcmp.eq.s32.totalorder %v5524_v56, 4  ;;  %v1114_v19 = vpop.xlane.xlu1 %1113 }
 0x2f1   :  { %vm4478_vm10 = vmand %vm5521_vm8, %vm4325_vm5  ;;  %v1463_v6 = vrot.slane %v4197_v34, 4  ;;  %vm1777_vm11 = vcmp.gt.s32.totalorder %v1776_v32, %v1711_v55  ;;  %vm5127_vm2 = vcmp.le.s32.totalorder %v5265_v39, %v4460_v5  ;;  %v4504_v28 = vsel %vm4445_vm13, %v4311_v59, %v1767_v16 }
 0x2f2   :  { %vm4490_vm14 = vmxor %vm5525_vm3, %vm5439_vm7  ;;  %v4506_v21 = vsel %vm1777_vm11, %v1776_v32, %v1711_v55  ;;  %v1348_v7 = vrot.slane %v1347_v49, 1  ;;  %v5529_v47 = vmov 0  ;;  %v1205_v59 = vsub.f32 %v4050_v33, %v5465_v22  ;;  %v5544_v32 = vld [vmem:[#allocation48_spill] sm:$0xff] }
 0x2f3   :  { %vm1684_vm5 = vmand %vm3594_vm1, %vm4430_vm15  ;;  %vm5528_vm15 = vcmp.eq.s32.totalorder %v3936_v25, 4 }
 0x2f4   :  { %vm1685_vm8 = vmand %vm5489_vm12, %vm4454_vm0  ;;  %v1716_v14 = vsel %vm1684_vm5, %v5457_v26, 4294967295  ;;  %v1208_v26 = vsub.f32 %v4380_v18, %v3987_v8  ;;  %vm5126_vm0 = vcmp.le.s32.totalorder %v3372_v27, %v4460_v5  ;;  %vm5531_vm5 = vnez %v5492_v58  ;;  %v1122_v46 = vpop.xlane.xlu1 %1121 }
 0x2f5   :  { %vm4516_vm3 = vmxor %vm5528_vm15, %vm5439_vm7  ;;  %v1717_v16 = vsel %vm1685_vm8, %v5467_v1, 4294967295  ;;  %v1464_v1 = vadd.f32 %v1463_v6, %v4197_v34  ;;  %v5535_v34 = vld [vmem:[#allocation67_spill] sm:$0xff]  ;;  %v5577_v6 = vld [vmem:[#allocation22_spill] sm:$0xff] }
 0x2f6   :  { %v5530_v47 = vsel %vm4516_vm3, 4294967295, %v5529_v47  ;;  %vm1686_vm13 = vmand %vm5493_vm6, %vm4478_vm10  ;;  %vm1803_vm11 = vcmp.gt.s32.totalorder %v1716_v14, %v1717_v16  ;;  %vm1349_vm3 = vcmp.lt.s32.totalorder %v1347_v49, %v1348_v7  ;;  %vm5532_vm10 = vcmp.gt.s32.totalorder %v4356_v36, %v4362_v13 }
 0x2f7   :  { %v1718_v0 = vsel %vm1686_vm13, %v3769_v10, 4294967295  ;;  %vm1592_vm15 = vmand %vm5127_vm2, %vm5531_vm5  ;;  %v4542_v33 = vsel %vm5532_vm10, %v4356_v36, %v4362_v13  ;;  %v1804_v18 = vsel %vm1803_vm11, %v1716_v14, %v1717_v16  ;;  %v1209_v10 = vsub.f32 %v1134_v41, %v3987_v8  ;;  %v5534_v36 = vld [vmem:[#allocation73_spill] sm:$0xff] }
 0x2f8   :  { %vm1692_vm8 = vmand %vm3594_vm1, %vm1592_vm15  ;;  %v4548_v58 = vsel %vm1349_vm3, %v1347_v49, %v1348_v7  ;;  %vm5533_vm5 = vnez %v5502_v44  ;;  %v1199_v13 = vsub.f32 %v1114_v19, %v5534_v36  ;;  %v5536_v23 = vsub.f32 %v5535_v34, %v5465_v22  ;;  %v5538_v44 = vld [vmem:[#allocation54_spill] sm:$0xff]  ;;  %v1128_v7 = vpop.xlane.xlu0 %1127 }
 0x2f9   :  { %v1724_v63 = vsel %vm1692_vm8, %v3856_v48, 4294967295  ;;  %vm1593_vm10 = vmand %vm5126_vm0, %vm5533_vm5  ;;  %vm1412_vm11 = vcmp.le.s32.totalorder %v5265_v39, %v4548_v58  ;;  %vm5537_vm3 = vcmp.le.s32.totalorder %v5265_v39, %v4234_v24  ;;  %v1490_v48 = vrot.slane %v4372_v2, 4 }
 0x2fa   :  { %v1452_v51 = vsel %vm5537_vm3, %v5536_v23, 0.0  ;;  %vm1693_vm15 = vmand %vm5489_vm12, %vm1593_vm10  ;;  %vm1413_vm8 = vcmp.le.s32.totalorder %v3372_v27, %v4548_v58  ;;  %vm1414_vm5 = vcmp.le.s32.totalorder %v3365_v30, %v4548_v58  ;;  %vm5539_vm0 = vcmp.eq.s32.totalorder %v5538_v44, 4 }
 0x2fb   :  { %vm4575_vm2 = vmxor %vm5539_vm0, %vm5439_vm7  ;;  %v1725_v42 = vsel %vm1693_vm15, %v3915_v35, 4294967295  ;;  %vm1415_vm3 = vcmp.le.s32.totalorder %v3534_v53, %v4548_v58  ;;  %v5543_v9 = vsub.f32 %v5542_v40, %v5534_v36  ;;  %v5545_v3 = vsub.f32 %v5544_v32, %v5534_v36 }
 0x2fc   :  { %vm4590_vm0 = vmand %vm1412_vm11, %vm4440_vm9  ;;  %vm5548_vm10 = vcmp.le.s32.totalorder %v3372_v27, %v4234_v24  ;;  %v1465_v19 = vrot.slane %v1464_v1, 2  ;;  %vm5552_vm9 = vcmp.eq.s32.totalorder %v5551_v52, 4  ;;  %v5553_v16 = vmov 0 }
 0x2fd   :  { %v1444_v17 = vsel %vm1412_vm11, %v5543_v9, 0.0  ;;  %v1445_v49 = vsel %vm1413_vm8, %v5545_v3, 0.0  ;;  %v1453_v35 = vsel %vm5548_vm10, %v1205_v59, 0.0  ;;  %vm4599_vm13 = vmand %vm1413_vm8, %vm4465_vm4  ;;  %v1779_v34 = vrot.slane %v4506_v21, 4  ;;  %v5555_v59 = vld [vmem:[#allocation56_spill] sm:$0xff]  ;;  %v1136_v3 = vpop.xlane.xlu0 %1135 }
 0x2fe   :  { %v1496_v14 = vadd.f32 %v1445_v49, %v1444_v17  ;;  %vm4606_vm11 = vmxor %vm5552_vm9, %vm5439_vm7  ;;  %v5556_v23 = vsub.f32 %v5555_v59, %v5534_v36  ;;  %v1447_v40 = vsel %vm1415_vm3, %v1199_v13, 0.0  ;;  %v1203_v17 = vsub.f32 %v1122_v46, %v5404_v57  ;;  %v5563_v57 = vld [vmem:[#allocation30_spill] sm:$0xff]  ;;  %v1130_v49 = vpop.xlane.xlu1 %1129 }
 0x2ff   :  { %v5554_v16 = vsel %vm4606_vm11, 4294967295, %v5553_v16  ;;  %vm4625_vm4 = vmand %vm1414_vm5, %vm4490_vm14  ;;  %v4631_v36 = vadd.f32 %v1490_v48, %v4372_v2  ;;  %vm5559_vm8 = vnez %v5530_v47  ;;  %vm1419_vm14 = vcmp.le.s32.totalorder %v3534_v53, %v4349_v11 }
 0x300   :  { %v1446_v29 = vsel %vm1414_vm5, %v5556_v23, 0.0  ;;  %vm4638_vm10 = vmand %vm1415_vm3, %vm5559_vm8  ;;  %vm5562_vm5 = vcmp.gt.s32.totalorder %v1804_v18, %v1718_v0  ;;  %vm5564_vm9 = vcmp.eq.s32.totalorder %v5563_v57, 4  ;;  %vm5567_vm11 = vcmp.le.s32.totalorder %v5265_v39, %v4460_v5 }
 0x301   :  { %v1497_v32 = vadd.f32 %v1496_v14, %v1446_v29  ;;  %v1806_v13 = vsel %vm5562_vm5, %v1804_v18, %v1718_v0  ;;  %vm4648_vm15 = vmxor %vm5564_vm9, %vm5439_vm7  ;;  %v1456_v47 = vsel %vm5567_vm11, %v1208_v26, 0.0  ;;  %vm5568_vm3 = vcmp.le.s32.totalorder %v3372_v27, %v4460_v5  ;;  %v1138_v9 = vpop.xlane.xlu0 %1137 }
 0x302   :  { %v1457_v48 = vsel %vm5568_vm3, %v1209_v10, 0.0  ;;  %vm1680_vm8 = vmand %vm3594_vm1, %vm4590_vm0  ;;  %v1451_v0 = vsel %vm1419_vm14, %v1203_v17, 0.0  ;;  %vm5569_vm5 = vcmp.gt.s32.totalorder %v1724_v63, %v1725_v42  ;;  %vm1422_vm9 = vcmp.le.s32.totalorder %v3365_v30, %v4234_v24 }
 0x303   :  { %v4666_v18 = vsel %vm5569_vm5, %v1724_v63, %v1725_v42  ;;  %v1498_v46 = vadd.f32 %v1497_v32, %v1447_v40  ;;  %vm1681_vm11 = vmand %vm5489_vm12, %vm4599_vm13  ;;  %v1712_v39 = vsel %vm1680_vm8, %v5508_v50, 4294967295  ;;  %v1507_v27 = vadd.f32 %v4458_v12, %v1451_v0 }
 0x304   :  { %vm5571_vm1 = vcmp.eq.s32.totalorder %v5570_v54, 4  ;;  %v1514_v10 = vadd.f32 %v1453_v35, %v1452_v51  ;;  %v1734_v63 = vrot.slane %v4297_v15, 4  ;;  %vm4685_vm3 = vcmp.gt.s32.totalorder %v4506_v21, %v1779_v34  ;;  %vm1682_vm12 = vmand %vm5493_vm6, %vm4625_vm4  ;;  %v1902_v35 = vpop.xlane.xlu1 %1901 }
 0x305   :  { %vm4679_vm0 = vmxor %vm5571_vm1, %vm5439_vm7  ;;  %v1713_v50 = vsel %vm1681_vm11, %v5517_v62, 4294967295  ;;  %v4694_v12 = vadd.f32 %v1465_v19, %v1464_v1  ;;  %vm5576_vm13 = vnez %v5305_v60  ;;  %v1714_v51 = vsel %vm1682_vm12, %v5524_v56, 4294967295 }
 0x306   :  { %vm1683_vm8 = vmand %vm5576_vm13, %vm4638_vm10  ;;  %vm1788_vm5 = vcmp.gt.s32.totalorder %v1712_v39, %v1713_v50  ;;  %v1206_v42 = vsub.f32 %v1128_v7, %v5465_v22  ;;  %vm5578_vm1 = vcmp.eq.s32.totalorder %v5577_v6, 4  ;;  %v1492_v62 = vrot.slane %v4631_v36, 2 }
 0x307   :  { %vm4705_vm4 = vmxor %vm5578_vm1, %vm5439_vm7  ;;  %v1523_v1 = vadd.f32 %v1457_v48, %v1456_v47  ;;  %v1715_v19 = vsel %vm1683_vm8, %v3936_v25, 4294967295  ;;  %v1789_v14 = vsel %vm1788_vm5, %v1712_v39, %v1713_v50  ;;  %v4719_v56 = vsel %vm4685_vm3, %v4506_v21, %v1779_v34 }
 0x308   :  { %vm1590_vm10 = vmand %vm1422_vm9, %vm4575_vm2  ;;  %vm1790_vm7 = vcmp.gt.s32.totalorder %v1789_v14, %v1714_v51  ;;  %v1454_v25 = vsel %vm1422_vm9, %v1206_v42, 0.0  ;;  %vm1426_vm12 = vcmp.le.s32.totalorder %v3365_v30, %v4460_v5  ;;  %vm4731_vm2 = vcmp.gt.s32.totalorder %v4297_v15, %v1734_v63 }
 0x309   :  { %vm1690_vm11 = vmand %vm5493_vm6, %vm1590_vm10  ;;  %v1791_v21 = vsel %vm1790_vm7, %v1789_v14, %v1714_v51  ;;  %vm5583_vm3 = vnez %v5554_v16  ;;  %v1210_v7 = vsub.f32 %v1136_v3, %v3987_v8  ;;  %v1207_v34 = vsub.f32 %v1130_v49, %v5465_v22  ;;  %v5588_v14 = vld [vmem:[#allocation59_spill] sm:$0xff] }
 0x30a   :  { %v1722_v41 = vsel %vm1690_vm11, %v5538_v44, 4294967295  ;;  %vm1587_vm8 = vmand %vm1419_vm14, %vm5583_vm3  ;;  %v1499_v59 = vrot.slane %v1498_v46, 4  ;;  %vm1792_vm9 = vcmp.gt.s32.totalorder %v1791_v21, %v1715_v19  ;;  %vm1423_vm10 = vcmp.le.s32.totalorder %v3534_v53, %v4234_v24 }
 0x30b   :  { %vm1820_vm5 = vcmp.gt.s32.totalorder %v4542_v33, %v1722_v41  ;;  %vm1687_vm1 = vmand %vm5576_vm13, %vm1587_vm8  ;;  %v1793_v44 = vsel %vm1792_vm9, %v1791_v21, %v1715_v19  ;;  %v1515_v16 = vadd.f32 %v1514_v10, %v1454_v25  ;;  %v1508_v40 = vrot.slane %v1507_v27, 4  ;;  %v5589_v25 = vld [vmem:[#allocation60_spill] sm:$0xff] }
 0x30c   :  { %v1719_v23 = vsel %vm1687_vm1, %v5551_v52, 4294967295  ;;  %vm1594_vm14 = vmand %vm1426_vm12, %vm4648_vm15  ;;  %v1821_v22 = vsel %vm1820_vm5, %v4542_v33, %v1722_v41  ;;  %v1794_v29 = vrot.slane %v1793_v44, 4  ;;  %vm1427_vm3 = vcmp.le.s32.totalorder %v3534_v53, %v4460_v5 }
 0x30d   :  { %vm1807_vm7 = vcmp.gt.s32.totalorder %v1806_v13, %v1719_v23  ;;  %vm1694_vm11 = vmand %vm5493_vm6, %vm1594_vm14  ;;  %v1782_v52 = vrot.slane %v4719_v56, 2  ;;  %v1455_v20 = vsel %vm1423_vm10, %v1207_v34, 0.0  ;;  %v1500_v43 = vadd.f32 %v1499_v59, %v1498_v46 }
 0x30e   :  { %v1808_v17 = vsel %vm1807_vm7, %v1806_v13, %v1719_v23  ;;  %v1726_v32 = vsel %vm1694_vm11, %v5563_v57, 4294967295  ;;  %vm1591_vm15 = vmand %vm1423_vm10, %vm4679_vm0  ;;  %vm1795_vm6 = vcmp.gt.s32.totalorder %v1793_v44, %v1794_v29  ;;  %v1458_v2 = vsel %vm1426_vm12, %v1210_v7, 0.0 }
 0x30f   :  { %v1809_v33 = vrot.slane %v1808_v17, 4  ;;  %vm1691_vm8 = vmand %vm5576_vm13, %vm1591_vm15  ;;  %v1796_v13 = vsel %vm1795_vm6, %v1793_v44, %v1794_v29  ;;  %vm1835_vm9 = vcmp.gt.s32.totalorder %v4666_v18, %v1726_v32  ;;  %v1211_v47 = vsub.f32 %v1138_v9, %v3987_v8  ;;  %v4791_v8 = vpop.xlane.xlu0 %1890 }
 0x310   :  { %v1723_v57 = vsel %vm1691_vm8, %v5570_v54, 4294967295  ;;  %vm1595_vm0 = vmand %vm1427_vm3, %vm4705_vm4  ;;  %v1509_v48 = vadd.f32 %v1508_v40, %v1507_v27  ;;  %v1516_v0 = vadd.f32 %v1515_v16, %v1455_v20  ;;  %v1836_v30 = vsel %vm1835_vm9, %v4666_v18, %v1726_v32 }
 0x311   :  { %vm1822_vm5 = vcmp.gt.s32.totalorder %v1821_v22, %v1723_v57  ;;  %vm1695_vm12 = vmand %vm5576_vm13, %vm1595_vm0  ;;  %vm4786_vm1 = vcmp.gt.s32.totalorder %v4719_v56, %v1782_v52  ;;  %v1524_v39 = vadd.f32 %v1523_v1, %v1458_v2  ;;  %v1501_v10 = vrot.slane %v1500_v43, 2 }
 0x312   :  { %v1823_v54 = vsel %vm1822_vm5, %v1821_v22, %v1723_v57  ;;  %v1727_v26 = vsel %vm1695_vm12, %v5577_v6, 4294967295  ;;  %v1797_v37 = vrot.slane %v1796_v13, 2  ;;  %vm1810_vm4 = vcmp.gt.s32.totalorder %v1808_v17, %v1809_v33 }
 0x313   :  { %vm1837_vm10 = vcmp.gt.s32.totalorder %v1836_v30, %v1727_v26  ;;  %vm4796_vm13 = vcmp.gt.s32.totalorder %v4304_v38, %v1752_v61  ;;  %v1770_v18 = vrot.slane %v4504_v28, 1  ;;  %v1824_v27 = vrot.slane %v1823_v54, 4 }
 0x314   :  { %v4801_v50 = vsel %vm1837_vm10, %v1836_v30, %v1727_v26  ;;  %v1459_v51 = vsel %vm1427_vm3, %v1211_v47, 0.0  ;;  %v1736_v42 = vsel %vm4731_vm2, %v4297_v15, %v1734_v63  ;;  %v1467_v3 = vrot.slane %v4694_v12, 1 }
 0x315   :  { %v1510_v49 = vrot.slane %v1509_v48, 2  ;;  %v1517_v6 = vrot.slane %v1516_v0, 4  ;;  %v1493_v1 = vadd.f32 %v1492_v62, %v4631_v36  ;;  %v4818_v53 = vsel %vm4786_vm1, %v4719_v56, %v1782_v52  ;;  %v5592_v36 = vld [vmem:[#allocation58_spill] sm:$0xff] }
 0x316   :  { %v4820_v19 = vsel %vm1810_vm4, %v1808_v17, %v1809_v33  ;;  %vm1892_vm14 = vcmp.eq.f32.partialorder %v5588_v14, %v4791_v8  ;;  %v4824_v15 = vadd.f32 %v1501_v10, %v1500_v43  ;;  %vm1798_vm2 = vcmp.gt.s32.totalorder %v1796_v13, %v1797_v37 }
 0x317   :  { %v1525_v63 = vadd.f32 %v1524_v39, %v1459_v51  ;;  %v1893_v55 = vsel %vm1892_vm14, %v5589_v25, -inf  ;;  %vm4827_vm7 = vcmp.gt.s32.totalorder %v1823_v54, %v1824_v27  ;;  %v4832_v62 = vsub.f32 %v1902_v35, %v5592_v36 }
 0x318   :  { %1894 = vmax.xlane.f32.xlu1 %v1893_v55  ;;  %v1474_v56 = vrot.slane %v4470_v4, 2  ;;  %v1483_v41 = vrot.slane %v4485_v45, 2  ;;  %v1737_v7 = vrot.slane %v1736_v42, 2  ;;  %v4836_v34 = vadd.f32 %v1510_v49, %v1509_v48  ;;  %v5597_v49 = vld [vmem:[#allocation32_spill] sm:$0xff] }
 0x319   :  { %v1812_v59 = vrot.slane %v4820_v19, 2  ;;  %v4839_v44 = vadd.f32 %v1517_v6, %v1516_v0  ;;  %vm1848_vm11 = vcmask 1041409   ;;  %v1799_v16 = vsel %vm1798_vm2, %v1796_v13, %v1797_v37 }
 0x31a   :  { %v1839_v23 = vrot.slane %v4801_v50, 4  ;;  %v1475_v22 = vadd.f32 %v1474_v56, %v4470_v4  ;;  %v1484_v29 = vadd.f32 %v1483_v41, %v4485_v45  ;;  %vm1850_vm3 = vcmask 1042434  }
 0x31b   :  { %v1494_v40 = vrot.slane %v1493_v1, 1  ;;  %v1785_v9 = vrot.slane %v4818_v53, 1  ;;  %v1826_v52 = vsel %vm4827_vm7, %v1823_v54, %v1824_v27  ;;  %v1526_v17 = vrot.slane %v1525_v63, 4 }
 0x31c   :  { %v1503_v32 = vrot.slane %v4824_v15, 1  ;;  %v1476_v20 = vrot.slane %v1475_v22, 1  ;;  %v1905_v43 = vrot.slane %v4832_v62, 1  ;;  %v1485_v33 = vrot.slane %v1484_v29, 1 }
 0x31d   :  { %v1800_v2 = vrot.slane %v1799_v16, 1  ;;  %v1512_v13 = vrot.slane %v4836_v34, 1  ;;  %vm4853_vm15 = vcmp.gt.s32.totalorder %v4820_v19, %v1812_v59  ;;  %v1519_v45 = vrot.slane %v4839_v44, 2 }
 0x31e   :  { %v1827_v57 = vrot.slane %v1826_v52, 2  ;;  %vm4861_vm6 = vcmp.gt.s32.totalorder %v4801_v50, %v1839_v23  ;;  %v1477_v48 = vadd.f32 %v1476_v20, %v1475_v22  ;;  %v1906_v0 = vrot.slane %v4832_v62, 2 }
 0x31f   :  { %v4866_v30 = vadd.f32 %v1526_v17, %v1525_v63  ;;  %v1468_v46 = vadd.f32 %v1467_v3, %v4694_v12  ;;  %vm1738_vm8 = vcmp.gt.s32.totalorder %v1736_v42, %v1737_v7  ;;  %v1754_v39 = vsel %vm4796_vm13, %v4304_v38, %v1752_v61  ;;  %v5598_v61 = vld [vmem:[#allocation26_spill] sm:$0xff] }
 0x320   :  { %v1921_v54 = vadd.f32 %v1905_v43, %v1477_v48  ;;  %v1486_v26 = vadd.f32 %v1485_v33, %v1484_v29  ;;  %v1495_v10 = vadd.f32 %v1494_v40, %v1493_v1  ;;  %v1739_v37 = vsel %vm1738_vm8, %v1736_v42, %v1737_v7  ;;  %v5599_v42 = vld [vmem:[#allocation29_spill] sm:$0xff] }
 0x321   :  { %v1740_v27 = vrot.slane %v1739_v37, 1  ;;  %v1755_v51 = vrot.slane %v1754_v39, 1  ;;  %vm1771_vm9 = vcmp.gt.s32.totalorder %v4504_v28, %v1770_v18  ;;  %v1929_v6 = vcvt.s32.f32 %v5597_v49 }
 0x322   :  { %1946 = vperm.xlu0 %2049, %v1921_v54   ;;  %v1922_v12 = vadd.f32 %v1906_v0, %v1486_v26  ;;  %v1907_v3 = vrot.slane %v4832_v62, 3  ;;  %v1772_v38 = vsel %vm1771_vm9, %v4504_v28, %v1770_v18  ;;  %v1930_v60 = vcvt.s32.f32 %v5598_v61 }
 0x323   :  { %vm1741_vm0 = vcmp.gt.s32.totalorder %v1739_v37, %v1740_v27  ;;  %vm1756_vm5 = vcmp.gt.s32.totalorder %v1754_v39, %v1755_v51  ;;  %v1931_v35 = vcvt.s32.f32 %v5599_v42  ;;  %vm1786_vm12 = vcmp.gt.s32.totalorder %v4818_v53, %v1785_v9 }
 0x324   :  { %v1742_v1 = vsel %vm1741_vm0, %v1739_v37, %v1740_v27  ;;  %v1757_v14 = vsel %vm1756_vm5, %v1754_v39, %v1755_v51  ;;  %v1997_v63 = vsel %vm1848_vm11, %v1930_v60, %v1929_v6  ;;  %vm1852_vm1 = vcmask 1043459  }
 0x325   :  { %v1849_v25 = vsel %vm1848_vm11, %v1757_v14, %v1742_v1  ;;  %v1998_v55 = vsel %vm1850_vm3, %v1931_v35, %v1997_v63  ;;  %v1932_v21 = vcvt.s32.f32 %v4189_v31  ;;  %vm1854_vm4 = vcmask 1044484  }
 0x326   :  { %v1851_v28 = vsel %vm1850_vm3, %v1772_v38, %v1849_v25  ;;  %v1787_v18 = vsel %vm1786_vm12, %v4818_v53, %v1785_v9  ;;  %v1933_v36 = vcvt.s32.f32 %v4548_v58  ;;  %vm1856_vm10 = vcmask 1045509  }
 0x327   :  { %v1853_v56 = vsel %vm1852_vm1, %v1787_v18, %v1851_v28  ;;  %v1999_v41 = vsel %vm1852_vm1, %v1932_v21, %v1998_v55  ;;  %vm1858_vm13 = vcmask 1046534   ;;  %vm1801_vm14 = vcmp.gt.s32.totalorder %v1799_v16, %v1800_v2 }
 0x328   :  { %v2000_v7 = vsel %vm1854_vm4, %v1933_v36, %v1999_v41  ;;  %v1802_v22 = vsel %vm1801_vm14, %v1799_v16, %v1800_v2  ;;  %v1814_v31 = vsel %vm4853_vm15, %v4820_v19, %v1812_v59  ;;  %vm1828_vm2 = vcmp.gt.s32.totalorder %v1826_v52, %v1827_v57 }
 0x329   :  { %1950 = vperm.xlu1 %2050, %v1922_v12   ;;  %v1815_v53 = vrot.slane %v1814_v31, 1  ;;  %v1829_v58 = vsel %vm1828_vm2, %v1826_v52, %v1827_v57  ;;  %v1841_v29 = vsel %vm4861_vm6, %v4801_v50, %v1839_v23  ;;  %v1855_v40 = vsel %vm1854_vm4, %v1802_v22, %v1853_v56 }
 0x32a   :  { %v1830_v9 = vrot.slane %v1829_v58, 1  ;;  %v1842_v16 = vrot.slane %v1841_v29, 2  ;;  %v1934_v17 = vcvt.s32.f32 %v4349_v11  ;;  %v1935_v20 = vcvt.s32.f32 %v4234_v24 }
 0x32b   :  { %v1920_v19 = vadd.f32 %v4832_v62, %v1468_v46  ;;  %vm1860_vm7 = vcmask 1047559   ;;  %vm1816_vm15 = vcmp.gt.s32.totalorder %v1814_v31, %v1815_v53  ;;  %v1936_v59 = vcvt.s32.f32 %v4460_v5 }
 0x32c   :  { %v1817_v52 = vsel %vm1816_vm15, %v1814_v31, %v1815_v53  ;;  %vm1831_vm8 = vcmp.gt.s32.totalorder %v1829_v58, %v1830_v9  ;;  %vm1843_vm9 = vcmp.gt.s32.totalorder %v1841_v29, %v1842_v16  ;;  %v2001_v43 = vsel %vm1856_vm10, %v1934_v17, %v2000_v7 }
 0x32d   :  { %1942 = vperm.xlu1 %2050, %v1920_v19   ;;  %v1832_v50 = vsel %vm1831_vm8, %v1829_v58, %v1830_v9  ;;  %v1844_v23 = vsel %vm1843_vm9, %v1841_v29, %v1842_v16  ;;  %v1857_v33 = vsel %vm1856_vm10, %v1817_v52, %v1855_v40  ;;  %v2002_v11 = vsel %vm1858_vm13, %v1935_v20, %v2001_v43 }
 0x32e   :  { %v1520_v24 = vadd.f32 %v1519_v45, %v4839_v44  ;;  %v1845_v2 = vrot.slane %v1844_v23, 1  ;;  %v1859_v4 = vsel %vm1858_vm13, %v1832_v50, %v1857_v33  ;;  %v4918_v5 = vsel %vm1860_vm7, %v1936_v59, %v2002_v11 }
 0x32f   :  { %v1528_v57 = vrot.slane %v4866_v30, 2  ;;  %v1923_v47 = vadd.f32 %v1907_v3, %v1495_v10  ;;  %v1504_v48 = vadd.f32 %v1503_v32, %v4824_v15  ;;  %v1908_v0 = vrot.slane %v4832_v62, 4 }
 0x330   :  { %vm1846_vm6 = vcmp.gt.s32.totalorder %v1844_v23, %v1845_v2  ;;  %v1521_v45 = vrot.slane %v1520_v24, 1  ;;  %v1513_v26 = vadd.f32 %v1512_v13, %v4836_v34  ;;  %v1909_v10 = vrot.slane %v4832_v62, 5 }
 0x331   :  { %1954 = vperm.xlu1 %2050, %v1923_v47   ;;  %v1847_v46 = vsel %vm1846_vm6, %v1844_v23, %v1845_v2  ;;  %v1529_v39 = vadd.f32 %v1528_v57, %v4866_v30  ;;  %v1924_v54 = vadd.f32 %v1908_v0, %v1504_v48  ;;  %v1910_v27 = vrot.slane %v4832_v62, 6 }
 0x332   :  { %v1861_v44 = vsel %vm1860_vm7, %v1847_v46, %v1859_v4  ;;  %v1925_v32 = vadd.f32 %v1909_v10, %v1513_v26  ;;  %v1522_v37 = vadd.f32 %v1521_v45, %v1520_v24  ;;  %v1911_v30 = vrot.slane %v4832_v62, 7 }
 0x333   :  { %1862 = vst [vmem:[#allocation10] sm:$0xff] %v1861_v44  ;;  %v1530_v15 = vrot.slane %v1529_v39, 1 }
 0x334   :  { %v1926_v51 = vadd.f32 %v1910_v27, %v1522_v37 }
 0x335   :  { %1958 = vperm.xlu1 %2050, %v1924_v54   ;;  %v1531_v49 = vadd.f32 %v1530_v15, %v1529_v39 }
 0x337   :  { %v1927_v6 = vadd.f32 %v1911_v30, %v1531_v49 }
 0x339   :  { %1962 = vperm.xlu1 %2050, %v1925_v32  }
 0x33d   :  { %1966 = vperm.xlu1 %2050, %v1926_v51  }
 0x341   :  { %1970 = vperm.xlu1 %2050, %v1927_v6  }
 0x342   :  { %2283 = shalt.err (!%p2280_p10)
}
 0x343   :  { %2016 = dma.vmem_to_hbm [thread:$0]  %s2014_s3, 128, %s4955_s4, [#allocation4]   ;;  %v1897_v60 = vcvt.f32.s32 %v4791_v8  ;;  %v5600_v31 = vld [vmem:[#allocation39_spill] sm:$0xff] }
 0x344   :  { %vm1939_vm0 = vcmp.eq.s32.totalorder %v5600_v31, 2  ;;  %s2332_s4 = smov [#allocation11]  }
 0x345   :  { %v1898_v21 = vshll.u32 %v1897_v60, 16  ;;  %s2023_s16 = sshll.u32 %s2332_s4, 4  ;;  %s2024_s16 = int_to_ptr.vmem [resolvable:$true] %s2023_s16 }
 0x346   :  { %s2292_s17 = scalar_lea.vmem %s2024_s16, 128  ;;  %p2297_p12 = scmp.lt.s32.totalorder %s2024_s16, %s2024_s16 }
 0x347   :  { %p2293_p11 = scmp.ne.s32.totalorder %s2024_s16, %s2292_s17  ;;  %p2298_p13 = scmp.lt.s32.totalorder %s2292_s17, %s2292_s17 }
 0x349   :  { %p2299_p0 = por %p2298_p13, %p2297_p12 }
 0x34b   :  { %p2300_p1 = pnand %p2299_p0, %p2293_p11 }
 0x39d   :  { %v1947_v38 = vpop.permute.xlu0 %1946 }
 0x39e   :  { %v1972_v42 = vrot.slane %v1947_v38, 7 }
 0x3a1   :  { %v1895_v34 = vpop.xlane.xlu1 %1894 }
 0x3a2   :  { %v1896_v35 = vcvt.f32.s32 %v1895_v34 }
 0x3a4   :  { %v1899_v56 = vadd.s32 %v1898_v21, %v1896_v35 }
 0x3a5   :  { %v1951_v13 = vpop.permute.xlu1 %1950 }
 0x3a6   :  { %v1974_v63 = vrot.slane %v1951_v13, 6  ;;  %v1938_v29 = vcvt.s32.f32 %v1899_v56 }
 0x3a9   :  { %v1943_v12 = vpop.permute.xlu1 %1942 }
 0x3aa   :  { %v1973_v1 = vsel %vm1848_vm11, %v1972_v42, %v1943_v12  ;;  %vm1937_vm11 = vcmp.eq.s32.totalorder %v5600_v31, 1 }
 0x3ab   :  { %v1975_v18 = vsel %vm1850_vm3, %v1974_v63, %v1973_v1  ;;  %vm1928_vm3 = vcmp.eq.s32.totalorder %v5600_v31, 0 }
 0x3ad   :  { %v1955_v62 = vpop.permute.xlu1 %1954 }
 0x3ae   :  { %v1976_v14 = vrot.slane %v1955_v62, 5 }
 0x3b0   :  { %v1977_v41 = vsel %vm1852_vm1, %v1976_v14, %v1975_v18 }
 0x3b1   :  { %v1959_v3 = vpop.permute.xlu1 %1958 }
 0x3b2   :  { %v1978_v25 = vrot.slane %v1959_v3, 4 }
 0x3b4   :  { %v1979_v7 = vsel %vm1854_vm4, %v1978_v25, %v1977_v41 }
 0x3b5   :  { %v1963_v61 = vpop.permute.xlu1 %1962 }
 0x3b6   :  { %v1980_v28 = vrot.slane %v1963_v61, 3 }
 0x3b8   :  { %v1981_v8 = vsel %vm1856_vm10, %v1980_v28, %v1979_v7 }
 0x3b9   :  { %v1967_v55 = vpop.permute.xlu1 %1966 }
 0x3ba   :  { %v1982_v36 = vrot.slane %v1967_v55, 2 }
 0x3bc   :  { %v1983_v58 = vsel %vm1858_vm13, %v1982_v36, %v1981_v8 }
 0x3bd   :  { %v1971_v22 = vpop.permute.xlu1 %1970 }
 0x3be   :  { %v1984_v53 = vrot.slane %v1971_v22, 1 }
 0x3c0   :  { %v1985_v40 = vsel %vm1860_vm7, %v1984_v53, %v1983_v58 }
 0x3c1   :  { %v1987_v9 = vsel %vm1939_vm0, %v1985_v40, 0.0 }
 0x3c2   :  { %v1988_v16 = vsel %vm1937_vm11, %v1938_v29, %v1987_v9 }
 0x3c3   :  { %v2005_v17 = vsel %vm1928_vm3, %v4918_v5, %v1988_v16 }
 0x3c4   :  { %2006 = vst [vmem:[#allocation11] sm:$0xff] %v2005_v17 }
 0x3c5   :  { %2303 = shalt.err (!%p2300_p1)
}
 0x3c6   :  { %2026 = dma.vmem_to_hbm [thread:$0]  %s2024_s16, 128, %s4956_s5, [#allocation12]  }
 0x3c7   :  { %2318 = dma.done.wait [#allocation4], 128  }
 0x3c8   :  { %2319 = vsyncadd [#allocation4], 4294967168 }
 0x3c9   :  { %2320 = dma.done.wait [#allocation12], 128  }
 0x3ca   :  { %2321 = vsyncadd [#allocation12], 4294967168 }
 0x3cb   :  { %2033 = vsyncpa [#allocation3], 1 }
 0x3cc   :  { %2034 = vsyncpa [#allocation6], 1 }
 0x3cd   :  { %2035 = vsyncpa [#allocation9], 1 }
 0x3ce   :  { %2036 = vsyncpa [#allocation4], 1 }
 0x3cf   :  { %2037 = vsyncpa [#allocation12], 1 }

</bundles_post_ra>
